<compile_context>
chip_gen: v7x
topology: tpu7x:2x2x1
jax: 0.10.0
libtpu: 0.0.40
codegen_flags: <defaults>
</compile_context>

<pallas_src>
import math
import functools

import jax
import jax.numpy as jnp
from jax import lax
from jax.experimental import pallas as pl
from jax.experimental.pallas import tpu as pltpu

_VMEM_LIMIT = 32 * 1024 * 1024  # well under v7x's 64 MiB physical VMEM


# ----------------------------------------------------------------------------
# small helpers
# ----------------------------------------------------------------------------
def _round_up(x, m):
    return ((x + m - 1) // m) * m


def _pick_batch_block(b, cap=8):
    # largest divisor of b that is <= cap (per-step footprint here is << 1 MiB,
    # so cap=8 is safely inside VMEM on every generation)
    for bt in range(min(b, cap), 0, -1):
        if b % bt == 0:
            return bt
    return 1


def _patch_dtype(c):
    # bf16 packs 2 rows per 32-bit sublane word; keep per-tap sublane stores
    # aligned by falling back to f32 when the channel count is not a multiple
    # of the bf16 packing (e.g. Cin=4 for the first conv).
    return jnp.bfloat16 if c % 16 == 0 else jnp.float32


# ----------------------------------------------------------------------------
# in-kernel elementwise helpers (all f32)
# ----------------------------------------------------------------------------
def _erf_f32(x):
    # Abramowitz & Stegun 7.1.26 rational approximation, |err| < 1.5e-7.
    a1, a2, a3, a4, a5 = 0.254829592, -0.284496736, 1.421413741, -1.453152027, 1.061405429
    p = 0.3275911
    s = jnp.where(x >= 0.0, 1.0, -1.0)
    z = jnp.abs(x)
    # divide moved to the (otherwise idle) EUP slot
    t = pl.reciprocal(1.0 + p * z, approx=True)
    poly = ((((a5 * t + a4) * t + a3) * t + a2) * t + a1) * t
    return s * (1.0 - poly * jnp.exp(-z * z))


def _gelu_exact(x):
    # PyTorch nn.GELU() default (approximate='none'): 0.5*x*(1+erf(x/sqrt(2)))
    return 0.5 * x * (1.0 + _erf_f32(x * (1.0 / math.sqrt(2.0))))


def _groupnorm(v, valid, inv_n, gamma, beta, eps):
    # v: (C, M) f32, valid: (1, M) {0,1} mask of real pixels, gamma/beta: (C, 1)
    # GroupNorm(num_groups=1): stats over all channels and valid spatial pixels.
    # Two-pass (mean, then sum((x-mean)^2)) to avoid E[x^2]-E[x]^2 cancellation.
    vm = v * valid
    mean = jnp.sum(jnp.sum(vm, axis=1, keepdims=True), axis=0, keepdims=True) * inv_n
    d = (v - mean) * valid
    var = jnp.sum(jnp.sum(d * d, axis=1, keepdims=True), axis=0, keepdims=True) * inv_n
    return (v - mean) * lax.rsqrt(var + eps) * gamma + beta


# ----------------------------------------------------------------------------
# fused DoubleConv kernel (Bt batch images per grid step)
# ----------------------------------------------------------------------------
def _double_conv_kernel(x_ref, w1_ref, g1_ref, b1_ref, w2_ref, g2_ref, b2_ref,
                        valid_ref, o_ref, h1pad_ref, p1_ref, p2_ref,
                        *, n_img, H, W, M, P, residual, eps):
    # x_ref    : (Bt, Cin, P)  bf16, flat zero-padded image per channel (lane axis)
    # w1_ref   : (Cmid, 9*Cin) bf16 ; w2_ref : (Cout, 9*Cmid) bf16
    # g*/b*    : (C, 1) f32 ; valid_ref : (1, M) f32 (1 on real pixels, 0 on halo cols)
    # o_ref    : (Bt, Cout, M) f32
    # h1pad_ref: (Cmid, P) bf16  padded intermediate (VMEM scratch)
    # p1_ref   : (9*Cin, M)  im2col patches for conv1 ; p2_ref : (9*Cmid, M) for conv2
    Wp = W + 2
    base = Wp + 1                       # flat offset of padded position (1, 1)
    cin = x_ref.shape[1]
    cmid = w1_ref.shape[0]
    cout = w2_ref.shape[0]

    valid = valid_ref[...]
    inv_n1 = 1.0 / float(cmid * H * W)
    inv_n2 = 1.0 / float(cout * H * W)

    # Zero only the halo border of the padded-intermediate scratch (~12% of it);
    # the interior is fully overwritten each image (garbage columns masked to 0).
    h1pad_ref[:, :base] = jnp.zeros((cmid, base), jnp.bfloat16)
    h1pad_ref[:, base + M:] = jnp.zeros((cmid, P - base - M), jnp.bfloat16)

    for b in range(n_img):
        xb = x_ref[b]                                            # (Cin, P) bf16

        # ---- conv1: single im2col matmul (Cmid, 9*Cin) x (9*Cin, M) ----
        for t in range(9):
            dh, dw = divmod(t, 3)
            off = dh * Wp + dw
            p1_ref[t * cin:(t + 1) * cin, :] = xb[:, off:off + M].astype(p1_ref.dtype)
        a1 = jnp.dot(w1_ref[...], p1_ref[...].astype(jnp.bfloat16),
                     preferred_element_type=jnp.float32)          # (Cmid, M) f32
        h1 = _gelu_exact(_groupnorm(a1, valid, inv_n1, g1_ref[...], b1_ref[...], eps))

        # masked intermediate -> interior of the padded scratch (halo cols -> 0)
        h1pad_ref[:, base:base + M] = (h1 * valid).astype(jnp.bfloat16)

        # ---- conv2: single im2col matmul (Cout, 9*Cmid) x (9*Cmid, M) ----
        h1p = h1pad_ref[...]                                      # (Cmid, P) bf16
        for t in range(9):
            dh, dw = divmod(t, 3)
            off = dh * Wp + dw
            p2_ref[t * cmid:(t + 1) * cmid, :] = h1p[:, off:off + M].astype(p2_ref.dtype)
        a2 = jnp.dot(w2_ref[...], p2_ref[...].astype(jnp.bfloat16),
                     preferred_element_type=jnp.float32)          # (Cout, M) f32
        y = _groupnorm(a2, valid, inv_n2, g2_ref[...], b2_ref[...], eps)

        if residual:  # F.gelu(x + double_conv(x)); requires cin == cout
            y = _gelu_exact(xb[:, base:base + M].astype(jnp.float32) + y)

        o_ref[b] = y


# ----------------------------------------------------------------------------
# wrapper: layout glue + pallas_call
# ----------------------------------------------------------------------------
def _double_conv_impl(x_nchw, params, residual=False):
    w1, w2 = params["w1"], params["w2"]                 # PyTorch (Cout, Cin, 3, 3)
    B, cin, H, W = x_nchw.shape
    cmid, cout = w1.shape[0], w2.shape[0]
    if residual and cin != cout:
        raise ValueError("residual DoubleConv requires in_channels == out_channels")

    Hp, Wp = H + 2, W + 2
    M = H * Wp                               # conv grid: H rows x (W+2) cols (2 garbage cols/row)
    P = _round_up(M + 2 * Wp + 2, 8)         # flat padded length incl. largest tap offset

    bt = _pick_batch_block(B)
    grid = (B // bt,)

    # glue: NCHW -> channel-major flat padded bf16; weights -> (Cout, 9*Cin), k = (3*dh+dw)*Cin+ci
    xpad = jnp.pad(x_nchw.astype(jnp.float32), ((0, 0), (0, 0), (1, 1), (1, 1)))
    xflat = xpad.reshape(B, cin, Hp * Wp)
    xflat = jnp.pad(xflat, ((0, 0), (0, 0), (0, P - Hp * Wp))).astype(jnp.bfloat16)

    w1p = jnp.transpose(w1, (0, 2, 3, 1)).reshape(cmid, 9 * cin).astype(jnp.bfloat16)
    w2p = jnp.transpose(w2, (0, 2, 3, 1)).reshape(cout, 9 * cmid).astype(jnp.bfloat16)

    col = jnp.arange(M, dtype=jnp.int32) % Wp
    valid = (col < W).astype(jnp.float32).reshape(1, M)

    kernel = functools.partial(_double_conv_kernel, n_img=bt, H=H, W=W, M=M, P=P,
                               residual=residual, eps=1e-5)

    out = pl.pallas_call(
        kernel,
        out_shape=jax.ShapeDtypeStruct((B, cout, M), jnp.float32),
        grid=grid,
        in_specs=[
            pl.BlockSpec((bt, cin, P), lambda b: (b, 0, 0)),
            pl.BlockSpec((cmid, 9 * cin), lambda b: (0, 0)),
            pl.BlockSpec((cmid, 1), lambda b: (0, 0)),
            pl.BlockSpec((cmid, 1), lambda b: (0, 0)),
            pl.BlockSpec((cout, 9 * cmid), lambda b: (0, 0)),
            pl.BlockSpec((cout, 1), lambda b: (0, 0)),
            pl.BlockSpec((cout, 1), lambda b: (0, 0)),
            pl.BlockSpec((1, M), lambda b: (0, 0)),
        ],
        out_specs=pl.BlockSpec((bt, cout, M), lambda b: (b, 0, 0)),
        scratch_shapes=[
            pltpu.VMEM((cmid, P), jnp.bfloat16),            # padded intermediate
            pltpu.VMEM((9 * cin, M), _patch_dtype(cin)),    # im2col patches, conv1
            pltpu.VMEM((9 * cmid, M), _patch_dtype(cmid)),  # im2col patches, conv2
        ],
        compiler_params=pltpu.CompilerParams(
            dimension_semantics=("parallel",), vmem_limit_bytes=_VMEM_LIMIT),
    )(xflat, w1p,
      params["g1"].reshape(cmid, 1).astype(jnp.float32),
      params["b1"].reshape(cmid, 1).astype(jnp.float32),
      w2p,
      params["g2"].reshape(cout, 1).astype(jnp.float32),
      params["b2"].reshape(cout, 1).astype(jnp.float32),
      valid)

    # drop the 2 garbage halo columns per row; output is already NCHW
    return out.reshape(B, cout, H, Wp)[:, :, :, :W]


double_conv = jax.jit(_double_conv_impl, static_argnames=("residual",))


# ----------------------------------------------------------------------------
# parameters + pure-JAX reference (correctness check only)
# ----------------------------------------------------------------------------
def init_double_conv_params(key, in_ch, out_ch, mid_ch=None):
    if mid_ch is None:
        mid_ch = out_ch
    k = jax.random.split(key, 6)
    return dict(
        w1=jax.random.normal(k[0], (mid_ch, in_ch, 3, 3), jnp.float32) / math.sqrt(9 * in_ch),
        g1=1.0 + 0.1 * jax.random.normal(k[1], (mid_ch,), jnp.float32),
        b1=0.1 * jax.random.normal(k[2], (mid_ch,), jnp.float32),
        w2=jax.random.normal(k[3], (out_ch, mid_ch, 3, 3), jnp.float32) / math.sqrt(9 * mid_ch),
        g2=1.0 + 0.1 * jax.random.normal(k[4], (out_ch,), jnp.float32),
        b2=0.1 * jax.random.normal(k[5], (out_ch,), jnp.float32),
    )


def double_conv_ref(x, params, residual=False):
    def conv(h, w):
        return lax.conv_general_dilated(
            h, w, window_strides=(1, 1), padding=((1, 1), (1, 1)),
            dimension_numbers=("NCHW", "OIHW", "NCHW"),
            precision=lax.Precision.HIGHEST)

    def gn(h, g, b, eps=1e-5):
        mean = jnp.mean(h, axis=(1, 2, 3), keepdims=True)
        var = jnp.mean(jnp.square(h - mean), axis=(1, 2, 3), keepdims=True)
        return ((h - mean) * lax.rsqrt(var + eps) * g.reshape(1, -1, 1, 1)
                + b.reshape(1, -1, 1, 1))

    h = jax.nn.gelu(gn(conv(x, params["w1"]), params["g1"], params["b1"]),
                    approximate=False)
    h = gn(conv(h, params["w2"]), params["g2"], params["b2"])
    if residual:
        h = jax.nn.gelu(x + h, approximate=False)
    return h


if __name__ == "__main__":
    key = jax.random.PRNGKey(0)
    kx, kp1, kp2 = jax.random.split(key, 3)

    B, Cin, H, W = 2, 4, 16, 16
    Cout = 32
    x = jax.random.normal(kx, (B, Cin, H, W), jnp.float32)

    p1 = init_double_conv_params(kp1, Cin, Cout)      # DoubleConv(4, 32)
    p2 = init_double_conv_params(kp2, Cout, Cout)     # DoubleConv(32, 32, residual=True)

    y1 = jax.block_until_ready(double_conv(x, p1, residual=False))
    y2 = jax.block_until_ready(double_conv(y1, p2, residual=True))

    assert y1.shape == (B, Cout, H, W), y1.shape
    assert y2.shape == (B, Cout, H, W), y2.shape
    assert bool(jnp.all(jnp.isfinite(y1))) and bool(jnp.all(jnp.isfinite(y2)))

    # correctness vs. pure-JAX reference of the PyTorch module; tolerance sized
    # for bf16 MXU operands (weights/activations quantized to bf16 in-kernel).
    r1 = double_conv_ref(x, p1, residual=False)
    r2 = double_conv_ref(y1, p2, residual=True)
    tol = dict(atol=5e-2, rtol=5e-2)
    assert bool(jnp.allclose(y1, r1, **tol)), float(jnp.max(jnp.abs(y1 - r1)))
    assert bool(jnp.allclose(y2, r2, **tol)), float(jnp.max(jnp.abs(y2 - r2)))

    print("KERNEL_OK")
</pallas_src>

<mosaic_0001>
module attributes {stable_mosaic.version = 11 : i64} {
  func.func @_double_conv_kernel(%arg0: i32, %arg1: memref<2x4x328xbf16, #tpu.memory_space<vmem>>, %arg2: memref<32x36xbf16, #tpu.memory_space<vmem>>, %arg3: memref<32x1xf32, #tpu.memory_space<vmem>>, %arg4: memref<32x1xf32, #tpu.memory_space<vmem>>, %arg5: memref<32x288xbf16, #tpu.memory_space<vmem>>, %arg6: memref<32x1xf32, #tpu.memory_space<vmem>>, %arg7: memref<32x1xf32, #tpu.memory_space<vmem>>, %arg8: memref<1x288xf32, #tpu.memory_space<vmem>>, %arg9: memref<2x32x288xf32, #tpu.memory_space<vmem>>, %arg10: memref<32x328xbf16, #tpu.memory_space<vmem>>, %arg11: memref<36x288xf32, #tpu.memory_space<vmem>>, %arg12: memref<288x288xbf16, #tpu.memory_space<vmem>>) attributes {dimension_semantics = [#tpu.dimension_semantics<parallel>], iteration_bounds = array<i64: 1>, scalar_prefetch = 0 : i64, scratch_operands = 3 : i64, tpu.core_type = #tpu.core_type<tc>, window_params = [{transform_indices = @transform_0, window_bounds = array<i64: 2, 4, 328>}, {pipeline_mode = #tpu.pipeline_mode<synchronous>, transform_indices = @transform_1, window_bounds = array<i64: 32, 36>}, {pipeline_mode = #tpu.pipeline_mode<synchronous>, transform_indices = @transform_2, window_bounds = array<i64: 32, 1>}, {pipeline_mode = #tpu.pipeline_mode<synchronous>, transform_indices = @transform_3, window_bounds = array<i64: 32, 1>}, {pipeline_mode = #tpu.pipeline_mode<synchronous>, transform_indices = @transform_4, window_bounds = array<i64: 32, 288>}, {pipeline_mode = #tpu.pipeline_mode<synchronous>, transform_indices = @transform_5, window_bounds = array<i64: 32, 1>}, {pipeline_mode = #tpu.pipeline_mode<synchronous>, transform_indices = @transform_6, window_bounds = array<i64: 32, 1>}, {pipeline_mode = #tpu.pipeline_mode<synchronous>, transform_indices = @transform_7, window_bounds = array<i64: 1, 288>}, {transform_indices = @transform_8, window_bounds = array<i64: 2, 32, 288>}]} {
    %c0 = arith.constant 0 : index
    %c0_0 = arith.constant 0 : index
    %0 = vector.load %arg8[%c0, %c0_0] : memref<1x288xf32, #tpu.memory_space<vmem>>, vector<1x288xf32>
    %cst = arith.constant 0.000000e+00 : bf16
    %1 = vector.broadcast %cst : bf16 to vector<32x19xbf16>
    %c0_1 = arith.constant 0 : index
    %c0_2 = arith.constant 0 : index
    %2 = vector.load %arg10[%c0_1, %c0_2] : memref<32x328xbf16, #tpu.memory_space<vmem>>, vector<32x19xbf16>
    tpu.vector_store %arg10[%c0_1, %c0_2], %1 {strides = array<i32>} : memref<32x328xbf16, #tpu.memory_space<vmem>>, vector<32x19xbf16>,
    %cst_3 = arith.constant 0.000000e+00 : bf16
    %3 = vector.broadcast %cst_3 : bf16 to vector<32x21xbf16>
    %c0_4 = arith.constant 0 : index
    %c307 = arith.constant 307 : index
    %4 = vector.load %arg10[%c0_4, %c307] : memref<32x328xbf16, #tpu.memory_space<vmem>>, vector<32x21xbf16>
    tpu.vector_store %arg10[%c0_4, %c307], %3 {strides = array<i32>} : memref<32x328xbf16, #tpu.memory_space<vmem>>, vector<32x21xbf16>,
    %c0_5 = arith.constant 0 : index
    %c0_6 = arith.constant 0 : index
    %c0_7 = arith.constant 0 : index
    %5 = vector.load %arg1[%c0_5, %c0_6, %c0_7] : memref<2x4x328xbf16, #tpu.memory_space<vmem>>, vector<1x4x328xbf16>
    %6 = vector.shape_cast %5 : vector<1x4x328xbf16> to vector<4x328xbf16>
    %7 = vector.extract_strided_slice %6 {offsets = [0, 0], sizes = [4, 288], strides = [1, 1]} : vector<4x328xbf16> to vector<4x288xbf16>
    %8 = arith.extf %7 : vector<4x288xbf16> to vector<4x288xf32>
    %c0_8 = arith.constant 0 : index
    %c0_9 = arith.constant 0 : index
    %9 = vector.load %arg11[%c0_8, %c0_9] : memref<36x288xf32, #tpu.memory_space<vmem>>, vector<4x288xf32>
    tpu.vector_store %arg11[%c0_8, %c0_9], %8 {strides = array<i32>} : memref<36x288xf32, #tpu.memory_space<vmem>>, vector<4x288xf32>,
    %10 = vector.extract_strided_slice %6 {offsets = [0, 1], sizes = [4, 288], strides = [1, 1]} : vector<4x328xbf16> to vector<4x288xbf16>
    %11 = arith.extf %10 : vector<4x288xbf16> to vector<4x288xf32>
    %c4 = arith.constant 4 : index
    %c0_10 = arith.constant 0 : index
    %12 = vector.load %arg11[%c4, %c0_10] : memref<36x288xf32, #tpu.memory_space<vmem>>, vector<4x288xf32>
    tpu.vector_store %arg11[%c4, %c0_10], %11 {strides = array<i32>} : memref<36x288xf32, #tpu.memory_space<vmem>>, vector<4x288xf32>,
    %13 = vector.extract_strided_slice %6 {offsets = [0, 2], sizes = [4, 288], strides = [1, 1]} : vector<4x328xbf16> to vector<4x288xbf16>
    %14 = arith.extf %13 : vector<4x288xbf16> to vector<4x288xf32>
    %c8 = arith.constant 8 : index
    %c0_11 = arith.constant 0 : index
    %15 = vector.load %arg11[%c8, %c0_11] : memref<36x288xf32, #tpu.memory_space<vmem>>, vector<4x288xf32>
    tpu.vector_store %arg11[%c8, %c0_11], %14 {strides = array<i32>} : memref<36x288xf32, #tpu.memory_space<vmem>>, vector<4x288xf32>,
    %16 = vector.extract_strided_slice %6 {offsets = [0, 18], sizes = [4, 288], strides = [1, 1]} : vector<4x328xbf16> to vector<4x288xbf16>
    %17 = arith.extf %16 : vector<4x288xbf16> to vector<4x288xf32>
    %c12 = arith.constant 12 : index
    %c0_12 = arith.constant 0 : index
    %18 = vector.load %arg11[%c12, %c0_12] : memref<36x288xf32, #tpu.memory_space<vmem>>, vector<4x288xf32>
    tpu.vector_store %arg11[%c12, %c0_12], %17 {strides = array<i32>} : memref<36x288xf32, #tpu.memory_space<vmem>>, vector<4x288xf32>,
    %19 = vector.extract_strided_slice %6 {offsets = [0, 19], sizes = [4, 288], strides = [1, 1]} : vector<4x328xbf16> to vector<4x288xbf16>
    %20 = arith.extf %19 : vector<4x288xbf16> to vector<4x288xf32>
    %c16 = arith.constant 16 : index
    %c0_13 = arith.constant 0 : index
    %21 = vector.load %arg11[%c16, %c0_13] : memref<36x288xf32, #tpu.memory_space<vmem>>, vector<4x288xf32>
    tpu.vector_store %arg11[%c16, %c0_13], %20 {strides = array<i32>} : memref<36x288xf32, #tpu.memory_space<vmem>>, vector<4x288xf32>,
    %22 = vector.extract_strided_slice %6 {offsets = [0, 20], sizes = [4, 288], strides = [1, 1]} : vector<4x328xbf16> to vector<4x288xbf16>
    %23 = arith.extf %22 : vector<4x288xbf16> to vector<4x288xf32>
    %c20 = arith.constant 20 : index
    %c0_14 = arith.constant 0 : index
    %24 = vector.load %arg11[%c20, %c0_14] : memref<36x288xf32, #tpu.memory_space<vmem>>, vector<4x288xf32>
    tpu.vector_store %arg11[%c20, %c0_14], %23 {strides = array<i32>} : memref<36x288xf32, #tpu.memory_space<vmem>>, vector<4x288xf32>,
    %25 = vector.extract_strided_slice %6 {offsets = [0, 36], sizes = [4, 288], strides = [1, 1]} : vector<4x328xbf16> to vector<4x288xbf16>
    %26 = arith.extf %25 : vector<4x288xbf16> to vector<4x288xf32>
    %c24 = arith.constant 24 : index
    %c0_15 = arith.constant 0 : index
    %27 = vector.load %arg11[%c24, %c0_15] : memref<36x288xf32, #tpu.memory_space<vmem>>, vector<4x288xf32>
    tpu.vector_store %arg11[%c24, %c0_15], %26 {strides = array<i32>} : memref<36x288xf32, #tpu.memory_space<vmem>>, vector<4x288xf32>,
    %28 = vector.extract_strided_slice %6 {offsets = [0, 37], sizes = [4, 288], strides = [1, 1]} : vector<4x328xbf16> to vector<4x288xbf16>
    %29 = arith.extf %28 : vector<4x288xbf16> to vector<4x288xf32>
    %c28 = arith.constant 28 : index
    %c0_16 = arith.constant 0 : index
    %30 = vector.load %arg11[%c28, %c0_16] : memref<36x288xf32, #tpu.memory_space<vmem>>, vector<4x288xf32>
    tpu.vector_store %arg11[%c28, %c0_16], %29 {strides = array<i32>} : memref<36x288xf32, #tpu.memory_space<vmem>>, vector<4x288xf32>,
    %31 = vector.extract_strided_slice %6 {offsets = [0, 38], sizes = [4, 288], strides = [1, 1]} : vector<4x328xbf16> to vector<4x288xbf16>
    %32 = arith.extf %31 : vector<4x288xbf16> to vector<4x288xf32>
    %c32 = arith.constant 32 : index
    %c0_17 = arith.constant 0 : index
    %33 = vector.load %arg11[%c32, %c0_17] : memref<36x288xf32, #tpu.memory_space<vmem>>, vector<4x288xf32>
    tpu.vector_store %arg11[%c32, %c0_17], %32 {strides = array<i32>} : memref<36x288xf32, #tpu.memory_space<vmem>>, vector<4x288xf32>,
    %c0_18 = arith.constant 0 : index
    %c0_19 = arith.constant 0 : index
    %34 = vector.load %arg2[%c0_18, %c0_19] : memref<32x36xbf16, #tpu.memory_space<vmem>>, vector<32x36xbf16>
    %c0_20 = arith.constant 0 : index
    %c0_21 = arith.constant 0 : index
    %35 = vector.load %arg11[%c0_20, %c0_21] : memref<36x288xf32, #tpu.memory_space<vmem>>, vector<36x288xf32>
    %36 = arith.truncf %35 : vector<36x288xf32> to vector<36x288xbf16>
    %cst_22 = arith.constant dense<0.000000e+00> : vector<32x288xf32>
    %37 = tpu.matmul %34, %36, %cst_22 {dimension_numbers = #tpu.dot_dimension_numbers<[1], [0], [0], [1], [0, 0, 1, 1], [], []>} : vector<32x36xbf16>, vector<36x288xbf16>, vector<32x288xf32> -> vector<32x288xf32>
    %c0_23 = arith.constant 0 : index
    %c0_24 = arith.constant 0 : index
    %38 = vector.load %arg3[%c0_23, %c0_24] : memref<32x1xf32, #tpu.memory_space<vmem>>, vector<32x1xf32>
    %c0_25 = arith.constant 0 : index
    %c0_26 = arith.constant 0 : index
    %39 = vector.load %arg4[%c0_25, %c0_26] : memref<32x1xf32, #tpu.memory_space<vmem>>, vector<32x1xf32>
    %40 = vector.broadcast %0 : vector<1x288xf32> to vector<32x288xf32>
    %41 = arith.mulf %37, %40 : vector<32x288xf32>
    %cst_27 = arith.constant dense<0.000000e+00> : vector<32xf32>
    %42 = vector.multi_reduction <add>, %41, %cst_27 [1] : vector<32x288xf32> to vector<32xf32>
    %43 = vector.shape_cast %42 : vector<32xf32> to vector<32x1xf32>
    %cst_28 = arith.constant dense<0.000000e+00> : vector<1xf32>
    %44 = vector.multi_reduction <add>, %43, %cst_28 [0] : vector<32x1xf32> to vector<1xf32>
    %45 = vector.shape_cast %44 : vector<1xf32> to vector<1x1xf32>
    %cst_29 = arith.constant 1.22070313E-4 : f32
    %46 = vector.broadcast %cst_29 : f32 to vector<1x1xf32>
    %47 = arith.mulf %45, %46 : vector<1x1xf32>
    %48 = vector.broadcast %47 : vector<1x1xf32> to vector<32x288xf32>
    %49 = arith.subf %37, %48 : vector<32x288xf32>
    %50 = vector.broadcast %0 : vector<1x288xf32> to vector<32x288xf32>
    %51 = arith.mulf %49, %50 : vector<32x288xf32>
    %52 = arith.mulf %51, %51 : vector<32x288xf32>
    %cst_30 = arith.constant dense<0.000000e+00> : vector<32xf32>
    %53 = vector.multi_reduction <add>, %52, %cst_30 [1] : vector<32x288xf32> to vector<32xf32>
    %54 = vector.shape_cast %53 : vector<32xf32> to vector<32x1xf32>
    %cst_31 = arith.constant dense<0.000000e+00> : vector<1xf32>
    %55 = vector.multi_reduction <add>, %54, %cst_31 [0] : vector<32x1xf32> to vector<1xf32>
    %56 = vector.shape_cast %55 : vector<1xf32> to vector<1x1xf32>
    %cst_32 = arith.constant 1.22070313E-4 : f32
    %57 = vector.broadcast %cst_32 : f32 to vector<1x1xf32>
    %58 = arith.mulf %56, %57 : vector<1x1xf32>
    %59 = vector.broadcast %47 : vector<1x1xf32> to vector<32x288xf32>
    %60 = arith.subf %37, %59 : vector<32x288xf32>
    %cst_33 = arith.constant 9.99999974E-6 : f32
    %61 = vector.broadcast %cst_33 : f32 to vector<1x1xf32>
    %62 = arith.addf %58, %61 : vector<1x1xf32>
    %63 = math.rsqrt %62 : vector<1x1xf32>
    %64 = vector.broadcast %63 : vector<1x1xf32> to vector<32x288xf32>
    %65 = arith.mulf %60, %64 : vector<32x288xf32>
    %66 = vector.broadcast %38 : vector<32x1xf32> to vector<32x288xf32>
    %67 = arith.mulf %65, %66 : vector<32x288xf32>
    %68 = vector.broadcast %39 : vector<32x1xf32> to vector<32x288xf32>
    %69 = arith.addf %67, %68 : vector<32x288xf32>
    %cst_34 = arith.constant 5.000000e-01 : f32
    %70 = vector.broadcast %cst_34 : f32 to vector<32x288xf32>
    %71 = arith.mulf %70, %69 : vector<32x288xf32>
    %cst_35 = arith.constant 0.707106769 : f32
    %72 = vector.broadcast %cst_35 : f32 to vector<32x288xf32>
    %73 = arith.mulf %69, %72 : vector<32x288xf32>
    %cst_36 = arith.constant 0.000000e+00 : f32
    %74 = vector.broadcast %cst_36 : f32 to vector<32x288xf32>
    %75 = arith.cmpf oge, %73, %74 : vector<32x288xf32>
    %cst_37 = arith.constant 1.000000e+00 : f32
    %cst_38 = arith.constant -1.000000e+00 : f32
    %76 = vector.broadcast %cst_37 : f32 to vector<32x288xf32>
    %77 = vector.broadcast %cst_38 : f32 to vector<32x288xf32>
    %78 = arith.select %75, %76, %77 : vector<32x288xi1>, vector<32x288xf32>
    %79 = math.absf %73 : vector<32x288xf32>
    %cst_39 = arith.constant 0.327591091 : f32
    %80 = vector.broadcast %cst_39 : f32 to vector<32x288xf32>
    %81 = arith.mulf %80, %79 : vector<32x288xf32>
    %cst_40 = arith.constant 1.000000e+00 : f32
    %82 = vector.broadcast %cst_40 : f32 to vector<32x288xf32>
    %83 = arith.addf %82, %81 : vector<32x288xf32>
    %84 = tpu.reciprocal %83 {approx = true} : vector<32x288xf32> -> vector<32x288xf32>
    %cst_41 = arith.constant 1.06140542 : f32
    %85 = vector.broadcast %cst_41 : f32 to vector<32x288xf32>
    %86 = arith.mulf %85, %84 : vector<32x288xf32>
    %cst_42 = arith.constant -1.45315206 : f32
    %87 = vector.broadcast %cst_42 : f32 to vector<32x288xf32>
    %88 = arith.addf %86, %87 : vector<32x288xf32>
    %89 = arith.mulf %88, %84 : vector<32x288xf32>
    %cst_43 = arith.constant 1.42141378 : f32
    %90 = vector.broadcast %cst_43 : f32 to vector<32x288xf32>
    %91 = arith.addf %89, %90 : vector<32x288xf32>
    %92 = arith.mulf %91, %84 : vector<32x288xf32>
    %cst_44 = arith.constant -0.284496725 : f32
    %93 = vector.broadcast %cst_44 : f32 to vector<32x288xf32>
    %94 = arith.addf %92, %93 : vector<32x288xf32>
    %95 = arith.mulf %94, %84 : vector<32x288xf32>
    %cst_45 = arith.constant 0.254829586 : f32
    %96 = vector.broadcast %cst_45 : f32 to vector<32x288xf32>
    %97 = arith.addf %95, %96 : vector<32x288xf32>
    %98 = arith.mulf %97, %84 : vector<32x288xf32>
    %cst_46 = arith.constant 0.000000e+00 : f32
    %99 = vector.broadcast %cst_46 : f32 to vector<32x288xf32>
    %100 = arith.subf %99, %79 : vector<32x288xf32>
    %101 = arith.mulf %100, %79 : vector<32x288xf32>
    %102 = math.exp %101 : vector<32x288xf32>
    %103 = arith.mulf %98, %102 : vector<32x288xf32>
    %cst_47 = arith.constant 1.000000e+00 : f32
    %104 = vector.broadcast %cst_47 : f32 to vector<32x288xf32>
    %105 = arith.subf %104, %103 : vector<32x288xf32>
    %106 = arith.mulf %78, %105 : vector<32x288xf32>
    %cst_48 = arith.constant 1.000000e+00 : f32
    %107 = vector.broadcast %cst_48 : f32 to vector<32x288xf32>
    %108 = arith.addf %107, %106 : vector<32x288xf32>
    %109 = arith.mulf %71, %108 : vector<32x288xf32>
    %110 = vector.broadcast %0 : vector<1x288xf32> to vector<32x288xf32>
    %111 = arith.mulf %109, %110 : vector<32x288xf32>
    %112 = arith.truncf %111 : vector<32x288xf32> to vector<32x288xbf16>
    %c0_49 = arith.constant 0 : index
    %c19 = arith.constant 19 : index
    %113 = vector.load %arg10[%c0_49, %c19] : memref<32x328xbf16, #tpu.memory_space<vmem>>, vector<32x288xbf16>
    tpu.vector_store %arg10[%c0_49, %c19], %112 {strides = array<i32>} : memref<32x328xbf16, #tpu.memory_space<vmem>>, vector<32x288xbf16>,
    %c0_50 = arith.constant 0 : index
    %c0_51 = arith.constant 0 : index
    %114 = vector.load %arg10[%c0_50, %c0_51] : memref<32x328xbf16, #tpu.memory_space<vmem>>, vector<32x328xbf16>
    %115 = vector.extract_strided_slice %114 {offsets = [0, 0], sizes = [32, 288], strides = [1, 1]} : vector<32x328xbf16> to vector<32x288xbf16>
    %c0_52 = arith.constant 0 : index
    %c0_53 = arith.constant 0 : index
    %116 = vector.load %arg12[%c0_52, %c0_53] : memref<288x288xbf16, #tpu.memory_space<vmem>>, vector<32x288xbf16>
    tpu.vector_store %arg12[%c0_52, %c0_53], %115 {strides = array<i32>} : memref<288x288xbf16, #tpu.memory_space<vmem>>, vector<32x288xbf16>,
    %117 = vector.extract_strided_slice %114 {offsets = [0, 1], sizes = [32, 288], strides = [1, 1]} : vector<32x328xbf16> to vector<32x288xbf16>
    %c32_54 = arith.constant 32 : index
    %c0_55 = arith.constant 0 : index
    %118 = vector.load %arg12[%c32_54, %c0_55] : memref<288x288xbf16, #tpu.memory_space<vmem>>, vector<32x288xbf16>
    tpu.vector_store %arg12[%c32_54, %c0_55], %117 {strides = array<i32>} : memref<288x288xbf16, #tpu.memory_space<vmem>>, vector<32x288xbf16>,
    %119 = vector.extract_strided_slice %114 {offsets = [0, 2], sizes = [32, 288], strides = [1, 1]} : vector<32x328xbf16> to vector<32x288xbf16>
    %c64 = arith.constant 64 : index
    %c0_56 = arith.constant 0 : index
    %120 = vector.load %arg12[%c64, %c0_56] : memref<288x288xbf16, #tpu.memory_space<vmem>>, vector<32x288xbf16>
    tpu.vector_store %arg12[%c64, %c0_56], %119 {strides = array<i32>} : memref<288x288xbf16, #tpu.memory_space<vmem>>, vector<32x288xbf16>,
    %121 = vector.extract_strided_slice %114 {offsets = [0, 18], sizes = [32, 288], strides = [1, 1]} : vector<32x328xbf16> to vector<32x288xbf16>
    %c96 = arith.constant 96 : index
    %c0_57 = arith.constant 0 : index
    %122 = vector.load %arg12[%c96, %c0_57] : memref<288x288xbf16, #tpu.memory_space<vmem>>, vector<32x288xbf16>
    tpu.vector_store %arg12[%c96, %c0_57], %121 {strides = array<i32>} : memref<288x288xbf16, #tpu.memory_space<vmem>>, vector<32x288xbf16>,
    %123 = vector.extract_strided_slice %114 {offsets = [0, 19], sizes = [32, 288], strides = [1, 1]} : vector<32x328xbf16> to vector<32x288xbf16>
    %c128 = arith.constant 128 : index
    %c0_58 = arith.constant 0 : index
    %124 = vector.load %arg12[%c128, %c0_58] : memref<288x288xbf16, #tpu.memory_space<vmem>>, vector<32x288xbf16>
    tpu.vector_store %arg12[%c128, %c0_58], %123 {strides = array<i32>} : memref<288x288xbf16, #tpu.memory_space<vmem>>, vector<32x288xbf16>,
    %125 = vector.extract_strided_slice %114 {offsets = [0, 20], sizes = [32, 288], strides = [1, 1]} : vector<32x328xbf16> to vector<32x288xbf16>
    %c160 = arith.constant 160 : index
    %c0_59 = arith.constant 0 : index
    %126 = vector.load %arg12[%c160, %c0_59] : memref<288x288xbf16, #tpu.memory_space<vmem>>, vector<32x288xbf16>
    tpu.vector_store %arg12[%c160, %c0_59], %125 {strides = array<i32>} : memref<288x288xbf16, #tpu.memory_space<vmem>>, vector<32x288xbf16>,
    %127 = vector.extract_strided_slice %114 {offsets = [0, 36], sizes = [32, 288], strides = [1, 1]} : vector<32x328xbf16> to vector<32x288xbf16>
    %c192 = arith.constant 192 : index
    %c0_60 = arith.constant 0 : index
    %128 = vector.load %arg12[%c192, %c0_60] : memref<288x288xbf16, #tpu.memory_space<vmem>>, vector<32x288xbf16>
    tpu.vector_store %arg12[%c192, %c0_60], %127 {strides = array<i32>} : memref<288x288xbf16, #tpu.memory_space<vmem>>, vector<32x288xbf16>,
    %129 = vector.extract_strided_slice %114 {offsets = [0, 37], sizes = [32, 288], strides = [1, 1]} : vector<32x328xbf16> to vector<32x288xbf16>
    %c224 = arith.constant 224 : index
    %c0_61 = arith.constant 0 : index
    %130 = vector.load %arg12[%c224, %c0_61] : memref<288x288xbf16, #tpu.memory_space<vmem>>, vector<32x288xbf16>
    tpu.vector_store %arg12[%c224, %c0_61], %129 {strides = array<i32>} : memref<288x288xbf16, #tpu.memory_space<vmem>>, vector<32x288xbf16>,
    %131 = vector.extract_strided_slice %114 {offsets = [0, 38], sizes = [32, 288], strides = [1, 1]} : vector<32x328xbf16> to vector<32x288xbf16>
    %c256 = arith.constant 256 : index
    %c0_62 = arith.constant 0 : index
    %132 = vector.load %arg12[%c256, %c0_62] : memref<288x288xbf16, #tpu.memory_space<vmem>>, vector<32x288xbf16>
    tpu.vector_store %arg12[%c256, %c0_62], %131 {strides = array<i32>} : memref<288x288xbf16, #tpu.memory_space<vmem>>, vector<32x288xbf16>,
    %c0_63 = arith.constant 0 : index
    %c0_64 = arith.constant 0 : index
    %133 = vector.load %arg5[%c0_63, %c0_64] : memref<32x288xbf16, #tpu.memory_space<vmem>>, vector<32x288xbf16>
    %c0_65 = arith.constant 0 : index
    %c0_66 = arith.constant 0 : index
    %134 = vector.load %arg12[%c0_65, %c0_66] : memref<288x288xbf16, #tpu.memory_space<vmem>>, vector<288x288xbf16>
    %cst_67 = arith.constant dense<0.000000e+00> : vector<32x288xf32>
    %135 = tpu.matmul %133, %134, %cst_67 {dimension_numbers = #tpu.dot_dimension_numbers<[1], [0], [0], [1], [0, 0, 1, 1], [], []>} : vector<32x288xbf16>, vector<288x288xbf16>, vector<32x288xf32> -> vector<32x288xf32>
    %c0_68 = arith.constant 0 : index
    %c0_69 = arith.constant 0 : index
    %136 = vector.load %arg6[%c0_68, %c0_69] : memref<32x1xf32, #tpu.memory_space<vmem>>, vector<32x1xf32>
    %c0_70 = arith.constant 0 : index
    %c0_71 = arith.constant 0 : index
    %137 = vector.load %arg7[%c0_70, %c0_71] : memref<32x1xf32, #tpu.memory_space<vmem>>, vector<32x1xf32>
    %138 = vector.broadcast %0 : vector<1x288xf32> to vector<32x288xf32>
    %139 = arith.mulf %135, %138 : vector<32x288xf32>
    %cst_72 = arith.constant dense<0.000000e+00> : vector<32xf32>
    %140 = vector.multi_reduction <add>, %139, %cst_72 [1] : vector<32x288xf32> to vector<32xf32>
    %141 = vector.shape_cast %140 : vector<32xf32> to vector<32x1xf32>
    %cst_73 = arith.constant dense<0.000000e+00> : vector<1xf32>
    %142 = vector.multi_reduction <add>, %141, %cst_73 [0] : vector<32x1xf32> to vector<1xf32>
    %143 = vector.shape_cast %142 : vector<1xf32> to vector<1x1xf32>
    %cst_74 = arith.constant 1.22070313E-4 : f32
    %144 = vector.broadcast %cst_74 : f32 to vector<1x1xf32>
    %145 = arith.mulf %143, %144 : vector<1x1xf32>
    %146 = vector.broadcast %145 : vector<1x1xf32> to vector<32x288xf32>
    %147 = arith.subf %135, %146 : vector<32x288xf32>
    %148 = vector.broadcast %0 : vector<1x288xf32> to vector<32x288xf32>
    %149 = arith.mulf %147, %148 : vector<32x288xf32>
    %150 = arith.mulf %149, %149 : vector<32x288xf32>
    %cst_75 = arith.constant dense<0.000000e+00> : vector<32xf32>
    %151 = vector.multi_reduction <add>, %150, %cst_75 [1] : vector<32x288xf32> to vector<32xf32>
    %152 = vector.shape_cast %151 : vector<32xf32> to vector<32x1xf32>
    %cst_76 = arith.constant dense<0.000000e+00> : vector<1xf32>
    %153 = vector.multi_reduction <add>, %152, %cst_76 [0] : vector<32x1xf32> to vector<1xf32>
    %154 = vector.shape_cast %153 : vector<1xf32> to vector<1x1xf32>
    %cst_77 = arith.constant 1.22070313E-4 : f32
    %155 = vector.broadcast %cst_77 : f32 to vector<1x1xf32>
    %156 = arith.mulf %154, %155 : vector<1x1xf32>
    %157 = vector.broadcast %145 : vector<1x1xf32> to vector<32x288xf32>
    %158 = arith.subf %135, %157 : vector<32x288xf32>
    %cst_78 = arith.constant 9.99999974E-6 : f32
    %159 = vector.broadcast %cst_78 : f32 to vector<1x1xf32>
    %160 = arith.addf %156, %159 : vector<1x1xf32>
    %161 = math.rsqrt %160 : vector<1x1xf32>
    %162 = vector.broadcast %161 : vector<1x1xf32> to vector<32x288xf32>
    %163 = arith.mulf %158, %162 : vector<32x288xf32>
    %164 = vector.broadcast %136 : vector<32x1xf32> to vector<32x288xf32>
    %165 = arith.mulf %163, %164 : vector<32x288xf32>
    %166 = vector.broadcast %137 : vector<32x1xf32> to vector<32x288xf32>
    %167 = arith.addf %165, %166 : vector<32x288xf32>
    %c0_79 = arith.constant 0 : index
    %c0_80 = arith.constant 0 : index
    %c0_81 = arith.constant 0 : index
    %168 = vector.load %arg9[%c0_79, %c0_80, %c0_81] : memref<2x32x288xf32, #tpu.memory_space<vmem>>, vector<1x32x288xf32>
    %169 = vector.shape_cast %168 : vector<1x32x288xf32> to vector<32x288xf32>
    %170 = vector.shape_cast %167 : vector<32x288xf32> to vector<1x32x288xf32>
    tpu.vector_store %arg9[%c0_79, %c0_80, %c0_81], %170 {strides = array<i32>} : memref<2x32x288xf32, #tpu.memory_space<vmem>>, vector<1x32x288xf32>,
    %c1 = arith.constant 1 : index
    %c0_82 = arith.constant 0 : index
    %c0_83 = arith.constant 0 : index
    %171 = vector.load %arg1[%c1, %c0_82, %c0_83] : memref<2x4x328xbf16, #tpu.memory_space<vmem>>, vector<1x4x328xbf16>
    %172 = vector.shape_cast %171 : vector<1x4x328xbf16> to vector<4x328xbf16>
    %173 = vector.extract_strided_slice %172 {offsets = [0, 0], sizes = [4, 288], strides = [1, 1]} : vector<4x328xbf16> to vector<4x288xbf16>
    %174 = arith.extf %173 : vector<4x288xbf16> to vector<4x288xf32>
    %c0_84 = arith.constant 0 : index
    %c0_85 = arith.constant 0 : index
    %175 = vector.load %arg11[%c0_84, %c0_85] : memref<36x288xf32, #tpu.memory_space<vmem>>, vector<4x288xf32>
    tpu.vector_store %arg11[%c0_84, %c0_85], %174 {strides = array<i32>} : memref<36x288xf32, #tpu.memory_space<vmem>>, vector<4x288xf32>,
    %176 = vector.extract_strided_slice %172 {offsets = [0, 1], sizes = [4, 288], strides = [1, 1]} : vector<4x328xbf16> to vector<4x288xbf16>
    %177 = arith.extf %176 : vector<4x288xbf16> to vector<4x288xf32>
    %c4_86 = arith.constant 4 : index
    %c0_87 = arith.constant 0 : index
    %178 = vector.load %arg11[%c4_86, %c0_87] : memref<36x288xf32, #tpu.memory_space<vmem>>, vector<4x288xf32>
    tpu.vector_store %arg11[%c4_86, %c0_87], %177 {strides = array<i32>} : memref<36x288xf32, #tpu.memory_space<vmem>>, vector<4x288xf32>,
    %179 = vector.extract_strided_slice %172 {offsets = [0, 2], sizes = [4, 288], strides = [1, 1]} : vector<4x328xbf16> to vector<4x288xbf16>
    %180 = arith.extf %179 : vector<4x288xbf16> to vector<4x288xf32>
    %c8_88 = arith.constant 8 : index
    %c0_89 = arith.constant 0 : index
    %181 = vector.load %arg11[%c8_88, %c0_89] : memref<36x288xf32, #tpu.memory_space<vmem>>, vector<4x288xf32>
    tpu.vector_store %arg11[%c8_88, %c0_89], %180 {strides = array<i32>} : memref<36x288xf32, #tpu.memory_space<vmem>>, vector<4x288xf32>,
    %182 = vector.extract_strided_slice %172 {offsets = [0, 18], sizes = [4, 288], strides = [1, 1]} : vector<4x328xbf16> to vector<4x288xbf16>
    %183 = arith.extf %182 : vector<4x288xbf16> to vector<4x288xf32>
    %c12_90 = arith.constant 12 : index
    %c0_91 = arith.constant 0 : index
    %184 = vector.load %arg11[%c12_90, %c0_91] : memref<36x288xf32, #tpu.memory_space<vmem>>, vector<4x288xf32>
    tpu.vector_store %arg11[%c12_90, %c0_91], %183 {strides = array<i32>} : memref<36x288xf32, #tpu.memory_space<vmem>>, vector<4x288xf32>,
    %185 = vector.extract_strided_slice %172 {offsets = [0, 19], sizes = [4, 288], strides = [1, 1]} : vector<4x328xbf16> to vector<4x288xbf16>
    %186 = arith.extf %185 : vector<4x288xbf16> to vector<4x288xf32>
    %c16_92 = arith.constant 16 : index
    %c0_93 = arith.constant 0 : index
    %187 = vector.load %arg11[%c16_92, %c0_93] : memref<36x288xf32, #tpu.memory_space<vmem>>, vector<4x288xf32>
    tpu.vector_store %arg11[%c16_92, %c0_93], %186 {strides = array<i32>} : memref<36x288xf32, #tpu.memory_space<vmem>>, vector<4x288xf32>,
    %188 = vector.extract_strided_slice %172 {offsets = [0, 20], sizes = [4, 288], strides = [1, 1]} : vector<4x328xbf16> to vector<4x288xbf16>
    %189 = arith.extf %188 : vector<4x288xbf16> to vector<4x288xf32>
    %c20_94 = arith.constant 20 : index
    %c0_95 = arith.constant 0 : index
    %190 = vector.load %arg11[%c20_94, %c0_95] : memref<36x288xf32, #tpu.memory_space<vmem>>, vector<4x288xf32>
    tpu.vector_store %arg11[%c20_94, %c0_95], %189 {strides = array<i32>} : memref<36x288xf32, #tpu.memory_space<vmem>>, vector<4x288xf32>,
    %191 = vector.extract_strided_slice %172 {offsets = [0, 36], sizes = [4, 288], strides = [1, 1]} : vector<4x328xbf16> to vector<4x288xbf16>
    %192 = arith.extf %191 : vector<4x288xbf16> to vector<4x288xf32>
    %c24_96 = arith.constant 24 : index
    %c0_97 = arith.constant 0 : index
    %193 = vector.load %arg11[%c24_96, %c0_97] : memref<36x288xf32, #tpu.memory_space<vmem>>, vector<4x288xf32>
    tpu.vector_store %arg11[%c24_96, %c0_97], %192 {strides = array<i32>} : memref<36x288xf32, #tpu.memory_space<vmem>>, vector<4x288xf32>,
    %194 = vector.extract_strided_slice %172 {offsets = [0, 37], sizes = [4, 288], strides = [1, 1]} : vector<4x328xbf16> to vector<4x288xbf16>
    %195 = arith.extf %194 : vector<4x288xbf16> to vector<4x288xf32>
    %c28_98 = arith.constant 28 : index
    %c0_99 = arith.constant 0 : index
    %196 = vector.load %arg11[%c28_98, %c0_99] : memref<36x288xf32, #tpu.memory_space<vmem>>, vector<4x288xf32>
    tpu.vector_store %arg11[%c28_98, %c0_99], %195 {strides = array<i32>} : memref<36x288xf32, #tpu.memory_space<vmem>>, vector<4x288xf32>,
    %197 = vector.extract_strided_slice %172 {offsets = [0, 38], sizes = [4, 288], strides = [1, 1]} : vector<4x328xbf16> to vector<4x288xbf16>
    %198 = arith.extf %197 : vector<4x288xbf16> to vector<4x288xf32>
    %c32_100 = arith.constant 32 : index
    %c0_101 = arith.constant 0 : index
    %199 = vector.load %arg11[%c32_100, %c0_101] : memref<36x288xf32, #tpu.memory_space<vmem>>, vector<4x288xf32>
    tpu.vector_store %arg11[%c32_100, %c0_101], %198 {strides = array<i32>} : memref<36x288xf32, #tpu.memory_space<vmem>>, vector<4x288xf32>,
    %c0_102 = arith.constant 0 : index
    %c0_103 = arith.constant 0 : index
    %200 = vector.load %arg2[%c0_102, %c0_103] : memref<32x36xbf16, #tpu.memory_space<vmem>>, vector<32x36xbf16>
    %c0_104 = arith.constant 0 : index
    %c0_105 = arith.constant 0 : index
    %201 = vector.load %arg11[%c0_104, %c0_105] : memref<36x288xf32, #tpu.memory_space<vmem>>, vector<36x288xf32>
    %202 = arith.truncf %201 : vector<36x288xf32> to vector<36x288xbf16>
    %cst_106 = arith.constant dense<0.000000e+00> : vector<32x288xf32>
    %203 = tpu.matmul %200, %202, %cst_106 {dimension_numbers = #tpu.dot_dimension_numbers<[1], [0], [0], [1], [0, 0, 1, 1], [], []>} : vector<32x36xbf16>, vector<36x288xbf16>, vector<32x288xf32> -> vector<32x288xf32>
    %c0_107 = arith.constant 0 : index
    %c0_108 = arith.constant 0 : index
    %204 = vector.load %arg3[%c0_107, %c0_108] : memref<32x1xf32, #tpu.memory_space<vmem>>, vector<32x1xf32>
    %c0_109 = arith.constant 0 : index
    %c0_110 = arith.constant 0 : index
    %205 = vector.load %arg4[%c0_109, %c0_110] : memref<32x1xf32, #tpu.memory_space<vmem>>, vector<32x1xf32>
    %206 = vector.broadcast %0 : vector<1x288xf32> to vector<32x288xf32>
    %207 = arith.mulf %203, %206 : vector<32x288xf32>
    %cst_111 = arith.constant dense<0.000000e+00> : vector<32xf32>
    %208 = vector.multi_reduction <add>, %207, %cst_111 [1] : vector<32x288xf32> to vector<32xf32>
    %209 = vector.shape_cast %208 : vector<32xf32> to vector<32x1xf32>
    %cst_112 = arith.constant dense<0.000000e+00> : vector<1xf32>
    %210 = vector.multi_reduction <add>, %209, %cst_112 [0] : vector<32x1xf32> to vector<1xf32>
    %211 = vector.shape_cast %210 : vector<1xf32> to vector<1x1xf32>
    %cst_113 = arith.constant 1.22070313E-4 : f32
    %212 = vector.broadcast %cst_113 : f32 to vector<1x1xf32>
    %213 = arith.mulf %211, %212 : vector<1x1xf32>
    %214 = vector.broadcast %213 : vector<1x1xf32> to vector<32x288xf32>
    %215 = arith.subf %203, %214 : vector<32x288xf32>
    %216 = vector.broadcast %0 : vector<1x288xf32> to vector<32x288xf32>
    %217 = arith.mulf %215, %216 : vector<32x288xf32>
    %218 = arith.mulf %217, %217 : vector<32x288xf32>
    %cst_114 = arith.constant dense<0.000000e+00> : vector<32xf32>
    %219 = vector.multi_reduction <add>, %218, %cst_114 [1] : vector<32x288xf32> to vector<32xf32>
    %220 = vector.shape_cast %219 : vector<32xf32> to vector<32x1xf32>
    %cst_115 = arith.constant dense<0.000000e+00> : vector<1xf32>
    %221 = vector.multi_reduction <add>, %220, %cst_115 [0] : vector<32x1xf32> to vector<1xf32>
    %222 = vector.shape_cast %221 : vector<1xf32> to vector<1x1xf32>
    %cst_116 = arith.constant 1.22070313E-4 : f32
    %223 = vector.broadcast %cst_116 : f32 to vector<1x1xf32>
    %224 = arith.mulf %222, %223 : vector<1x1xf32>
    %225 = vector.broadcast %213 : vector<1x1xf32> to vector<32x288xf32>
    %226 = arith.subf %203, %225 : vector<32x288xf32>
    %cst_117 = arith.constant 9.99999974E-6 : f32
    %227 = vector.broadcast %cst_117 : f32 to vector<1x1xf32>
    %228 = arith.addf %224, %227 : vector<1x1xf32>
    %229 = math.rsqrt %228 : vector<1x1xf32>
    %230 = vector.broadcast %229 : vector<1x1xf32> to vector<32x288xf32>
    %231 = arith.mulf %226, %230 : vector<32x288xf32>
    %232 = vector.broadcast %204 : vector<32x1xf32> to vector<32x288xf32>
    %233 = arith.mulf %231, %232 : vector<32x288xf32>
    %234 = vector.broadcast %205 : vector<32x1xf32> to vector<32x288xf32>
    %235 = arith.addf %233, %234 : vector<32x288xf32>
    %cst_118 = arith.constant 5.000000e-01 : f32
    %236 = vector.broadcast %cst_118 : f32 to vector<32x288xf32>
    %237 = arith.mulf %236, %235 : vector<32x288xf32>
    %cst_119 = arith.constant 0.707106769 : f32
    %238 = vector.broadcast %cst_119 : f32 to vector<32x288xf32>
    %239 = arith.mulf %235, %238 : vector<32x288xf32>
    %cst_120 = arith.constant 0.000000e+00 : f32
    %240 = vector.broadcast %cst_120 : f32 to vector<32x288xf32>
    %241 = arith.cmpf oge, %239, %240 : vector<32x288xf32>
    %cst_121 = arith.constant 1.000000e+00 : f32
    %cst_122 = arith.constant -1.000000e+00 : f32
    %242 = vector.broadcast %cst_121 : f32 to vector<32x288xf32>
    %243 = vector.broadcast %cst_122 : f32 to vector<32x288xf32>
    %244 = arith.select %241, %242, %243 : vector<32x288xi1>, vector<32x288xf32>
    %245 = math.absf %239 : vector<32x288xf32>
    %cst_123 = arith.constant 0.327591091 : f32
    %246 = vector.broadcast %cst_123 : f32 to vector<32x288xf32>
    %247 = arith.mulf %246, %245 : vector<32x288xf32>
    %cst_124 = arith.constant 1.000000e+00 : f32
    %248 = vector.broadcast %cst_124 : f32 to vector<32x288xf32>
    %249 = arith.addf %248, %247 : vector<32x288xf32>
    %250 = tpu.reciprocal %249 {approx = true} : vector<32x288xf32> -> vector<32x288xf32>
    %cst_125 = arith.constant 1.06140542 : f32
    %251 = vector.broadcast %cst_125 : f32 to vector<32x288xf32>
    %252 = arith.mulf %251, %250 : vector<32x288xf32>
    %cst_126 = arith.constant -1.45315206 : f32
    %253 = vector.broadcast %cst_126 : f32 to vector<32x288xf32>
    %254 = arith.addf %252, %253 : vector<32x288xf32>
    %255 = arith.mulf %254, %250 : vector<32x288xf32>
    %cst_127 = arith.constant 1.42141378 : f32
    %256 = vector.broadcast %cst_127 : f32 to vector<32x288xf32>
    %257 = arith.addf %255, %256 : vector<32x288xf32>
    %258 = arith.mulf %257, %250 : vector<32x288xf32>
    %cst_128 = arith.constant -0.284496725 : f32
    %259 = vector.broadcast %cst_128 : f32 to vector<32x288xf32>
    %260 = arith.addf %258, %259 : vector<32x288xf32>
    %261 = arith.mulf %260, %250 : vector<32x288xf32>
    %cst_129 = arith.constant 0.254829586 : f32
    %262 = vector.broadcast %cst_129 : f32 to vector<32x288xf32>
    %263 = arith.addf %261, %262 : vector<32x288xf32>
    %264 = arith.mulf %263, %250 : vector<32x288xf32>
    %cst_130 = arith.constant 0.000000e+00 : f32
    %265 = vector.broadcast %cst_130 : f32 to vector<32x288xf32>
    %266 = arith.subf %265, %245 : vector<32x288xf32>
    %267 = arith.mulf %266, %245 : vector<32x288xf32>
    %268 = math.exp %267 : vector<32x288xf32>
    %269 = arith.mulf %264, %268 : vector<32x288xf32>
    %cst_131 = arith.constant 1.000000e+00 : f32
    %270 = vector.broadcast %cst_131 : f32 to vector<32x288xf32>
    %271 = arith.subf %270, %269 : vector<32x288xf32>
    %272 = arith.mulf %244, %271 : vector<32x288xf32>
    %cst_132 = arith.constant 1.000000e+00 : f32
    %273 = vector.broadcast %cst_132 : f32 to vector<32x288xf32>
    %274 = arith.addf %273, %272 : vector<32x288xf32>
    %275 = arith.mulf %237, %274 : vector<32x288xf32>
    %276 = vector.broadcast %0 : vector<1x288xf32> to vector<32x288xf32>
    %277 = arith.mulf %275, %276 : vector<32x288xf32>
    %278 = arith.truncf %277 : vector<32x288xf32> to vector<32x288xbf16>
    %c0_133 = arith.constant 0 : index
    %c19_134 = arith.constant 19 : index
    %279 = vector.load %arg10[%c0_133, %c19_134] : memref<32x328xbf16, #tpu.memory_space<vmem>>, vector<32x288xbf16>
    tpu.vector_store %arg10[%c0_133, %c19_134], %278 {strides = array<i32>} : memref<32x328xbf16, #tpu.memory_space<vmem>>, vector<32x288xbf16>,
    %c0_135 = arith.constant 0 : index
    %c0_136 = arith.constant 0 : index
    %280 = vector.load %arg10[%c0_135, %c0_136] : memref<32x328xbf16, #tpu.memory_space<vmem>>, vector<32x328xbf16>
    %281 = vector.extract_strided_slice %280 {offsets = [0, 0], sizes = [32, 288], strides = [1, 1]} : vector<32x328xbf16> to vector<32x288xbf16>
    %c0_137 = arith.constant 0 : index
    %c0_138 = arith.constant 0 : index
    %282 = vector.load %arg12[%c0_137, %c0_138] : memref<288x288xbf16, #tpu.memory_space<vmem>>, vector<32x288xbf16>
    tpu.vector_store %arg12[%c0_137, %c0_138], %281 {strides = array<i32>} : memref<288x288xbf16, #tpu.memory_space<vmem>>, vector<32x288xbf16>,
    %283 = vector.extract_strided_slice %280 {offsets = [0, 1], sizes = [32, 288], strides = [1, 1]} : vector<32x328xbf16> to vector<32x288xbf16>
    %c32_139 = arith.constant 32 : index
    %c0_140 = arith.constant 0 : index
    %284 = vector.load %arg12[%c32_139, %c0_140] : memref<288x288xbf16, #tpu.memory_space<vmem>>, vector<32x288xbf16>
    tpu.vector_store %arg12[%c32_139, %c0_140], %283 {strides = array<i32>} : memref<288x288xbf16, #tpu.memory_space<vmem>>, vector<32x288xbf16>,
    %285 = vector.extract_strided_slice %280 {offsets = [0, 2], sizes = [32, 288], strides = [1, 1]} : vector<32x328xbf16> to vector<32x288xbf16>
    %c64_141 = arith.constant 64 : index
    %c0_142 = arith.constant 0 : index
    %286 = vector.load %arg12[%c64_141, %c0_142] : memref<288x288xbf16, #tpu.memory_space<vmem>>, vector<32x288xbf16>
    tpu.vector_store %arg12[%c64_141, %c0_142], %285 {strides = array<i32>} : memref<288x288xbf16, #tpu.memory_space<vmem>>, vector<32x288xbf16>,
    %287 = vector.extract_strided_slice %280 {offsets = [0, 18], sizes = [32, 288], strides = [1, 1]} : vector<32x328xbf16> to vector<32x288xbf16>
    %c96_143 = arith.constant 96 : index
    %c0_144 = arith.constant 0 : index
    %288 = vector.load %arg12[%c96_143, %c0_144] : memref<288x288xbf16, #tpu.memory_space<vmem>>, vector<32x288xbf16>
    tpu.vector_store %arg12[%c96_143, %c0_144], %287 {strides = array<i32>} : memref<288x288xbf16, #tpu.memory_space<vmem>>, vector<32x288xbf16>,
    %289 = vector.extract_strided_slice %280 {offsets = [0, 19], sizes = [32, 288], strides = [1, 1]} : vector<32x328xbf16> to vector<32x288xbf16>
    %c128_145 = arith.constant 128 : index
    %c0_146 = arith.constant 0 : index
    %290 = vector.load %arg12[%c128_145, %c0_146] : memref<288x288xbf16, #tpu.memory_space<vmem>>, vector<32x288xbf16>
    tpu.vector_store %arg12[%c128_145, %c0_146], %289 {strides = array<i32>} : memref<288x288xbf16, #tpu.memory_space<vmem>>, vector<32x288xbf16>,
    %291 = vector.extract_strided_slice %280 {offsets = [0, 20], sizes = [32, 288], strides = [1, 1]} : vector<32x328xbf16> to vector<32x288xbf16>
    %c160_147 = arith.constant 160 : index
    %c0_148 = arith.constant 0 : index
    %292 = vector.load %arg12[%c160_147, %c0_148] : memref<288x288xbf16, #tpu.memory_space<vmem>>, vector<32x288xbf16>
    tpu.vector_store %arg12[%c160_147, %c0_148], %291 {strides = array<i32>} : memref<288x288xbf16, #tpu.memory_space<vmem>>, vector<32x288xbf16>,
    %293 = vector.extract_strided_slice %280 {offsets = [0, 36], sizes = [32, 288], strides = [1, 1]} : vector<32x328xbf16> to vector<32x288xbf16>
    %c192_149 = arith.constant 192 : index
    %c0_150 = arith.constant 0 : index
    %294 = vector.load %arg12[%c192_149, %c0_150] : memref<288x288xbf16, #tpu.memory_space<vmem>>, vector<32x288xbf16>
    tpu.vector_store %arg12[%c192_149, %c0_150], %293 {strides = array<i32>} : memref<288x288xbf16, #tpu.memory_space<vmem>>, vector<32x288xbf16>,
    %295 = vector.extract_strided_slice %280 {offsets = [0, 37], sizes = [32, 288], strides = [1, 1]} : vector<32x328xbf16> to vector<32x288xbf16>
    %c224_151 = arith.constant 224 : index
    %c0_152 = arith.constant 0 : index
    %296 = vector.load %arg12[%c224_151, %c0_152] : memref<288x288xbf16, #tpu.memory_space<vmem>>, vector<32x288xbf16>
    tpu.vector_store %arg12[%c224_151, %c0_152], %295 {strides = array<i32>} : memref<288x288xbf16, #tpu.memory_space<vmem>>, vector<32x288xbf16>,
    %297 = vector.extract_strided_slice %280 {offsets = [0, 38], sizes = [32, 288], strides = [1, 1]} : vector<32x328xbf16> to vector<32x288xbf16>
    %c256_153 = arith.constant 256 : index
    %c0_154 = arith.constant 0 : index
    %298 = vector.load %arg12[%c256_153, %c0_154] : memref<288x288xbf16, #tpu.memory_space<vmem>>, vector<32x288xbf16>
    tpu.vector_store %arg12[%c256_153, %c0_154], %297 {strides = array<i32>} : memref<288x288xbf16, #tpu.memory_space<vmem>>, vector<32x288xbf16>,
    %c0_155 = arith.constant 0 : index
    %c0_156 = arith.constant 0 : index
    %299 = vector.load %arg5[%c0_155, %c0_156] : memref<32x288xbf16, #tpu.memory_space<vmem>>, vector<32x288xbf16>
    %c0_157 = arith.constant 0 : index
    %c0_158 = arith.constant 0 : index
    %300 = vector.load %arg12[%c0_157, %c0_158] : memref<288x288xbf16, #tpu.memory_space<vmem>>, vector<288x288xbf16>
    %cst_159 = arith.constant dense<0.000000e+00> : vector<32x288xf32>
    %301 = tpu.matmul %299, %300, %cst_159 {dimension_numbers = #tpu.dot_dimension_numbers<[1], [0], [0], [1], [0, 0, 1, 1], [], []>} : vector<32x288xbf16>, vector<288x288xbf16>, vector<32x288xf32> -> vector<32x288xf32>
    %c0_160 = arith.constant 0 : index
    %c0_161 = arith.constant 0 : index
    %302 = vector.load %arg6[%c0_160, %c0_161] : memref<32x1xf32, #tpu.memory_space<vmem>>, vector<32x1xf32>
    %c0_162 = arith.constant 0 : index
    %c0_163 = arith.constant 0 : index
    %303 = vector.load %arg7[%c0_162, %c0_163] : memref<32x1xf32, #tpu.memory_space<vmem>>, vector<32x1xf32>
    %304 = vector.broadcast %0 : vector<1x288xf32> to vector<32x288xf32>
    %305 = arith.mulf %301, %304 : vector<32x288xf32>
    %cst_164 = arith.constant dense<0.000000e+00> : vector<32xf32>
    %306 = vector.multi_reduction <add>, %305, %cst_164 [1] : vector<32x288xf32> to vector<32xf32>
    %307 = vector.shape_cast %306 : vector<32xf32> to vector<32x1xf32>
    %cst_165 = arith.constant dense<0.000000e+00> : vector<1xf32>
    %308 = vector.multi_reduction <add>, %307, %cst_165 [0] : vector<32x1xf32> to vector<1xf32>
    %309 = vector.shape_cast %308 : vector<1xf32> to vector<1x1xf32>
    %cst_166 = arith.constant 1.22070313E-4 : f32
    %310 = vector.broadcast %cst_166 : f32 to vector<1x1xf32>
    %311 = arith.mulf %309, %310 : vector<1x1xf32>
    %312 = vector.broadcast %311 : vector<1x1xf32> to vector<32x288xf32>
    %313 = arith.subf %301, %312 : vector<32x288xf32>
    %314 = vector.broadcast %0 : vector<1x288xf32> to vector<32x288xf32>
    %315 = arith.mulf %313, %314 : vector<32x288xf32>
    %316 = arith.mulf %315, %315 : vector<32x288xf32>
    %cst_167 = arith.constant dense<0.000000e+00> : vector<32xf32>
    %317 = vector.multi_reduction <add>, %316, %cst_167 [1] : vector<32x288xf32> to vector<32xf32>
    %318 = vector.shape_cast %317 : vector<32xf32> to vector<32x1xf32>
    %cst_168 = arith.constant dense<0.000000e+00> : vector<1xf32>
    %319 = vector.multi_reduction <add>, %318, %cst_168 [0] : vector<32x1xf32> to vector<1xf32>
    %320 = vector.shape_cast %319 : vector<1xf32> to vector<1x1xf32>
    %cst_169 = arith.constant 1.22070313E-4 : f32
    %321 = vector.broadcast %cst_169 : f32 to vector<1x1xf32>
    %322 = arith.mulf %320, %321 : vector<1x1xf32>
    %323 = vector.broadcast %311 : vector<1x1xf32> to vector<32x288xf32>
    %324 = arith.subf %301, %323 : vector<32x288xf32>
    %cst_170 = arith.constant 9.99999974E-6 : f32
    %325 = vector.broadcast %cst_170 : f32 to vector<1x1xf32>
    %326 = arith.addf %322, %325 : vector<1x1xf32>
    %327 = math.rsqrt %326 : vector<1x1xf32>
    %328 = vector.broadcast %327 : vector<1x1xf32> to vector<32x288xf32>
    %329 = arith.mulf %324, %328 : vector<32x288xf32>
    %330 = vector.broadcast %302 : vector<32x1xf32> to vector<32x288xf32>
    %331 = arith.mulf %329, %330 : vector<32x288xf32>
    %332 = vector.broadcast %303 : vector<32x1xf32> to vector<32x288xf32>
    %333 = arith.addf %331, %332 : vector<32x288xf32>
    %c1_171 = arith.constant 1 : index
    %c0_172 = arith.constant 0 : index
    %c0_173 = arith.constant 0 : index
    %334 = vector.load %arg9[%c1_171, %c0_172, %c0_173] : memref<2x32x288xf32, #tpu.memory_space<vmem>>, vector<1x32x288xf32>
    %335 = vector.shape_cast %334 : vector<1x32x288xf32> to vector<32x288xf32>
    %336 = vector.shape_cast %333 : vector<32x288xf32> to vector<1x32x288xf32>
    tpu.vector_store %arg9[%c1_171, %c0_172, %c0_173], %336 {strides = array<i32>} : memref<2x32x288xf32, #tpu.memory_space<vmem>>, vector<1x32x288xf32>,
    return
  }
  func.func @transform_0(%arg0: i32) -> (i32, i32, i32) {
    %c0_i32 = arith.constant 0 : i32
    %c0_i32_0 = arith.constant 0 : i32
    %c0_i32_1 = arith.constant 0 : i32
    return %arg0, %c0_i32, %c0_i32_0 : i32, i32, i32
  }
  func.func @transform_1(%arg0: i32) -> (i32, i32) {
    %c0_i32 = arith.constant 0 : i32
    %c0_i32_0 = arith.constant 0 : i32
    %c0_i32_1 = arith.constant 0 : i32
    return %c0_i32, %c0_i32_0 : i32, i32
  }
  func.func @transform_2(%arg0: i32) -> (i32, i32) {
    %c0_i32 = arith.constant 0 : i32
    %c0_i32_0 = arith.constant 0 : i32
    %c0_i32_1 = arith.constant 0 : i32
    return %c0_i32, %c0_i32_0 : i32, i32
  }
  func.func @transform_3(%arg0: i32) -> (i32, i32) {
    %c0_i32 = arith.constant 0 : i32
    %c0_i32_0 = arith.constant 0 : i32
    %c0_i32_1 = arith.constant 0 : i32
    return %c0_i32, %c0_i32_0 : i32, i32
  }
  func.func @transform_4(%arg0: i32) -> (i32, i32) {
    %c0_i32 = arith.constant 0 : i32
    %c0_i32_0 = arith.constant 0 : i32
    %c0_i32_1 = arith.constant 0 : i32
    return %c0_i32, %c0_i32_0 : i32, i32
  }
  func.func @transform_5(%arg0: i32) -> (i32, i32) {
    %c0_i32 = arith.constant 0 : i32
    %c0_i32_0 = arith.constant 0 : i32
    %c0_i32_1 = arith.constant 0 : i32
    return %c0_i32, %c0_i32_0 : i32, i32
  }
  func.func @transform_6(%arg0: i32) -> (i32, i32) {
    %c0_i32 = arith.constant 0 : i32
    %c0_i32_0 = arith.constant 0 : i32
    %c0_i32_1 = arith.constant 0 : i32
    return %c0_i32, %c0_i32_0 : i32, i32
  }
  func.func @transform_7(%arg0: i32) -> (i32, i32) {
    %c0_i32 = arith.constant 0 : i32
    %c0_i32_0 = arith.constant 0 : i32
    %c0_i32_1 = arith.constant 0 : i32
    return %c0_i32, %c0_i32_0 : i32, i32
  }
  func.func @transform_8(%arg0: i32) -> (i32, i32, i32) {
    %c0_i32 = arith.constant 0 : i32
    %c0_i32_0 = arith.constant 0 : i32
    %c0_i32_1 = arith.constant 0 : i32
    return %arg0, %c0_i32, %c0_i32_0 : i32, i32, i32
  }
}

</mosaic_0001>

<bundles_post_ra>
// kernel: _double_conv_impl.1
= control target key start
LH: loop header
LB: loop body
LE: loop exit
PB: predicated region body
PF: predicated region fallthrough
CT: control target
= control target key end

     0   :  { %vm46_vm0 = vcmask 257024   ;;  %s3648_s29 = smov 110   ;;  %s3649_s30 = smov 127   ;;  %vm209_vm1 = vcmask 293888   ;;  %v5404_v9 = vmov 0   ;;  %vm64_vm2 = vcmask 261124   ;;  %s5394_s0 = inlined_call_operand.vmem [shape: bf16[2,4,328], index: 0, kind: input, shape index: {}]   ;;  %s5395_s1 = inlined_call_operand.vmem [shape: bf16[32,36], index: 1, kind: input, shape index: {}]   ;;  %s5396_s7 = inlined_call_operand.vmem [shape: f32[1,288], index: 7, kind: input, shape index: {}]   ;;  %s5397_s2 = inlined_call_operand.vmem [shape: f32[32,1], index: 2, kind: input, shape index: {}]   ;;  %s5398_s3 = inlined_call_operand.vmem [shape: f32[32,1], index: 3, kind: input, shape index: {}]   ;;  %s5399_s4 = inlined_call_operand.vmem [shape: bf16[32,288], index: 4, kind: input, shape index: {}]   ;;  %s5400_s5 = inlined_call_operand.vmem [shape: f32[32,1], index: 5, kind: input, shape index: {}]   ;;  %s5401_s6 = inlined_call_operand.vmem [shape: f32[32,1], index: 6, kind: input, shape index: {}]   ;;  %s5402_s8 = inlined_call_operand.vmem [shape: f32[2,32,288], index: 8, kind: output, shape index: {}]  }
   0x1   :  { %v37_v0 = vld [vmem:[%s5394_s0] sm:$0x3f]  ;;  %s3650_s9 = smov 126   ;;  %s3651_s10 = smov 108   ;;  %258 = vmatprep.mubr.bf16.mxu0 %v5404_v9  ;;  %3483 = vset.pattern.permute.xlu1 %v5404_v9  ;;  %vm87_vm3 = vcmask 900096   ;;  %vm56_vm4 = vcmask 1039360  }
   0x2   :  { %v38_v1 = vunpack.c.l.bf16 %v37_v0  ;;  %v39_v2 = vunpack.c.h.bf16 %v37_v0  ;;  %s3652_s11 = smov 109   ;;  %s3653_s12 = smov 91   ;;  %v3728_v10 = vld [vmem:[%s5395_s1] sm:$0xff]   ;;  %3484 = vset.pattern.permute.xlu0 %v5404_v9  ;;  %vm72_vm5 = vcmask 1031168   ;;  %vm117_vm6 = vcmask 883712  }
   0x3   :  { %s3654_s13 = smov 92   ;;  %s3655_s14 = smov 90   ;;  %3384 = vmatprep.mubr.msk.bf16.mxu1 %vm209_vm1, %v3728_v10  ;;  %v3274_v24 = vld [vmem:[%s5394_s0 + $0x6] sm:$0x3f]  ;;  %vm102_vm7 = vcmask 891904   ;;  %vm147_vm8 = vcmask 744448  }
   0x4   :  { %v49_v3 = vcombine.low %v39_v2, %v39_v2  ;;  %44 = vst [vmem:[#allocation3] sm:$0xf] %v38_v1  ;;  %v42_v4 = vcombine.high %v38_v1, %v38_v1  ;;  %47 = vst.msk [vmem:[#allocation3 + $0x10] sm:$0xf] %vm46_vm0, %v39_v2  ;;  %v48_v6 = vcombine.low %v38_v1, %v38_v1  ;;  %v3744_v28 = vunpack.c.l.bf16 %v3274_v24 }
   0x5   :  { %v3748_v31 = vunpack.c.h.bf16 %v3274_v24  ;;  %vm132_vm9 = vcmask 752640   ;;  %vm5416_vm10 = vcmask 736256   ;;  %vm5403_vm11 = vcmask 1041408   ;;  %v3526_v24 = vld [vmem:[%s5395_s1 + $0x8] sm:$0xff]  }
   0x6   :  { %v3453_v5 = vpack.i.bf16 %v49_v3, %v38_v1  ;;  %45 = vst [vmem:[#allocation3 + $0x8] sm:$0xf] %v42_v4  ;;  %v3448_v7 = vpack.i.bf16 %v39_v2, %v42_v4  ;;  %v3478_v8 = vpack.i.bf16 %v42_v4, %v38_v1  ;;  %5429 = vst [vmem:[#allocation5_spill] sm:$0xff] %v3744_v28  ;;  %vm365_vm12 = vcmask 261120  }
   0x7   :  { %v3752_v33 = vcombine.high %v3744_v28, %v3744_v28 }
   0x8   :  { %3454 = vrot.lane.b32.xlu1 %v3453_v5, %s3648_s29  ;;  %3444 = vrot.lane.b32.xlu0 %v3453_v5, %s3649_s30 }
   0x9   :  { %5430 = vst [vmem:[#allocation6_spill] sm:$0xff] %v3752_v33 }
   0xc   :  { %50 = vrot.lane.b32.xlu1 %v48_v6, %s3649_s30  ;;  %3449 = vrot.lane.b32.xlu0 %v3448_v7, %s3650_s9 }
  0x10   :  { %81 = vrot.lane.b32.xlu1 %v48_v6, %s3648_s29  ;;  %66 = vrot.lane.b32.xlu0 %v38_v1, %s3650_s9 }
  0x14   :  { %3464 = vrot.lane.b32.xlu1 %v3453_v5, %s3651_s10  ;;  %3459 = vrot.lane.b32.xlu0 %v3448_v7, %s3652_s11 }
  0x18   :  { %3474 = vrot.lane.b32.xlu1 %v3453_v5, %s3653_s12  ;;  %3469 = vrot.lane.b32.xlu0 %v3448_v7, %s3654_s13 }
  0x1c   :  { %111 = vrot.lane.b32.xlu1 %v48_v6, %s3651_s10  ;;  %96 = vrot.lane.b32.xlu0 %v38_v1, %s3652_s11 }
  0x20   :  { %141 = vrot.lane.b32.xlu1 %v48_v6, %s3653_s12  ;;  %126 = vrot.lane.b32.xlu0 %v38_v1, %s3654_s13 }
  0x24   :  { %3479 = vrot.lane.b32.xlu0 %v3478_v8, %s3655_s14  ;;  %160 = vrot.lane.b32.xlu1 %v39_v2, %s3655_s14 }
  0x7a   :  { %v3455_v11 = vpop.permute.xlu1 %3454  ;;  %v3445_v12 = vpop.permute.xlu0 %3444 }
  0x7b   :  { %v3457_v13 = vunpack.i.h.bf16 %v3455_v11  ;;  %v3456_v14 = vunpack.i.l.bf16 %v3455_v11  ;;  %v3447_v15 = vunpack.i.h.bf16 %v3445_v12  ;;  %v3446_v16 = vunpack.i.l.bf16 %v3445_v12 }
  0x7d   :  { %95 = vst.msk [vmem:[#allocation3 + $0x28] sm:$0xf0] %vm64_vm2, %v3457_v13  ;;  %v89_v17 = vsel %vm87_vm3, %v3456_v14, %v3457_v13  ;;  %65 = vst.msk [vmem:[#allocation3 + $0x10] sm:$0xf0] %vm64_vm2, %v3447_v15  ;;  %v58_v18 = vsel %vm56_vm4, %v3446_v16, %v3447_v15 }
  0x7e   :  { %94 = vst [vmem:[#allocation3 + $0x20] sm:$0xf0] %v89_v17  ;;  %63 = vst [vmem:[#allocation3 + $0x8] sm:$0xf0] %v58_v18  ;;  %v51_v19 = vpop.permute.xlu1 %50  ;;  %v3450_v20 = vpop.permute.xlu0 %3449 }
  0x7f   :  { %v57_v21 = vsel %vm56_vm4, %v51_v19, %v3446_v16  ;;  %v3452_v22 = vunpack.i.h.bf16 %v3450_v20  ;;  %v3451_v23 = vunpack.i.l.bf16 %v3450_v20 }
  0x80   :  { %62 = vst [vmem:[#allocation3] sm:$0xf0] %v57_v21 }
  0x81   :  { %80 = vst.msk [vmem:[#allocation3 + $0x28] sm:$0xf] %vm46_vm0, %v3452_v22  ;;  %v74_v25 = vsel %vm72_vm5, %v3451_v23, %v3452_v22 }
  0x82   :  { %79 = vst [vmem:[#allocation3 + $0x20] sm:$0xf] %v74_v25  ;;  %v82_v26 = vpop.permute.xlu1 %81  ;;  %v67_v27 = vpop.permute.xlu0 %66 }
  0x83   :  { %v88_v29 = vsel %vm87_vm3, %v82_v26, %v3456_v14  ;;  %v73_v30 = vsel %vm72_vm5, %v67_v27, %v3451_v23 }
  0x84   :  { %93 = vst [vmem:[#allocation3 + $0x18] sm:$0xf0] %v88_v29  ;;  %78 = vst [vmem:[#allocation3 + $0x18] sm:$0xf] %v73_v30  ;;  %v177_v32 = vld [vmem:[#allocation3 + $0x10] sm:$0xff]  ;;  %v337_v29 = vlaneseq }
  0x85   :  { %1674 = vst.msk [vmem:[#allocation3 + $0x10] sm:$0xf] %vm46_vm0, %v3748_v31  ;;  %v176_v34 = vld [vmem:[#allocation3 + $0x8] sm:$0xff] }
  0x86   :  { %v3465_v35 = vpop.permute.xlu1 %3464  ;;  %v3460_v36 = vpop.permute.xlu0 %3459  ;;  %1673 = vst [vmem:[#allocation3 + $0x8] sm:$0xf] %v3752_v33  ;;  %v338_v30 = vshrl.u32 %v337_v29, 7 }
  0x87   :  { %v3467_v37 = vunpack.i.h.bf16 %v3465_v35  ;;  %v3466_v38 = vunpack.i.l.bf16 %v3465_v35  ;;  %v3462_v39 = vunpack.i.h.bf16 %v3460_v36  ;;  %v3461_v40 = vunpack.i.l.bf16 %v3460_v36  ;;  %v175_v41 = vld [vmem:[#allocation3] sm:$0xff]  ;;  %v30_v35 = vld [vmem:[%s5396_s7] sm:$0x7]  ;;  %s3658_s7 = smov 19  }
  0x88   :  { %v180_v42 = vld [vmem:[#allocation3 + $0x28] sm:$0xff]  ;;  %1672 = vst [vmem:[#allocation3] sm:$0xf] %v3744_v28  ;;  %v343_v36 = vsub.s32 1, %v338_v30 }
  0x89   :  { %125 = vst.msk [vmem:[#allocation3 + $0x40] sm:$0xf0] %vm64_vm2, %v3467_v37  ;;  %v119_v43 = vsel %vm117_vm6, %v3466_v38, %v3467_v37  ;;  %v104_v44 = vsel %vm102_vm7, %v3461_v40, %v3462_v39  ;;  %v192_v45 = vpack.c.bf16 %v180_v42, %v177_v32  ;;  %v179_v46 = vld [vmem:[#allocation3 + $0x20] sm:$0xff]  ;;  %v347_v32 = vsub.s32 2, %v338_v30 }
  0x8a   :  { %110 = vst.msk [vmem:[#allocation3 + $0x40] sm:$0xf] %vm46_vm0, %v3462_v39  ;;  %124 = vst [vmem:[#allocation3 + $0x38] sm:$0xf0] %v119_v43  ;;  %v3475_v47 = vpop.permute.xlu1 %3474  ;;  %v3470_v48 = vpop.permute.xlu0 %3469  ;;  %v191_v49 = vpack.c.bf16 %v179_v46, %v176_v34  ;;  %v339_v34 = vsub.s32 0, %v338_v30 }
  0x8b   :  { %109 = vst [vmem:[#allocation3 + $0x38] sm:$0xf] %v104_v44  ;;  %v3477_v50 = vunpack.i.h.bf16 %v3475_v47  ;;  %v3476_v51 = vunpack.i.l.bf16 %v3475_v47  ;;  %v3472_v52 = vunpack.i.h.bf16 %v3470_v48  ;;  %v3471_v53 = vunpack.i.l.bf16 %v3470_v48  ;;  %3378 = vmatprep.subr.bf16.mxu1 %v192_v45  ;;  %v178_v54 = vld [vmem:[#allocation3 + $0x18] sm:$0xff] }
  0x8c   :  { %226 = vmatprep.subr.bf16.mxu0 %v191_v49  ;;  %3379 = vmatpush3.bf16.msra.mxu1 %v192_v45  ;;  %v190_v55 = vpack.c.bf16 %v178_v54, %v175_v41  ;;  %v3788_v37 = vrot.slane %v30_v35, %v347_v32 }
  0x8d   :  { %155 = vst.msk [vmem:[#allocation3 + $0x58] sm:$0xf0] %vm64_vm2, %v3477_v50  ;;  %v149_v56 = vsel %vm147_vm8, %v3476_v51, %v3477_v50  ;;  %v134_v57 = vsel %vm132_vm9, %v3471_v53, %v3472_v52 }
  0x8e   :  { %140 = vst.msk [vmem:[#allocation3 + $0x58] sm:$0xf] %vm46_vm0, %v3472_v52  ;;  %154 = vst [vmem:[#allocation3 + $0x50] sm:$0xf0] %v149_v56  ;;  %v112_v58 = vpop.permute.xlu1 %111  ;;  %v97_v59 = vpop.permute.xlu0 %96  ;;  %227 = vmatpush1.bf16.msra.mxu0 %v190_v55 }
  0x8f   :  { %139 = vst [vmem:[#allocation3 + $0x50] sm:$0xf] %v134_v57  ;;  %v118_v60 = vsel %vm117_vm6, %v112_v58, %v3466_v38  ;;  %v103_v61 = vsel %vm102_vm7, %v97_v59, %v3461_v40  ;;  %v3790_v38 = vrot.slane %v30_v35, %v339_v34 }
  0x90   :  { %123 = vst [vmem:[#allocation3 + $0x30] sm:$0xf0] %v118_v60  ;;  %108 = vst [vmem:[#allocation3 + $0x30] sm:$0xf] %v103_v61 }
  0x91   :  { %v183_v2 = vld [vmem:[#allocation3 + $0x40] sm:$0xff] }
  0x92   :  { %v142_v62 = vpop.permute.xlu1 %141  ;;  %v127_v63 = vpop.permute.xlu0 %126  ;;  %v182_v5 = vld [vmem:[#allocation3 + $0x38] sm:$0xff] }
  0x93   :  { %v148_v0 = vsel %vm147_vm8, %v142_v62, %v3476_v51  ;;  %v133_v1 = vsel %vm132_vm9, %v127_v63, %v3471_v53 }
  0x94   :  { %153 = vst [vmem:[#allocation3 + $0x48] sm:$0xf0] %v148_v0  ;;  %138 = vst [vmem:[#allocation3 + $0x48] sm:$0xf] %v133_v1 }
  0x95   :  { %v186_v3 = vld [vmem:[#allocation3 + $0x58] sm:$0xff] }
  0x96   :  { %v195_v4 = vpack.c.bf16 %v186_v3, %v183_v2  ;;  %v185_v6 = vld [vmem:[#allocation3 + $0x50] sm:$0xff]  ;;  %v3480_v7 = vpop.permute.xlu0 %3479  ;;  %v161_v8 = vpop.permute.xlu1 %160 }
  0x97   :  { %v194_v11 = vpack.c.bf16 %v185_v6, %v182_v5  ;;  %v3482_v12 = vunpack.i.h.bf16 %v3480_v7  ;;  %v3481_v13 = vunpack.i.l.bf16 %v3480_v7  ;;  %170 = vst.msk [vmem:[#allocation3 + $0x70] sm:$0xf] %vm46_vm0, %v161_v8  ;;  %v181_v16 = vld [vmem:[#allocation3 + $0x30] sm:$0xff] }
  0x98   :  { %3380 = vmatprep.subr.bf16.mxu1 %v195_v4 }
  0x99   :  { %228 = vmatprep.subr.bf16.mxu0 %v194_v11  ;;  %3381 = vmatpush3.bf16.msra.mxu1 %v195_v4  ;;  %v163_v14 = vsel %vm5416_vm10, %v3481_v13, %v3482_v12  ;;  %v164_v15 = vsel %vm5416_vm10, %v3482_v12, %v161_v8 }
  0x9a   :  { %168 = vst [vmem:[#allocation3 + $0x60] sm:$0xf] %v163_v14  ;;  %169 = vst [vmem:[#allocation3 + $0x68] sm:$0xf] %v164_v15 }
  0x9b   :  { %v184_v17 = vld [vmem:[#allocation3 + $0x48] sm:$0xff] }
  0x9c   :  { %v193_v18 = vpack.c.bf16 %v184_v17, %v181_v16 }
  0x9e   :  { %229 = vmatpush1.bf16.msra.mxu0 %v193_v18  ;;  %v189_v19 = vld [vmem:[#allocation3 + $0x70] sm:$0xf] }
  0x9f   :  { %v198_v20 = vpack.c.bf16 %v189_v19, %v189_v19 }
  0xa1   :  { %3430 = vmatprep.subr.msk.bf16.mxu1 %vm5403_vm11, %v198_v20  ;;  %v188_v21 = vld [vmem:[#allocation3 + $0x68] sm:$0xf]  ;;  %v224_v22 = vsel %vm5403_vm11, %v198_v20, 0  ;;  %v187_v23 = vld [vmem:[#allocation3 + $0x60] sm:$0xf] }
  0xa2   :  { %v197_v25 = vpack.c.bf16 %v188_v21, %v188_v21  ;;  %3383 = vmatpush3.bf16.msra.mxu1 %v224_v22  ;;  %v196_v26 = vpack.c.bf16 %v187_v23, %v187_v23 }
  0xa4   :  { %3259 = vmatprep.subr.msk.bf16.mxu0 %vm5403_vm11, %v197_v25  ;;  %v218_v27 = vsel %vm5403_vm11, %v196_v26, 0 }
  0xa5   :  { %231 = vmatpush1.bf16.msra.mxu0 %v218_v27  ;;  %3385 = vmatmul.mubr.msk.bf16.vlgmr.msra.gmra.mrb[0].mxu1 %vm209_vm1, %v3526_v24 }
  0xa8   :  { %3260 = vmatmul.mubr.msk.bf16.vlgmr.msra.gmra.mrb[0].mxu0 %vm209_vm1, %v3728_v10  ;;  %v3794_v10 = vrot.slane %v30_v35, %v343_v36 }
  0xa9   :  { %268 = vmatprep.mubr.bf16.mxu0 %v5404_v9 }
  0xb0   :  { %3261 = vmatmul.mubr.msk.bf16.gmra.mrb[4].mxu0 %vm209_vm1, %v3526_v24 }
 0x178   :  { %v3792_v39 = vpop.f32.mrb[0].mxu1 }
 0x179   :  { %v313_v40 = vpop.f32.mrb[1].mxu1  ;;  %v360_v60 = vmul.f32 %v3792_v39, %v3788_v37 }
 0x17a   :  { %v354_v41 = vmul.f32 %v3788_v37, %v313_v40  ;;  %v3797_v42 = vpop.f32.mrb[2].mxu1 }
 0x17b   :  { %v260_v43 = vpop.f32.mrb[0].mxu0  ;;  %v316_v44 = vpop.f32.mrb[3].mxu1  ;;  %v363_v1 = vmul.f32 %v3797_v42, %v3788_v37  ;;  %v376_v6 = vsel %vm365_vm12, %v360_v60, 0.0 }
 0x17c   :  { %v352_v45 = vmul.f32 %v3790_v38, %v260_v43  ;;  %v262_v46 = vpop.f32.mrb[1].mxu0  ;;  %v357_v47 = vmul.f32 %v3788_v37, %v316_v44  ;;  %v366_v52 = vsel %vm365_vm12, %v354_v41, 0.0 }
 0x17d   :  { %v353_v48 = vmul.f32 %v3794_v10, %v262_v46  ;;  %v264_v49 = vpop.f32.mrb[2].mxu0  ;;  %v381_v11 = vsel %vm365_vm12, %v363_v1, 0.0 }
 0x17e   :  { %v355_v50 = vmul.f32 %v3790_v38, %v264_v49  ;;  %v266_v51 = vpop.f32.mrb[3].mxu0  ;;  %v371_v55 = vsel %vm365_vm12, %v357_v47, 0.0 }
 0x17f   :  { %v356_v53 = vmul.f32 %v3794_v10, %v266_v51  ;;  %v364_v54 = vadd.f32 %v353_v48, %v352_v45 }
 0x181   :  { %v367_v56 = vadd.f32 %v366_v52, %v364_v54  ;;  %v370_v57 = vadd.f32 %v356_v53, %v355_v50 }
 0x183   :  { %368 = vadd.xlane.f32.xlu0 %v367_v56  ;;  %v270_v58 = vpop.f32.mrb[4].mxu0  ;;  %v372_v59 = vadd.f32 %v371_v55, %v370_v57 }
 0x184   :  { %v358_v61 = vmul.f32 %v3790_v38, %v270_v58  ;;  %v3809_v62 = vpop.f32.mrb[5].mxu0 }
 0x185   :  { %v359_v63 = vmul.f32 %v3794_v10, %v3809_v62  ;;  %373 = vadd.xlane.f32.xlu1 %v372_v59  ;;  %v274_v0 = vpop.f32.mrb[6].mxu0 }
 0x186   :  { %v361_v2 = vmul.f32 %v3790_v38, %v274_v0  ;;  %v276_v3 = vpop.f32.mrb[7].mxu0 }
 0x187   :  { %v362_v4 = vmul.f32 %v3794_v10, %v276_v3  ;;  %v375_v5 = vadd.f32 %v359_v63, %v358_v61 }
 0x189   :  { %v377_v7 = vadd.f32 %v376_v6, %v375_v5  ;;  %v380_v8 = vadd.f32 %v362_v4, %v361_v2 }
 0x18b   :  { %378 = vadd.xlane.f32.xlu0 %v377_v7  ;;  %v382_v12 = vadd.f32 %v381_v11, %v380_v8 }
 0x18f   :  { %383 = vadd.xlane.f32.xlu0 %v382_v12 }
 0x210   :  { %v369_v13 = vpop.xlane.xlu0 %368 }
 0x212   :  { %v374_v14 = vpop.xlane.xlu1 %373 }
 0x213   :  { %v385_v16 = vadd.f32 %v374_v14, %v369_v13 }
 0x218   :  { %v379_v15 = vpop.xlane.xlu0 %378 }
 0x219   :  { %v386_v17 = vadd.f32 %v385_v16, %v379_v15 }
 0x21c   :  { %v384_v18 = vpop.xlane.xlu0 %383 }
 0x21d   :  { %v387_v19 = vadd.f32 %v386_v17, %v384_v18  ;;  %v328_v18 = vld [vmem:[%s5397_s2] sm:$0xff] }
 0x21f   :  { %v388_v20 = vrot.slane %v387_v19, 4 }
 0x221   :  { %v389_v21 = vadd.f32 %v388_v20, %v387_v19  ;;  %v329_v19 = vld [vmem:[%s5397_s2 + $0x8] sm:$0xff]  ;;  %v332_v20 = vld [vmem:[%s5398_s3] sm:$0xff] }
 0x223   :  { %v390_v22 = vrot.slane %v389_v21, 2 }
 0x225   :  { %v391_v23 = vadd.f32 %v390_v22, %v389_v21  ;;  %v333_v21 = vld [vmem:[%s5398_s3 + $0x8] sm:$0xff]  ;;  %v330_v22 = vld [vmem:[%s5397_s2 + $0x10] sm:$0xff] }
 0x227   :  { %v392_v24 = vrot.slane %v391_v23, 1 }
 0x229   :  { %v393_v25 = vadd.f32 %v392_v24, %v391_v23  ;;  %v331_v23 = vld [vmem:[%s5397_s2 + $0x18] sm:$0xff]  ;;  %v334_v24 = vld [vmem:[%s5398_s3 + $0x10] sm:$0xff] }
 0x22b   :  { %v394_v26 = vmul.f32 0.00012207031, %v393_v25  ;;  %v335_v25 = vld [vmem:[%s5398_s3 + $0x18] sm:$0xff] }
 0x22d   :  { %v3819_v27 = vsub.f32 %v264_v49, %v394_v26  ;;  %v3821_v29 = vsub.f32 %v266_v51, %v394_v26  ;;  %v3823_v30 = vsub.f32 %v316_v44, %v394_v26  ;;  %v3825_v32 = vsub.f32 %v260_v43, %v394_v26 }
 0x22e   :  { %v3827_v34 = vsub.f32 %v262_v46, %v394_v26  ;;  %v3829_v35 = vsub.f32 %v313_v40, %v394_v26  ;;  %v3831_v36 = vsub.f32 %v274_v0, %v394_v26  ;;  %v3833_v41 = vsub.f32 %v276_v3, %v394_v26 }
 0x22f   :  { %v410_v45 = vmul.f32 %v3819_v27, %v3790_v38  ;;  %v411_v47 = vmul.f32 %v3821_v29, %v3794_v10  ;;  %v412_v44 = vmul.f32 %v3823_v30, %v3788_v37  ;;  %v407_v43 = vmul.f32 %v3825_v32, %v3790_v38 }
 0x230   :  { %v408_v40 = vmul.f32 %v3827_v34, %v3794_v10  ;;  %v409_v46 = vmul.f32 %v3829_v35, %v3788_v37  ;;  %v3848_v48 = vsub.f32 %v3797_v42, %v394_v26  ;;  %v416_v49 = vmul.f32 %v3831_v36, %v3790_v38 }
 0x231   :  { %v422_v50 = vmul.f32 %v410_v45, %v410_v45  ;;  %v423_v51 = vmul.f32 %v411_v47, %v411_v47  ;;  %v424_v52 = vmul.f32 %v412_v44, %v412_v44  ;;  %v419_v53 = vmul.f32 %v407_v43, %v407_v43 }
 0x232   :  { %v420_v54 = vmul.f32 %v408_v40, %v408_v40  ;;  %v421_v55 = vmul.f32 %v409_v46, %v409_v46  ;;  %v417_v56 = vmul.f32 %v3833_v41, %v3794_v10  ;;  %v418_v57 = vmul.f32 %v3848_v48, %v3788_v37 }
 0x233   :  { %v436_v59 = vadd.f32 %v423_v51, %v422_v50  ;;  %v437_v60 = vsel %vm365_vm12, %v424_v52, 0.0  ;;  %v428_v42 = vmul.f32 %v416_v49, %v416_v49  ;;  %v3857_v61 = vsub.f32 %v270_v58, %v394_v26 }
 0x234   :  { %v431_v63 = vadd.f32 %v420_v54, %v419_v53  ;;  %v432_v0 = vsel %vm365_vm12, %v421_v55, 0.0  ;;  %v429_v1 = vmul.f32 %v417_v56, %v417_v56  ;;  %v430_v2 = vmul.f32 %v418_v57, %v418_v57 }
 0x235   :  { %v438_v3 = vadd.f32 %v437_v60, %v436_v59  ;;  %v402_v4 = vsub.f32 %v3809_v62, %v394_v26  ;;  %v3862_v5 = vsub.f32 %v3792_v39, %v394_v26  ;;  %v413_v6 = vmul.f32 %v3857_v61, %v3790_v38 }
 0x236   :  { %v433_v7 = vadd.f32 %v432_v0, %v431_v63  ;;  %v446_v8 = vadd.f32 %v429_v1, %v428_v42  ;;  %v447_v11 = vsel %vm365_vm12, %v430_v2, 0.0 }
 0x237   :  { %439 = vadd.xlane.f32.xlu0 %v438_v3  ;;  %v414_v58 = vmul.f32 %v402_v4, %v3794_v10  ;;  %v415_v12 = vmul.f32 %v3862_v5, %v3788_v37  ;;  %v425_v13 = vmul.f32 %v413_v6, %v413_v6 }
 0x238   :  { %434 = vadd.xlane.f32.xlu1 %v433_v7  ;;  %v448_v14 = vadd.f32 %v447_v11, %v446_v8 }
 0x239   :  { %v426_v62 = vmul.f32 %v414_v58, %v414_v58  ;;  %v427_v15 = vmul.f32 %v415_v12, %v415_v12 }
 0x23b   :  { %449 = vadd.xlane.f32.xlu0 %v448_v14  ;;  %v441_v39 = vadd.f32 %v426_v62, %v425_v13  ;;  %v442_v16 = vsel %vm365_vm12, %v427_v15, 0.0 }
 0x23d   :  { %v443_v17 = vadd.f32 %v442_v16, %v441_v39 }
 0x23f   :  { %444 = vadd.xlane.f32.xlu1 %v443_v17 }
 0x250   :  { %477 = vperm.xlu1 %3483, %v328_v18  }
 0x251   :  { %482 = vperm.xlu0 %3484, %v329_v19  }
 0x254   :  { %509 = vperm.xlu1 %3483, %v332_v20  }
 0x258   :  { %514 = vperm.xlu1 %3483, %v333_v21  }
 0x25c   :  { %487 = vperm.xlu1 %3483, %v330_v22  }
 0x260   :  { %492 = vperm.xlu1 %3483, %v331_v23  }
 0x264   :  { %519 = vperm.xlu1 %3483, %v334_v24  }
 0x268   :  { %524 = vperm.xlu1 %3483, %v335_v25  }
 0x2c4   :  { %v440_v45 = vpop.xlane.xlu0 %439 }
 0x2c5   :  { %v435_v26 = vpop.xlane.xlu1 %434 }
 0x2c6   :  { %v451_v47 = vadd.f32 %v440_v45, %v435_v26 }
 0x2c8   :  { %v450_v40 = vpop.xlane.xlu0 %449 }
 0x2cc   :  { %v445_v44 = vpop.xlane.xlu1 %444 }
 0x2cd   :  { %v452_v43 = vadd.f32 %v451_v47, %v445_v44 }
 0x2cf   :  { %v453_v46 = vadd.f32 %v452_v43, %v450_v40 }
 0x2d0   :  { %v478_v52 = vpop.permute.xlu1 %477 }
 0x2d1   :  { %v454_v49 = vrot.slane %v453_v46, 4 }
 0x2d3   :  { %v455_v50 = vadd.f32 %v454_v49, %v453_v46 }
 0x2d4   :  { %v510_v56 = vpop.permute.xlu1 %509 }
 0x2d5   :  { %v456_v51 = vrot.slane %v455_v50, 2 }
 0x2d7   :  { %v457_v53 = vadd.f32 %v456_v51, %v455_v50 }
 0x2d8   :  { %v3895_v60 = vpop.permute.xlu1 %514 }
 0x2d9   :  { %v458_v54 = vrot.slane %v457_v53, 1 }
 0x2db   :  { %v459_v55 = vadd.f32 %v458_v54, %v457_v53 }
 0x2dc   :  { %v488_v42 = vpop.permute.xlu1 %487 }
 0x2dd   :  { %v460_v57 = vmul.f32 0.00012207031, %v459_v55 }
 0x2df   :  { %v461_v59 = vadd.f32 1e-05, %v460_v57 }
 0x2e0   :  { %v493_v7 = vpop.permute.xlu1 %492 }
 0x2e1   :  { %3544 = vrsqrt.f32 %v461_v59 }
 0x2e4   :  { %v520_v18 = vpop.permute.xlu1 %519 }
 0x2eb   :  { %v3897_v63 = vpop.eup %3544 }
 0x2ec   :  { %v463_v0 = vmul.f32 %v3897_v63, %v3825_v32  ;;  %v464_v1 = vmul.f32 %v3897_v63, %v3827_v34  ;;  %v465_v2 = vmul.f32 %v3897_v63, %v3829_v35  ;;  %v469_v3 = vmul.f32 %v3897_v63, %v3857_v61 }
 0x2ed   :  { %v470_v6 = vmul.f32 %v3897_v63, %v402_v4  ;;  %v471_v12 = vmul.f32 %v3897_v63, %v3862_v5  ;;  %v472_v35 = vmul.f32 %v3897_v63, %v3831_v36  ;;  %v473_v4 = vmul.f32 %v3897_v63, %v3833_v41 }
 0x2ee   :  { %v495_v8 = vmul.f32 %v478_v52, %v463_v0  ;;  %v496_v11 = vmul.f32 %v478_v52, %v464_v1  ;;  %v497_v58 = vmul.f32 %v478_v52, %v465_v2  ;;  %v501_v62 = vmul.f32 %v488_v42, %v469_v3 }
 0x2ef   :  { %v502_v34 = vmul.f32 %v488_v42, %v470_v6  ;;  %v503_v39 = vmul.f32 %v488_v42, %v471_v12  ;;  %v474_v17 = vmul.f32 %v3897_v63, %v3848_v48  ;;  %v504_v24 = vmul.f32 %v493_v7, %v472_v35 }
 0x2f0   :  { %v527_v13 = vadd.f32 %v510_v56, %v495_v8  ;;  %v528_v32 = vadd.f32 %v510_v56, %v496_v11  ;;  %v529_v14 = vadd.f32 %v510_v56, %v497_v58  ;;  %v533_v19 = vadd.f32 %v520_v18, %v501_v62  ;;  %v525_v11 = vpop.permute.xlu1 %524 }
 0x2f1   :  { %v534_v21 = vadd.f32 %v520_v18, %v502_v34  ;;  %v3916_v25 = vadd.f32 %v520_v18, %v503_v39  ;;  %v505_v45 = vmul.f32 %v493_v7, %v473_v4  ;;  %v506_v47 = vmul.f32 %v493_v7, %v474_v17 }
 0x2f2   :  { %v551_v15 = vmul.f32 0.70710677, %v527_v13  ;;  %v552_v61 = vmul.f32 0.70710677, %v528_v32  ;;  %v553_v16 = vmul.f32 0.70710677, %v529_v14 }
 0x2f3   :  { %5431 = vst [vmem:[#allocation7_spill] sm:$0xff] %v3916_v25  ;;  %v3918_v26 = vmul.f32 0.5, %v527_v13  ;;  %v557_v44 = vmul.f32 0.70710677, %v533_v19  ;;  %v558_v40 = vmul.f32 0.70710677, %v534_v21  ;;  %v3943_v35 = vadd.f32 %v525_v11, %v506_v47 }
 0x2f4   :  { %v587_v5 = vand.u32 2147483647, %v551_v15  ;;  %v588_v20 = vand.u32 2147483647, %v552_v61  ;;  %v589_v22 = vand.u32 2147483647, %v553_v16 }
 0x2f5   :  { %vm563_vm13 = vcmp.ge.f32.partialorder %v551_v15, 0.0  ;;  %vm564_vm14 = vcmp.ge.f32.partialorder %v552_v61, 0.0  ;;  %vm565_vm15 = vcmp.ge.f32.partialorder %v553_v16, 0.0  ;;  %v3920_v46 = vmul.f32 0.5, %v528_v32  ;;  %5433 = vst [vmem:[#allocation9_spill] sm:$0xff] %v3943_v35 }
 0x2f6   :  { %v599_v23 = vmul.f32 0.3275911, %v587_v5  ;;  %v743_v36 = vsub.f32 0.0, %v587_v5  ;;  %v744_v41 = vsub.f32 0.0, %v588_v20  ;;  %v600_v48 = vmul.f32 0.3275911, %v588_v20 }
 0x2f7   :  { %v745_v43 = vsub.f32 0.0, %v589_v22  ;;  %v601_v49 = vmul.f32 0.3275911, %v589_v22  ;;  %v3923_v51 = vmul.f32 0.70710677, %v3916_v25  ;;  %v3925_v52 = vmul.f32 0.5, %v529_v14 }
 0x2f8   :  { %v611_v50 = vadd.f32 1.0, %v599_v23  ;;  %v755_v53 = vmul.f32 %v743_v36, %v587_v5  ;;  %v3927_v54 = vmul.f32 0.5, %v533_v19  ;;  %v3929_v55 = vmul.f32 0.5, %v534_v21 }
 0x2f9   :  { %5432 = vst [vmem:[#allocation8_spill] sm:$0xff] %v3923_v51  ;;  %v5406_v56 = vmov -1.0   ;;  %v756_v0 = vmul.f32 %v744_v41, %v588_v20  ;;  %v612_v1 = vadd.f32 1.0, %v600_v48  ;;  %v757_v2 = vmul.f32 %v745_v43, %v589_v22 }
 0x2fa   :  { %v3933_v57 = vsel %vm563_vm13, 1.0, %v5406_v56  ;;  %v3937_v59 = vsel %vm564_vm14, 1.0, %v5406_v56  ;;  %v3940_v42 = vsel %vm565_vm15, 1.0, %v5406_v56  ;;  %v593_v3 = vand.u32 2147483647, %v557_v44 }
 0x2fb   :  { %v594_v6 = vand.u32 2147483647, %v558_v40  ;;  %v613_v7 = vadd.f32 1.0, %v601_v49  ;;  %3546 = vrcp.f32 %v611_v50  ;;  %vm569_vm11 = vcmp.ge.f32.partialorder %v557_v44, 0.0 }
 0x2fc   :  { %v595_v8 = vand.u32 2147483647, %v3923_v51  ;;  %v767_v58 = vmul.f32 1.442695, %v755_v53  ;;  %v605_v12 = vmul.f32 0.3275911, %v593_v3  ;;  %v536_v32 = vadd.f32 %v525_v11, %v504_v24 }
 0x2fd   :  { %v749_v13 = vsub.f32 0.0, %v593_v3  ;;  %v769_v14 = vmul.f32 1.442695, %v756_v0  ;;  %v606_v62 = vmul.f32 0.3275911, %v594_v6  ;;  %v750_v34 = vsub.f32 0.0, %v594_v6 }
 0x2fe   :  { %v537_v15 = vadd.f32 %v525_v11, %v505_v45  ;;  %3548 = vrcp.f32 %v612_v1  ;;  %v771_v39 = vmul.f32 1.442695, %v757_v2  ;;  %vm570_vm13 = vcmp.ge.f32.partialorder %v558_v40, 0.0 }
 0x2ff   :  { %3550 = vrcp.f32 %v613_v7  ;;  %v3947_v61 = vsel %vm569_vm11, 1.0, %v5406_v56  ;;  %v607_v16 = vmul.f32 0.3275911, %v595_v8  ;;  %v751_v4 = vsub.f32 0.0, %v595_v8 }
 0x300   :  { %3552 = vpow2.f32 %v767_v58  ;;  %v617_v17 = vadd.f32 1.0, %v605_v12  ;;  %v761_v18 = vmul.f32 %v749_v13, %v593_v3  ;;  %v560_v5 = vmul.f32 0.70710677, %v536_v32 }
 0x301   :  { %3554 = vpow2.f32 %v769_v14  ;;  %v618_v19 = vadd.f32 1.0, %v606_v62  ;;  %v762_v20 = vmul.f32 %v750_v34, %v594_v6  ;;  %v3949_v21 = vmul.f32 0.70710677, %v537_v15  ;;  %v483_v6 = vpop.permute.xlu0 %482 }
 0x302   :  { %3556 = vpow2.f32 %v771_v39  ;;  %v3952_v22 = vsel %vm570_vm13, 1.0, %v5406_v56  ;;  %v3955_v23 = vmul.f32 0.70710677, %v3943_v35  ;;  %v596_v24 = vand.u32 2147483647, %v560_v5 }
 0x303   :  { %v619_v36 = vadd.f32 1.0, %v607_v16  ;;  %v763_v45 = vmul.f32 %v751_v4, %v595_v8  ;;  %v3957_v47 = vmul.f32 0.5, %v536_v32  ;;  %v597_v41 = vand.u32 2147483647, %v3949_v21 }
 0x304   :  { %5434 = vst [vmem:[#allocation10_spill] sm:$0xff] %v3955_v23  ;;  %3558 = vrcp.f32 %v617_v17  ;;  %v779_v44 = vmul.f32 1.442695, %v761_v18  ;;  %v3960_v48 = vmul.f32 0.5, %v537_v15  ;;  %v598_v43 = vand.u32 2147483647, %v3955_v23 }
 0x305   :  { %v3963_v40 = vpop.eup %3546  ;;  %3560 = vrcp.f32 %v618_v19  ;;  %v781_v49 = vmul.f32 1.442695, %v762_v20  ;;  %v608_v50 = vmul.f32 0.3275911, %v596_v24  ;;  %v609_v53 = vmul.f32 0.3275911, %v597_v41 }
 0x306   :  { %v610_v0 = vmul.f32 0.3275911, %v598_v43  ;;  %v752_v1 = vsub.f32 0.0, %v596_v24  ;;  %v753_v2 = vsub.f32 0.0, %v597_v41  ;;  %v754_v3 = vsub.f32 0.0, %v598_v43 }
 0x307   :  { %3562 = vrcp.f32 %v619_v36  ;;  %v621_v7 = vadd.f32 1.0, %v609_v53  ;;  %v466_v8 = vmul.f32 %v3897_v63, %v3819_v27  ;;  %v467_v11 = vmul.f32 %v3897_v63, %v3821_v29 }
 0x308   :  { %v3969_v58 = vpop.eup %3548  ;;  %3564 = vpow2.f32 %v779_v44  ;;  %v783_v12 = vmul.f32 1.442695, %v763_v45  ;;  %vm572_vm11 = vcmp.ge.f32.partialorder %v560_v5, 0.0  ;;  %v764_v13 = vmul.f32 %v752_v1, %v596_v24 }
 0x309   :  { %v3971_v32 = vpop.eup %3550  ;;  %v765_v14 = vmul.f32 %v753_v2, %v597_v41  ;;  %v468_v62 = vmul.f32 %v3897_v63, %v3823_v30  ;;  %v498_v34 = vmul.f32 %v483_v6, %v466_v8  ;;  %v499_v15 = vmul.f32 %v483_v6, %v467_v11 }
 0x30a   :  { %v3975_v39 = vpop.eup %3552  ;;  %vm573_vm14 = vcmp.ge.f32.partialorder %v3949_v21, 0.0  ;;  %v620_v27 = vadd.f32 1.0, %v608_v50  ;;  %v622_v29 = vadd.f32 1.0, %v610_v0  ;;  %v766_v16 = vmul.f32 %v754_v3, %v598_v43 }
 0x30b   :  { %v3978_v4 = vpop.eup %3554  ;;  %3566 = vrcp.f32 %v621_v7  ;;  %v500_v17 = vmul.f32 %v483_v6, %v468_v62  ;;  %v530_v18 = vadd.f32 %v3895_v60, %v498_v34  ;;  %v531_v19 = vadd.f32 %v3895_v60, %v499_v15 }
 0x30c   :  { %v3982_v20 = vpop.eup %3556  ;;  %3568 = vpow2.f32 %v781_v49  ;;  %v3986_v30 = vsel %vm572_vm11, 1.0, %v5406_v56  ;;  %v785_v63 = vmul.f32 1.442695, %v764_v13  ;;  %v637_v24 = vmul.f32 1.0614054, %v3971_v32 }
 0x30d   :  { %3570 = vpow2.f32 %v783_v12  ;;  %v787_v36 = vmul.f32 1.442695, %v765_v14  ;;  %v532_v45 = vadd.f32 %v3895_v60, %v500_v17  ;;  %v635_v41 = vmul.f32 1.0614054, %v3963_v40 }
 0x30e   :  { %v3991_v44 = vpop.eup %3558  ;;  %3572 = vrcp.f32 %v620_v27  ;;  %v3993_v43 = vmul.f32 0.70710677, %v530_v18  ;;  %v3995_v50 = vmul.f32 0.70710677, %v531_v19  ;;  %v649_v49 = vadd.f32 -1.4531521, %v637_v24 }
 0x30f   :  { %v3997_v5 = vpop.eup %3560  ;;  %v4002_v53 = vsel %vm573_vm14, 1.0, %v5406_v56  ;;  %3574 = vrcp.f32 %v622_v29  ;;  %v789_v0 = vmul.f32 1.442695, %v766_v16  ;;  %v4004_v60 = vmul.f32 0.70710677, %v532_v45 }
 0x310   :  { %3576 = vpow2.f32 %v785_v63  ;;  %v590_v1 = vand.u32 2147483647, %v3993_v43  ;;  %v591_v2 = vand.u32 2147483647, %v3995_v50  ;;  %v636_v3 = vmul.f32 1.0614054, %v3969_v58 }
 0x311   :  { %v4009_v6 = vpop.eup %3562  ;;  %3578 = vpow2.f32 %v787_v36  ;;  %v592_v7 = vand.u32 2147483647, %v4004_v60  ;;  %v661_v21 = vmul.f32 %v3971_v32, %v649_v49  ;;  %v647_v8 = vadd.f32 -1.4531521, %v635_v41 }
 0x312   :  { %v4013_v11 = vpop.eup %3564  ;;  %v602_v12 = vmul.f32 0.3275911, %v590_v1  ;;  %v603_v13 = vmul.f32 0.3275911, %v591_v2  ;;  %v746_v14 = vsub.f32 0.0, %v590_v1  ;;  %v747_v62 = vsub.f32 0.0, %v591_v2 }
 0x313   :  { %v4015_v34 = vmul.f32 0.5, %v530_v18  ;;  %v604_v15 = vmul.f32 0.3275911, %v592_v7  ;;  %v748_v27 = vsub.f32 0.0, %v592_v7  ;;  %v673_v29 = vadd.f32 1.4214138, %v661_v21 }
 0x314   :  { %v4017_v16 = vmul.f32 0.5, %v531_v19  ;;  %v614_v17 = vadd.f32 1.0, %v602_v12  ;;  %v615_v63 = vadd.f32 1.0, %v603_v13  ;;  %v758_v24 = vmul.f32 %v746_v14, %v590_v1 }
 0x315   :  { %v4019_v36 = vpop.eup %3566  ;;  %v616_v49 = vadd.f32 1.0, %v604_v15  ;;  %v759_v41 = vmul.f32 %v747_v62, %v591_v2  ;;  %v685_v9 = vmul.f32 %v3971_v32, %v673_v29  ;;  %v659_v56 = vmul.f32 %v3963_v40, %v647_v8 }
 0x316   :  { %v4023_v33 = vpop.eup %3568  ;;  %v4025_v18 = vmul.f32 0.5, %v532_v45  ;;  %vm566_vm15 = vcmp.ge.f32.partialorder %v3993_v43, 0.0  ;;  %3580 = vrcp.f32 %v614_v17  ;;  %v760_v19 = vmul.f32 %v748_v27, %v592_v7 }
 0x317   :  { %v4028_v21 = vpop.eup %3570  ;;  %3582 = vrcp.f32 %v615_v63  ;;  %v773_v1 = vmul.f32 1.442695, %v758_v24  ;;  %v697_v12 = vadd.f32 -0.28449672, %v685_v9  ;;  %v671_v13 = vadd.f32 1.4214138, %v659_v56 }
 0x318   :  { %5435 = vst [vmem:[#allocation11_spill] sm:$0xff] %v4028_v21  ;;  %v4030_v14 = vpop.eup %3572  ;;  %3584 = vrcp.f32 %v616_v49  ;;  %v648_v2 = vadd.f32 -1.4531521, %v636_v3  ;;  %v642_v8 = vmul.f32 1.0614054, %v3997_v5  ;;  %vm568_vm13 = vcmp.ge.f32.partialorder %v4004_v60, 0.0 }
 0x319   :  { %v645_v62 = vmul.f32 1.0614054, %v4019_v36  ;;  %v4034_v45 = vpop.eup %3574  ;;  %v775_v15 = vmul.f32 1.442695, %v759_v41  ;;  %v709_v29 = vmul.f32 %v3971_v32, %v697_v12  ;;  %v683_v7 = vmul.f32 %v3963_v40, %v671_v13 }
 0x31a   :  { %v641_v27 = vmul.f32 1.0614054, %v3991_v44  ;;  %v4039_v17 = vpop.eup %3576  ;;  %v777_v9 = vmul.f32 1.442695, %v760_v19  ;;  %v660_v56 = vmul.f32 %v3969_v58, %v648_v2  ;;  %v654_v63 = vadd.f32 -1.4531521, %v642_v8 }
 0x31b   :  { %v657_v3 = vadd.f32 -1.4531521, %v645_v62  ;;  %v4042_v24 = vpop.eup %3578  ;;  %3586 = vpow2.f32 %v789_v0  ;;  %v721_v49 = vadd.f32 0.2548296, %v709_v29  ;;  %v695_v35 = vadd.f32 -0.28449672, %v683_v7 }
 0x31c   :  { %v644_v41 = vmul.f32 1.0614054, %v4030_v14  ;;  %v672_v25 = vadd.f32 1.4214138, %v660_v56  ;;  %v666_v12 = vmul.f32 %v3997_v5, %v654_v63  ;;  %v653_v28 = vadd.f32 -1.4531521, %v641_v27 }
 0x31d   :  { %v669_v13 = vmul.f32 %v4019_v36, %v657_v3  ;;  %v733_v23 = vmul.f32 %v3971_v32, %v721_v49  ;;  %v5436_v19 = vmov -1.0   ;;  %v707_v8 = vmul.f32 %v3963_v40, %v695_v35 }
 0x31e   :  { %v4051_v2 = vsel %vm566_vm15, 1.0, %v5436_v19  ;;  %v656_v0 = vadd.f32 -1.4531521, %v644_v41  ;;  %3588 = vpow2.f32 %v773_v1  ;;  %v684_v62 = vmul.f32 %v3969_v58, %v672_v25 }
 0x31f   :  { %v678_v29 = vadd.f32 1.4214138, %v666_v12  ;;  %v681_v7 = vadd.f32 1.4214138, %v669_v13  ;;  %3590 = vpow2.f32 %v775_v15  ;;  %v793_v56 = vmul.f32 %v3982_v20, %v733_v23 }
 0x320   :  { %v719_v63 = vadd.f32 0.2548296, %v707_v8  ;;  %v665_v27 = vmul.f32 %v3991_v44, %v653_v28  ;;  %v4057_v32 = vpop.eup %3580  ;;  %3592 = vpow2.f32 %v777_v9  ;;  %v696_v43 = vadd.f32 -0.28449672, %v684_v62 }
 0x321   :  { %v690_v35 = vmul.f32 %v3997_v5, %v678_v29  ;;  %v693_v1 = vmul.f32 %v4019_v36, %v681_v7  ;;  %v4062_v3 = vpop.eup %3582  ;;  %vm567_vm11 = vcmp.ge.f32.partialorder %v3995_v50, 0.0  ;;  %v805_v25 = vsub.f32 1.0, %v793_v56 }
 0x322   :  { %v638_v23 = vmul.f32 1.0614054, %v4057_v32  ;;  %v731_v20 = vmul.f32 %v3963_v40, %v719_v63  ;;  %v668_v28 = vmul.f32 %v4030_v14, %v656_v0  ;;  %v4068_v15 = vpop.eup %3584  ;;  %v639_v9 = vmul.f32 1.0614054, %v4062_v3 }
 0x323   :  { %v708_v49 = vmul.f32 %v3969_v58, %v696_v43  ;;  %v702_v41 = vadd.f32 -0.28449672, %v690_v35  ;;  %v705_v12 = vadd.f32 -0.28449672, %v693_v1  ;;  %v640_v13 = vmul.f32 1.0614054, %v4068_v15 }
 0x324   :  { %v650_v8 = vadd.f32 -1.4531521, %v638_v23  ;;  %v791_v62 = vmul.f32 %v3975_v39, %v731_v20  ;;  %v677_v29 = vadd.f32 1.4214138, %v665_v27  ;;  %v651_v7 = vadd.f32 -1.4531521, %v639_v9 }
 0x325   :  { %v720_v56 = vadd.f32 0.2548296, %v708_v49  ;;  %v714_v40 = vmul.f32 %v3997_v5, %v702_v41  ;;  %v717_v0 = vmul.f32 %v4019_v36, %v705_v12  ;;  %v4076_v63 = vpop.eup %3586  ;;  %v652_v21 = vadd.f32 -1.4531521, %v640_v13 }
 0x326   :  { %5437 = vst [vmem:[#allocation12_spill] sm:$0xff] %v4076_v63  ;;  %v817_v51 = vmul.f32 %v805_v25, %v3940_v42  ;;  %v662_v43 = vmul.f32 %v4057_v32, %v650_v8  ;;  %v803_v35 = vsub.f32 1.0, %v791_v62  ;;  %v663_v1 = vmul.f32 %v4062_v3, %v651_v7 }
 0x327   :  { %v732_v23 = vmul.f32 %v3969_v58, %v720_v56  ;;  %v726_v39 = vadd.f32 0.2548296, %v714_v40  ;;  %v729_v27 = vadd.f32 0.2548296, %v717_v0  ;;  %v664_v20 = vmul.f32 %v4068_v15, %v652_v21 }
 0x328   :  { %v674_v9 = vadd.f32 1.4214138, %v662_v43  ;;  %v815_v49 = vmul.f32 %v803_v35, %v3933_v57  ;;  %v680_v41 = vadd.f32 1.4214138, %v668_v28  ;;  %v3589_v12 = vpop.eup %3588  ;;  %v675_v63 = vadd.f32 1.4214138, %v663_v1 }
 0x329   :  { %v792_v13 = vmul.f32 %v3978_v4, %v732_v23  ;;  %v738_v42 = vmul.f32 %v3997_v5, %v726_v39  ;;  %v741_v25 = vmul.f32 %v4019_v36, %v729_v27  ;;  %v3591_v8 = vpop.eup %3590  ;;  %v676_v62 = vadd.f32 1.4214138, %v664_v20 }
 0x32a   :  { %v829_v7 = vadd.f32 1.0, %v817_v51  ;;  %v686_v58 = vmul.f32 %v4057_v32, %v674_v9  ;;  %v827_v56 = vadd.f32 1.0, %v815_v49  ;;  %v3593_v40 = vpop.eup %3592  ;;  %v687_v21 = vmul.f32 %v4062_v3, %v675_v63 }
 0x32b   :  { %v804_v0 = vsub.f32 1.0, %v792_v13  ;;  %v798_v57 = vmul.f32 %v4023_v33, %v738_v42  ;;  %v801_v28 = vmul.f32 %v4042_v24, %v741_v25  ;;  %v580_v4 = vsel %vm568_vm13, 1.0, %v5436_v19 }
 0x32c   :  { %v688_v5 = vmul.f32 %v4068_v15, %v676_v62  ;;  %v698_v36 = vadd.f32 -0.28449672, %v686_v58  ;;  %v689_v51 = vmul.f32 %v3991_v44, %v677_v29  ;;  %v579_v43 = vsel %vm567_vm11, 1.0, %v5436_v19 }
 0x32d   :  { %v699_v35 = vadd.f32 -0.28449672, %v687_v21  ;;  %v816_v63 = vmul.f32 %v804_v0, %v3937_v59  ;;  %v810_v1 = vsub.f32 1.0, %v798_v57  ;;  %v692_v23 = vmul.f32 %v4030_v14, %v680_v41 }
 0x32e   :  { %v700_v33 = vadd.f32 -0.28449672, %v688_v5  ;;  %v710_v24 = vmul.f32 %v4057_v32, %v698_v36  ;;  %v643_v60 = vmul.f32 1.0614054, %v4009_v6  ;;  %v841_v39 = vmul.f32 %v829_v7, %v3925_v52 }
 0x32f   :  { %v839_v27 = vmul.f32 %v827_v56, %v3918_v26  ;;  %v711_v29 = vmul.f32 %v4062_v3, %v699_v35  ;;  %v813_v20 = vsub.f32 1.0, %v801_v28  ;;  %v701_v49 = vadd.f32 -0.28449672, %v689_v51 }
 0x330   :  { %v712_v50 = vmul.f32 %v4068_v15, %v700_v33  ;;  %v722_v9 = vadd.f32 0.2548296, %v710_v24  ;;  %v704_v59 = vadd.f32 -0.28449672, %v692_v23  ;;  %v828_v42 = vadd.f32 1.0, %v816_v63 }
 0x331   :  { %v723_v13 = vadd.f32 0.2548296, %v711_v29  ;;  %v822_v25 = vmul.f32 %v810_v1, %v3952_v22  ;;  %v646_v41 = vmul.f32 1.0614054, %v4034_v45  ;;  %v713_v52 = vmul.f32 %v3991_v44, %v701_v49 }
 0x332   :  { %v724_v62 = vadd.f32 0.2548296, %v712_v50  ;;  %v734_v58 = vmul.f32 %v4057_v32, %v722_v9  ;;  %v716_v26 = vmul.f32 %v4030_v14, %v704_v59  ;;  %v4113_v7 = vmul.f32 %v841_v39, %v3788_v37 }
 0x333   :  { %v851_v56 = vmul.f32 %v839_v27, %v3790_v38  ;;  %v735_v21 = vmul.f32 %v4062_v3, %v723_v13  ;;  %v825_v0 = vmul.f32 %v813_v20, %v4002_v53  ;;  %v725_v28 = vadd.f32 0.2548296, %v713_v52 }
 0x334   :  { %v736_v22 = vmul.f32 %v4068_v15, %v724_v62  ;;  %v794_v57 = vmul.f32 %v3589_v12, %v734_v58  ;;  %v728_v5 = vadd.f32 0.2548296, %v716_v26  ;;  %v840_v32 = vmul.f32 %v828_v42, %v3920_v46 }
 0x335   :  { %v795_v36 = vmul.f32 %v3591_v8, %v735_v21  ;;  %v834_v51 = vadd.f32 1.0, %v822_v25  ;;  %v655_v35 = vadd.f32 -1.4531521, %v643_v60  ;;  %v737_v33 = vmul.f32 %v3991_v44, %v725_v28 }
 0x336   :  { %v796_v63 = vmul.f32 %v3593_v40, %v736_v22  ;;  %v806_v1 = vsub.f32 1.0, %v794_v57  ;;  %v740_v24 = vmul.f32 %v4030_v14, %v728_v5  ;;  %v837_v3 = vadd.f32 1.0, %v825_v0 }
 0x337   :  { %v807_v23 = vsub.f32 1.0, %v795_v36  ;;  %v658_v39 = vadd.f32 -1.4531521, %v646_v41  ;;  %v667_v53 = vmul.f32 %v4009_v6, %v655_v35  ;;  %v797_v8 = vmul.f32 %v4013_v11, %v737_v33 }
 0x338   :  { %v808_v15 = vsub.f32 1.0, %v796_v63  ;;  %v818_v12 = vmul.f32 %v806_v1, %v4051_v2  ;;  %v800_v46 = vmul.f32 %v4039_v17, %v740_v24  ;;  %vm31_vm14 = vcmask 154624   ;;  %v5440_v63 = vld [vmem:[#allocation11_spill] sm:$0xff]  ;;  %v5442_v24 = vld [vmem:[#allocation12_spill] sm:$0xff] }
 0x339   :  { %v819_v27 = vmul.f32 %v807_v23, %v579_v43  ;;  %v670_v40 = vmul.f32 %v4034_v45, %v658_v39  ;;  %v679_v60 = vadd.f32 1.4214138, %v667_v53  ;;  %v809_v14 = vsub.f32 1.0, %v797_v8 }
 0x33a   :  { %v820_v44 = vmul.f32 %v808_v15, %v580_v4  ;;  %v830_v29 = vadd.f32 1.0, %v818_v12  ;;  %v812_v20 = vsub.f32 1.0, %v800_v46  ;;  %v5438_v50 = vmov 0   ;;  %v5443_v15 = vld [vmem:[#allocation5_spill] sm:$0xff] }
 0x33b   :  { %32 = vst.msk [vmem:[#allocation2] sm:$0xff] %vm31_vm14, %v5438_v50  ;;  %33 = vst.msk [vmem:[#allocation2 + $0x18] sm:$0xff] %vm31_vm14, %v5438_v50  ;;  %v831_v2 = vadd.f32 1.0, %v819_v27  ;;  %v846_v11 = vmul.f32 %v834_v51, %v3929_v55  ;;  %v682_v9 = vadd.f32 1.4214138, %v670_v40  ;;  %v691_v17 = vmul.f32 %v4009_v6, %v679_v60  ;;  %v5439_v51 = vld [vmem:[#allocation8_spill] sm:$0xff] }
 0x33c   :  { %v832_v43 = vadd.f32 1.0, %v820_v44  ;;  %v842_v49 = vmul.f32 %v830_v29, %v4015_v34  ;;  %v821_v4 = vmul.f32 %v809_v14, %v3947_v61  ;;  %v824_v59 = vmul.f32 %v812_v20, %v3986_v30  ;;  %v5444_v27 = vld [vmem:[#allocation7_spill] sm:$0xff]  ;;  %v5445_v29 = vld [vmem:[#allocation9_spill] sm:$0xff] }
 0x33d   :  { %v843_v13 = vmul.f32 %v831_v2, %v4017_v16  ;;  %v849_v42 = vmul.f32 %v837_v3, %v3960_v48  ;;  %v694_v25 = vmul.f32 %v4034_v45, %v682_v9  ;;  %v703_v41 = vadd.f32 -0.28449672, %v691_v17 }
 0x33e   :  { %v844_v62 = vmul.f32 %v832_v43, %v4025_v18  ;;  %v854_v55 = vmul.f32 %v842_v49, %v3790_v38  ;;  %v833_v58 = vadd.f32 1.0, %v821_v4  ;;  %v836_v52 = vadd.f32 1.0, %v824_v59  ;;  %v5446_v49 = vld [vmem:[#allocation6_spill] sm:$0xff] }
 0x33f   :  { %v852_v26 = vmul.f32 %v840_v32, %v3794_v10  ;;  %v855_v34 = vmul.f32 %v843_v13, %v3794_v10  ;;  %v706_v61 = vadd.f32 -0.28449672, %v694_v25  ;;  %v715_v30 = vmul.f32 %v4009_v6, %v703_v41 }
 0x340   :  { %v856_v16 = vmul.f32 %v844_v62, %v3788_v37  ;;  %v863_v21 = vpack.c.bf16 %v854_v55, %v851_v56  ;;  %v845_v48 = vmul.f32 %v833_v58, %v3927_v54  ;;  %v848_v0 = vmul.f32 %v836_v52, %v3957_v47 }
 0x341   :  { %v718_v18 = vmul.f32 %v4034_v45, %v706_v61  ;;  %v727_v22 = vadd.f32 0.2548296, %v715_v30  ;;  %vm34_vm15 = vcmask 589208   ;;  %v858_v28 = vmul.f32 %v846_v11, %v3794_v10 }
 0x342   :  { %v865_v57 = vpack.c.bf16 %v856_v16, %v4113_v7  ;;  %875 = vrot.lane.b32.xlu1 %v863_v21, %s3658_s7  ;;  %v861_v5 = vmul.f32 %v849_v42, %v3794_v10  ;;  %35 = vst.msk [vmem:[#allocation2 + $0x10] sm:$0xff] %vm34_vm15, %v5438_v50  ;;  %36 = vst.msk [vmem:[#allocation2 + $0x28] sm:$0xff] %vm34_vm15, %v5438_v50  ;;  %v864_v56 = vpack.c.bf16 %v855_v34, %v852_v26  ;;  %vm898_vm15 = vcmask 1047704  }
 0x343   :  { %v730_v54 = vadd.f32 0.2548296, %v718_v18  ;;  %v739_v47 = vmul.f32 %v4009_v6, %v727_v22  ;;  %v857_v36 = vmul.f32 %v845_v48, %v3790_v38  ;;  %v860_v7 = vmul.f32 %v848_v0, %v3790_v38  ;;  %v5441_v6 = vld [vmem:[#allocation10_spill] sm:$0xff] }
 0x344   :  { %879 = vrot.lane.b32.xlu0 %v865_v57, %s3658_s7  ;;  %v1676_v32 = vcombine.low %v3748_v31, %v3748_v31  ;;  %vm571_vm13 = vcmp.ge.f32.partialorder %v5439_v51, 0.0  ;;  %v867_v33 = vpack.c.bf16 %v861_v5, %v858_v28  ;;  %vm574_vm11 = vcmp.ge.f32.partialorder %v5441_v6, 0.0 }
 0x345   :  { %v742_v35 = vmul.f32 %v4034_v45, %v730_v54  ;;  %v799_v1 = vmul.f32 %v5440_v63, %v739_v47  ;;  %v583_v39 = vsel %vm571_vm13, 1.0, %v5436_v19  ;;  %v866_v53 = vpack.c.bf16 %v860_v7, %v857_v36 }
 0x346   :  { %877 = vrot.lane.b32.xlu1 %v864_v56, %s3658_s7  ;;  %v4169_v12 = vpack.i.bf16 %v1676_v32, %v5443_v15  ;;  %v586_v46 = vsel %vm574_vm11, 1.0, %v5436_v19  ;;  %v547_v40 = vmul.f32 0.5, %v5444_v27  ;;  %v550_v14 = vmul.f32 0.5, %v5445_v29 }
 0x347   :  { %v802_v23 = vmul.f32 %v5442_v24, %v742_v35  ;;  %v811_v3 = vsub.f32 1.0, %v799_v1  ;;  %v4184_v4 = vpack.i.bf16 %v3748_v31, %v5446_v49  ;;  %v4190_v59 = vcombine.low %v5443_v15, %v5443_v15  ;;  %v3529_v35 = vld [vmem:[%s5399_s4 + $0x4] ss:$12 sps:$4 sm:$0xff]  }
 0x348   :  { %883 = vrot.lane.b32.xlu0 %v867_v33, %s3658_s7  ;;  %vm901_vm13 = vcmask 416768   ;;  %1392 = vmatprep.mubr.bf16.mxu1 %v3529_v35  ;;  %v3520_v63 = vpack.i.bf16 %v5446_v49, %v5443_v15 }
 0x349   :  { %v814_v8 = vsub.f32 1.0, %v802_v23  ;;  %v823_v45 = vmul.f32 %v811_v3, %v583_v39  ;;  %1286 = vmatprep.mubr.bf16.mxu0 %v3529_v35 }
 0x34a   :  { %881 = vrot.lane.b32.xlu1 %v866_v53, %s3658_s7 }
 0x34b   :  { %v826_v60 = vmul.f32 %v814_v8, %v586_v46  ;;  %v835_v44 = vadd.f32 1.0, %v823_v45 }
 0x34c   :  { %3486 = vrot.lane.b32.xlu0 %v4169_v12, %s3649_s30 }
 0x34d   :  { %v838_v20 = vadd.f32 1.0, %v826_v60  ;;  %v847_v2 = vmul.f32 %v835_v44, %v547_v40 }
 0x34f   :  { %v850_v11 = vmul.f32 %v838_v20, %v550_v14  ;;  %v859_v9 = vmul.f32 %v847_v2, %v3788_v37 }
 0x350   :  { %3496 = vrot.lane.b32.xlu0 %v4169_v12, %s3648_s29 }
 0x351   :  { %v862_v17 = vmul.f32 %v850_v11, %v3788_v37 }
 0x353   :  { %v868_v43 = vpack.c.bf16 %v862_v17, %v859_v9 }
 0x355   :  { %885 = vrot.lane.b32.xlu1 %v868_v43, %s3658_s7 }
 0x359   :  { %3491 = vrot.lane.b32.xlu1 %v4184_v4, %s3650_s9 }
 0x35d   :  { %1677 = vrot.lane.b32.xlu1 %v4190_v59, %s3649_s30 }
 0x3b4   :  { %v876_v13 = vpop.permute.xlu1 %875 }
 0x3b5   :  { %899 = vst.msk [vmem:[#allocation2] sm:$0xff] %vm898_vm15, %v876_v13 }
 0x3b6   :  { %v880_v42 = vpop.permute.xlu0 %879 }
 0x3b8   :  { %v878_v25 = vpop.permute.xlu1 %877 }
 0x3b9   :  { %v4196_v41 = vsel %vm31_vm14, %v876_v13, %v878_v25  ;;  %v889_v62 = vsel %vm31_vm14, %v878_v25, %v880_v42 }
 0x3ba   :  { %v884_v55 = vpop.permute.xlu0 %883  ;;  %902 = vst.msk [vmem:[#allocation2 + $0x10] sm:$0xff] %vm901_vm13, %v889_v62  ;;  %1254 = vmatprep.subr.bf16.mxu0 %v4196_v41 }
 0x3bc   :  { %v882_v58 = vpop.permute.xlu1 %881  ;;  %v906_v52 = vld [vmem:[#allocation2] sm:$0xff] }
 0x3bd   :  { %v4202_v26 = vsel %vm31_vm14, %v882_v58, %v884_v55  ;;  %903 = vst.msk [vmem:[#allocation2 + $0x18] sm:$0xff] %vm898_vm15, %v882_v58  ;;  %924 = vrot.lane.b32.xlu0 %v906_v52, %s3649_s30  ;;  %1255 = vmatpush1.bf16.msra.mxu0 %v906_v52 }
 0x3be   :  { %1256 = vmatprep.subr.bf16.mxu0 %v4202_v26  ;;  %v3487_v34 = vpop.permute.xlu0 %3486 }
 0x3bf   :  { %v3489_v61 = vunpack.i.h.bf16 %v3487_v34  ;;  %v3488_v30 = vunpack.i.l.bf16 %v3487_v34 }
 0x3c1   :  { %953 = vrot.lane.b32.xlu0 %v906_v52, %s3650_s9  ;;  %v4208_v16 = vld [vmem:[#allocation2 + $0x10] sm:$0xff]  ;;  %1690 = vst.msk [vmem:[#allocation3 + $0x10] sm:$0xf0] %vm64_vm2, %v3489_v61  ;;  %v1684_v21 = vsel %vm56_vm4, %v3488_v30, %v3489_v61 }
 0x3c2   :  { %914 = vst.msk [vmem:[#allocation4 + $0x10] sm:$0xff] %vm365_vm12, %v4208_v16  ;;  %1689 = vst [vmem:[#allocation3 + $0x8] sm:$0xf0] %v1684_v21  ;;  %v4214_v48 = vpop.permute.xlu0 %3496 }
 0x3c3   :  { %v3499_v0 = vunpack.i.h.bf16 %v4214_v48  ;;  %v3498_v18 = vunpack.i.l.bf16 %v4214_v48 }
 0x3c4   :  { %v909_v22 = vld [vmem:[#allocation2 + $0x18] sm:$0xff] }
 0x3c5   :  { %982 = vrot.lane.b32.xlu0 %v906_v52, %s3648_s29  ;;  %930 = vrot.lane.b32.xlu1 %v909_v22, %s3649_s30  ;;  %1718 = vst.msk [vmem:[#allocation3 + $0x28] sm:$0xf0] %vm64_vm2, %v3499_v0  ;;  %v1712_v57 = vsel %vm87_vm3, %v3498_v18, %v3499_v0 }
 0x3c6   :  { %1257 = vmatpush1.bf16.msra.mxu0 %v909_v22  ;;  %1717 = vst [vmem:[#allocation3 + $0x20] sm:$0xf0] %v1712_v57 }
 0x3c7   :  { %v886_v28 = vpop.permute.xlu1 %885 }
 0x3c8   :  { %v891_v5 = vsel %vm31_vm14, %v884_v55, %v886_v28 }
 0x3c9   :  { %905 = vst.msk [vmem:[#allocation2 + $0x28] sm:$0xff] %vm901_vm13, %v891_v5  ;;  %1011 = vrot.lane.b32.xlu0 %v906_v52, %s3652_s11  ;;  %959 = vrot.lane.b32.xlu1 %v909_v22, %s3650_s9 }
 0x3cb   :  { %v4228_v54 = vpop.permute.xlu1 %3491 }
 0x3cc   :  { %v3494_v47 = vunpack.i.h.bf16 %v4228_v54  ;;  %v3493_v56 = vunpack.i.l.bf16 %v4228_v54 }
 0x3cd   :  { %1040 = vrot.lane.b32.xlu0 %v906_v52, %s3651_s10  ;;  %988 = vrot.lane.b32.xlu1 %v909_v22, %s3648_s29 }
 0x3ce   :  { %1704 = vst.msk [vmem:[#allocation3 + $0x28] sm:$0xf] %vm46_vm0, %v3494_v47  ;;  %v1698_v36 = vsel %vm72_vm5, %v3493_v56, %v3494_v47 }
 0x3cf   :  { %1703 = vst [vmem:[#allocation3 + $0x20] sm:$0xf] %v1698_v36  ;;  %v1678_v7 = vpop.permute.xlu1 %1677 }
 0x3d0   :  { %v911_v32 = vld [vmem:[#allocation2 + $0x28] sm:$0xff]  ;;  %v1683_v51 = vsel %vm56_vm4, %v1678_v7, %v3488_v30 }
 0x3d1   :  { %1069 = vrot.lane.b32.xlu0 %v906_v52, %s3654_s13  ;;  %1017 = vrot.lane.b32.xlu1 %v909_v22, %s3652_s11  ;;  %917 = vst.msk [vmem:[#allocation4 + $0x28] sm:$0xff] %vm365_vm12, %v911_v32  ;;  %1688 = vst [vmem:[#allocation3] sm:$0xf0] %v1683_v51 }
 0x3d5   :  { %1098 = vrot.lane.b32.xlu0 %v906_v52, %s3653_s12  ;;  %1046 = vrot.lane.b32.xlu1 %v909_v22, %s3651_s10 }
 0x3d9   :  { %1127 = vrot.lane.b32.xlu0 %v906_v52, %s3655_s14  ;;  %1075 = vrot.lane.b32.xlu1 %v909_v22, %s3654_s13 }
 0x3dd   :  { %926 = vrot.lane.b32.xlu0 %v4196_v41, %s3649_s30  ;;  %1104 = vrot.lane.b32.xlu1 %v909_v22, %s3653_s12 }
 0x3e1   :  { %1133 = vrot.lane.b32.xlu1 %v909_v22, %s3655_s14  ;;  %934 = vrot.lane.b32.xlu0 %v911_v32, %s3649_s30 }
 0x3e5   :  { %928 = vrot.lane.b32.xlu1 %v4208_v16, %s3649_s30  ;;  %955 = vrot.lane.b32.xlu0 %v4196_v41, %s3650_s9 }
 0x3e9   :  { %932 = vrot.lane.b32.xlu1 %v4202_v26, %s3649_s30  ;;  %963 = vrot.lane.b32.xlu0 %v911_v32, %s3650_s9 }
 0x3ed   :  { %957 = vrot.lane.b32.xlu1 %v4208_v16, %s3650_s9  ;;  %984 = vrot.lane.b32.xlu0 %v4196_v41, %s3648_s29 }
 0x3f1   :  { %961 = vrot.lane.b32.xlu1 %v4202_v26, %s3650_s9  ;;  %992 = vrot.lane.b32.xlu0 %v911_v32, %s3648_s29 }
 0x3f5   :  { %986 = vrot.lane.b32.xlu1 %v4208_v16, %s3648_s29  ;;  %1013 = vrot.lane.b32.xlu0 %v4196_v41, %s3652_s11 }
 0x3f9   :  { %990 = vrot.lane.b32.xlu1 %v4202_v26, %s3648_s29  ;;  %1021 = vrot.lane.b32.xlu0 %v911_v32, %s3652_s11 }
 0x3fd   :  { %1015 = vrot.lane.b32.xlu1 %v4208_v16, %s3652_s11  ;;  %1042 = vrot.lane.b32.xlu0 %v4196_v41, %s3651_s10 }
 0x401   :  { %1019 = vrot.lane.b32.xlu1 %v4202_v26, %s3652_s11  ;;  %1050 = vrot.lane.b32.xlu0 %v911_v32, %s3651_s10 }
 0x405   :  { %1044 = vrot.lane.b32.xlu1 %v4208_v16, %s3651_s10  ;;  %1071 = vrot.lane.b32.xlu0 %v4196_v41, %s3654_s13 }
 0x409   :  { %1048 = vrot.lane.b32.xlu1 %v4202_v26, %s3651_s10  ;;  %1079 = vrot.lane.b32.xlu0 %v911_v32, %s3654_s13 }
 0x40d   :  { %1073 = vrot.lane.b32.xlu1 %v4208_v16, %s3654_s13  ;;  %1100 = vrot.lane.b32.xlu0 %v4196_v41, %s3653_s12 }
 0x411   :  { %1077 = vrot.lane.b32.xlu1 %v4202_v26, %s3654_s13  ;;  %1108 = vrot.lane.b32.xlu0 %v911_v32, %s3653_s12 }
 0x415   :  { %1102 = vrot.lane.b32.xlu1 %v4208_v16, %s3653_s12  ;;  %1691 = vrot.lane.b32.xlu0 %v5443_v15, %s3650_s9 }
 0x419   :  { %1106 = vrot.lane.b32.xlu1 %v4202_v26, %s3653_s12  ;;  %3501 = vrot.lane.b32.xlu0 %v4184_v4, %s3652_s11 }
 0x41d   :  { %1705 = vrot.lane.b32.xlu1 %v4190_v59, %s3648_s29  ;;  %1129 = vrot.lane.b32.xlu0 %v4196_v41, %s3655_s14 }
 0x421   :  { %3506 = vrot.lane.b32.xlu1 %v4169_v12, %s3651_s10  ;;  %1137 = vrot.lane.b32.xlu0 %v911_v32, %s3655_s14 }
 0x425   :  { %1131 = vrot.lane.b32.xlu1 %v4208_v16, %s3655_s14  ;;  %3511 = vrot.lane.b32.xlu0 %v4184_v4, %s3654_s13 }
 0x429   :  { %1135 = vrot.lane.b32.xlu1 %v4202_v26, %s3655_s14  ;;  %1719 = vrot.lane.b32.xlu0 %v5443_v15, %s3652_s11 }
 0x42d   :  { %3516 = vrot.lane.b32.xlu1 %v4169_v12, %s3653_s12  ;;  %1747 = vrot.lane.b32.xlu0 %v5443_v15, %s3654_s13 }
 0x42f   :  { %v925_v1 = vpop.permute.xlu0 %924 }
 0x431   :  { %1733 = vrot.lane.b32.xlu1 %v4190_v59, %s3651_s10  ;;  %3521 = vrot.lane.b32.xlu0 %v3520_v63, %s3655_s14  ;;  %v1166_v63 = vld [vmem:[#allocation4 + $0x10] sm:$0xff] }
 0x433   :  { %v954_v33 = vpop.permute.xlu0 %953 }
 0x435   :  { %1761 = vrot.lane.b32.xlu1 %v4190_v59, %s3653_s12 }
 0x437   :  { %v983_v6 = vpop.permute.xlu0 %982  ;;  %v931_v24 = vpop.permute.xlu1 %930 }
 0x439   :  { %1779 = vrot.lane.b32.xlu1 %v3748_v31, %s3655_s14 }
 0x43b   :  { %v1012_v23 = vpop.permute.xlu0 %1011  ;;  %v960_v3 = vpop.permute.xlu1 %959 }
 0x43f   :  { %v4332_v39 = vpop.permute.xlu0 %1040  ;;  %v989_v53 = vpop.permute.xlu1 %988 }
 0x443   :  { %v4334_v15 = vpop.permute.xlu0 %1069  ;;  %v4336_v12 = vpop.permute.xlu1 %1017 }
 0x447   :  { %v4338_v8 = vpop.permute.xlu0 %1098  ;;  %v4340_v45 = vpop.permute.xlu1 %1046 }
 0x44b   :  { %v4342_v46 = vpop.permute.xlu0 %1127  ;;  %v4344_v27 = vpop.permute.xlu1 %1075 }
 0x44f   :  { %v927_v40 = vpop.permute.xlu0 %926  ;;  %v4346_v60 = vpop.permute.xlu1 %1104 }
 0x450   :  { %v937_v2 = vsel %vm56_vm4, %v925_v1, %v927_v40 }
 0x453   :  { %v935_v31 = vpop.permute.xlu0 %934  ;;  %v4348_v44 = vpop.permute.xlu1 %1133 }
 0x454   :  { %952 = vst.msk [vmem:[#allocation4 + $0x58] sm:$0xff] %vm365_vm12, %v935_v31 }
 0x457   :  { %v956_v29 = vpop.permute.xlu0 %955  ;;  %v929_v14 = vpop.permute.xlu1 %928 }
 0x458   :  { %v938_v20 = vsel %vm56_vm4, %v927_v40, %v929_v14  ;;  %949 = vst.msk [vmem:[#allocation4 + $0x40] sm:$0xff] %vm365_vm12, %v929_v14  ;;  %v966_v13 = vsel %vm72_vm5, %v954_v33, %v956_v29 }
 0x459   :  { %1258 = vmatprep.subr.bf16.mxu0 %v938_v20 }
 0x45a   :  { %1259 = vmatpush1.bf16.msra.mxu0 %v937_v2 }
 0x45b   :  { %v964_v11 = vpop.permute.xlu0 %963  ;;  %v933_v9 = vpop.permute.xlu1 %932 }
 0x45c   :  { %981 = vst.msk [vmem:[#allocation4 + $0x88] sm:$0xff] %vm365_vm12, %v964_v11  ;;  %v939_v17 = vsel %vm56_vm4, %v931_v24, %v933_v9  ;;  %v940_v43 = vsel %vm56_vm4, %v933_v9, %v935_v31 }
 0x45d   :  { %1260 = vmatprep.subr.bf16.mxu0 %v940_v43 }
 0x45e   :  { %1261 = vmatpush1.bf16.msra.mxu0 %v939_v17  ;;  %v1175_v17 = vld [vmem:[#allocation4 + $0x58] sm:$0xff] }
 0x45f   :  { %v985_v49 = vpop.permute.xlu0 %984  ;;  %v958_v4 = vpop.permute.xlu1 %957 }
 0x460   :  { %v967_v59 = vsel %vm72_vm5, %v956_v29, %v958_v4  ;;  %978 = vst.msk [vmem:[#allocation4 + $0x70] sm:$0xff] %vm365_vm12, %v958_v4  ;;  %v995_v26 = vsel %vm87_vm3, %v983_v6, %v985_v49  ;;  %v1172_v29 = vld [vmem:[#allocation4 + $0x40] sm:$0xff] }
 0x461   :  { %1262 = vmatprep.subr.bf16.mxu0 %v967_v59 }
 0x462   :  { %1263 = vmatpush1.bf16.msra.mxu0 %v966_v13 }
 0x463   :  { %v993_v42 = vpop.permute.xlu0 %992  ;;  %v962_v25 = vpop.permute.xlu1 %961 }
 0x464   :  { %1010 = vst.msk [vmem:[#allocation4 + $0xb8] sm:$0xff] %vm365_vm12, %v993_v42  ;;  %v968_v41 = vsel %vm72_vm5, %v960_v3, %v962_v25  ;;  %v969_v62 = vsel %vm72_vm5, %v962_v25, %v964_v11 }
 0x465   :  { %1264 = vmatprep.subr.bf16.mxu0 %v969_v62 }
 0x466   :  { %1265 = vmatpush1.bf16.msra.mxu0 %v968_v41 }
 0x467   :  { %v1014_v55 = vpop.permute.xlu0 %1013  ;;  %v987_v58 = vpop.permute.xlu1 %986  ;;  %v1178_v13 = vld [vmem:[#allocation4 + $0x70] sm:$0xff] }
 0x468   :  { %v996_v52 = vsel %vm87_vm3, %v985_v49, %v987_v58  ;;  %1007 = vst.msk [vmem:[#allocation4 + $0xa0] sm:$0xff] %vm365_vm12, %v987_v58  ;;  %v1024_v57 = vsel %vm102_vm7, %v1012_v23, %v1014_v55  ;;  %v1181_v58 = vld [vmem:[#allocation4 + $0x88] sm:$0xff] }
 0x469   :  { %1266 = vmatprep.subr.bf16.mxu0 %v996_v52 }
 0x46a   :  { %1267 = vmatpush1.bf16.msra.mxu0 %v995_v26  ;;  %v3530_v26 = vld [vmem:[%s5399_s4 + $0x1c] ss:$12 sps:$4 sm:$0xff]  }
 0x46b   :  { %v1022_v34 = vpop.permute.xlu0 %1021  ;;  %v991_v61 = vpop.permute.xlu1 %990 }
 0x46c   :  { %1039 = vst.msk [vmem:[#allocation4 + $0xe8] sm:$0xff] %vm365_vm12, %v1022_v34  ;;  %v997_v30 = vsel %vm87_vm3, %v989_v53, %v991_v61  ;;  %v998_v16 = vsel %vm87_vm3, %v991_v61, %v993_v42  ;;  %v1169_v53 = vld [vmem:[#allocation4 + $0x28] sm:$0xff] }
 0x46d   :  { %1268 = vmatprep.subr.bf16.mxu0 %v998_v16 }
 0x46e   :  { %1269 = vmatpush1.bf16.msra.mxu0 %v997_v30 }
 0x46f   :  { %v1043_v21 = vpop.permute.xlu0 %1042  ;;  %v1016_v0 = vpop.permute.xlu1 %1015  ;;  %v1184_v16 = vld [vmem:[#allocation4 + $0xa0] sm:$0xff] }
 0x470   :  { %v1025_v22 = vsel %vm102_vm7, %v1014_v55, %v1016_v0  ;;  %1036 = vst.msk [vmem:[#allocation4 + $0xd0] sm:$0xff] %vm365_vm12, %v1016_v0  ;;  %v1053_v1 = vsel %vm117_vm6, %v4332_v39, %v1043_v21  ;;  %v1160_v0 = vld [vmem:[%s5399_s4 + $0x18] sm:$0xff] }
 0x471   :  { %1270 = vmatprep.subr.bf16.mxu0 %v1025_v22  ;;  %v1162_v22 = vld [vmem:[%s5399_s4 + $0x24] sm:$0xff] }
 0x472   :  { %1271 = vmatpush1.bf16.msra.mxu0 %v1024_v57 }
 0x473   :  { %v1051_v28 = vpop.permute.xlu0 %1050  ;;  %v1020_v5 = vpop.permute.xlu1 %1019  ;;  %v1193_v33 = vld [vmem:[#allocation4 + $0xe8] sm:$0xff] }
 0x474   :  { %1068 = vst.msk [vmem:[#allocation4 + $0x118] sm:$0xff] %vm365_vm12, %v1051_v28  ;;  %v1026_v47 = vsel %vm102_vm7, %v4336_v12, %v1020_v5  ;;  %v1027_v36 = vsel %vm102_vm7, %v1020_v5, %v1022_v34  ;;  %v1187_v5 = vld [vmem:[#allocation4 + $0xb8] sm:$0xff] }
 0x475   :  { %1272 = vmatprep.subr.bf16.mxu0 %v1027_v36 }
 0x476   :  { %1273 = vmatpush1.bf16.msra.mxu0 %v1026_v47  ;;  %v3267_v47 = vcombine.low %v1160_v0, %v1162_v22 }
 0x477   :  { %v1072_v7 = vpop.permute.xlu0 %1071  ;;  %v1045_v32 = vpop.permute.xlu1 %1044  ;;  %v1190_v51 = vld [vmem:[#allocation4 + $0xd0] sm:$0xff] }
 0x478   :  { %v1054_v35 = vsel %vm117_vm6, %v1043_v21, %v1045_v32  ;;  %1065 = vst.msk [vmem:[#allocation4 + $0x100] sm:$0xff] %vm365_vm12, %v1045_v32  ;;  %3309 = vmatprep.subr.bf16.mxu1 %v1190_v51  ;;  %v1082_v14 = vsel %vm132_vm9, %v4334_v15, %v1072_v7 }
 0x479   :  { %3310 = vmatpush3.bf16.msra.mxu1 %v1166_v63  ;;  %1274 = vmatprep.subr.bf16.mxu0 %v1054_v35 }
 0x47a   :  { %3311 = vmatprep.subr.bf16.mxu1 %v1193_v33  ;;  %1275 = vmatpush1.bf16.msra.mxu0 %v1053_v1 }
 0x47b   :  { %v1080_v6 = vpop.permute.xlu0 %1079  ;;  %v1049_v24 = vpop.permute.xlu1 %1048 }
 0x47c   :  { %1097 = vst.msk [vmem:[#allocation4 + $0x148] sm:$0xff] %vm365_vm12, %v1080_v6  ;;  %v1055_v23 = vsel %vm117_vm6, %v4340_v45, %v1049_v24  ;;  %v1056_v3 = vsel %vm117_vm6, %v1049_v24, %v1051_v28  ;;  %v1199_v45 = vld [vmem:[#allocation4 + $0x118] sm:$0xff] }
 0x47d   :  { %3312 = vmatpush3.bf16.msra.mxu1 %v1169_v53  ;;  %1276 = vmatprep.subr.bf16.mxu0 %v1056_v3 }
 0x47e   :  { %1277 = vmatpush1.bf16.msra.mxu0 %v1055_v23 }
 0x47f   :  { %v1101_v12 = vpop.permute.xlu0 %1100  ;;  %v1074_v39 = vpop.permute.xlu1 %1073  ;;  %v1196_v40 = vld [vmem:[#allocation4 + $0x100] sm:$0xff] }
 0x480   :  { %v1083_v31 = vsel %vm132_vm9, %v1072_v7, %v1074_v39  ;;  %1094 = vst.msk [vmem:[#allocation4 + $0x130] sm:$0xff] %vm365_vm12, %v1074_v39  ;;  %3313 = vmatprep.subr.bf16.mxu1 %v1196_v40 }
 0x481   :  { %3314 = vmatpush3.bf16.msra.mxu1 %v1172_v29  ;;  %1278 = vmatprep.subr.bf16.mxu0 %v1083_v31  ;;  %v3532_v29 = vld [vmem:[%s5399_s4 + $0x8] ss:$12 sps:$4 sm:$0xff]  }
 0x482   :  { %3315 = vmatprep.subr.bf16.mxu1 %v1199_v45  ;;  %1279 = vmatpush1.bf16.msra.mxu0 %v1082_v14 }
 0x483   :  { %v1109_v20 = vpop.permute.xlu0 %1108  ;;  %v1078_v2 = vpop.permute.xlu1 %1077  ;;  %v1205_v42 = vld [vmem:[#allocation4 + $0x148] sm:$0xff] }
 0x484   :  { %1126 = vst.msk [vmem:[#allocation4 + $0x178] sm:$0xff] %vm365_vm12, %v1109_v20  ;;  %v1084_v11 = vsel %vm132_vm9, %v4344_v27, %v1078_v2  ;;  %v1085_v9 = vsel %vm132_vm9, %v1078_v2, %v1080_v6  ;;  %v1111_v27 = vsel %vm147_vm8, %v4338_v8, %v1101_v12  ;;  %v3527_v8 = vld [vmem:[%s5399_s4] ss:$12 sps:$4 sm:$0xff]  }
 0x485   :  { %3316 = vmatpush3.bf16.msra.mxu1 %v1175_v17  ;;  %1280 = vmatprep.subr.bf16.mxu0 %v1085_v9  ;;  %v1795_v2 = vld [vmem:[#allocation3 + $0x10] sm:$0xff]  ;;  %v1798_v17 = vld [vmem:[#allocation3 + $0x28] sm:$0xff] }
 0x486   :  { %1281 = vmatpush1.bf16.msra.mxu0 %v1084_v11 }
 0x487   :  { %v1692_v43 = vpop.permute.xlu0 %1691  ;;  %v1103_v15 = vpop.permute.xlu1 %1102  ;;  %v1202_v49 = vld [vmem:[#allocation4 + $0x130] sm:$0xff] }
 0x488   :  { %v1697_v4 = vsel %vm72_vm5, %v1692_v43, %v3493_v56  ;;  %v1112_v59 = vsel %vm147_vm8, %v1101_v12, %v1103_v15  ;;  %1123 = vst.msk [vmem:[#allocation4 + $0x160] sm:$0xff] %vm365_vm12, %v1103_v15  ;;  %3317 = vmatprep.subr.bf16.mxu1 %v1202_v49  ;;  %v1797_v12 = vld [vmem:[#allocation3 + $0x20] sm:$0xff] }
 0x489   :  { %1702 = vst [vmem:[#allocation3 + $0x18] sm:$0xf] %v1697_v4  ;;  %3318 = vmatpush3.bf16.msra.mxu1 %v1178_v13  ;;  %1282 = vmatprep.subr.bf16.mxu0 %v1112_v59  ;;  %v1793_v43 = vld [vmem:[#allocation3] sm:$0xff] }
 0x48a   :  { %3319 = vmatprep.subr.bf16.mxu1 %v1205_v42  ;;  %1283 = vmatpush1.bf16.msra.mxu0 %v1111_v27  ;;  %v1810_v27 = vpack.c.bf16 %v1798_v17, %v1795_v2  ;;  %v3533_v42 = vld [vmem:[%s5399_s4 + $0x20] ss:$12 sps:$4 sm:$0xff]  }
 0x48b   :  { %v3502_v25 = vpop.permute.xlu0 %3501  ;;  %v1107_v41 = vpop.permute.xlu1 %1106  ;;  %v1211_v21 = vld [vmem:[#allocation4 + $0x178] sm:$0xff] }
 0x48c   :  { %v3504_v54 = vunpack.i.h.bf16 %v3502_v25  ;;  %v3503_v62 = vunpack.i.l.bf16 %v3502_v25  ;;  %v1113_v56 = vsel %vm147_vm8, %v4346_v60, %v1107_v41  ;;  %v1114_v55 = vsel %vm147_vm8, %v1107_v41, %v1109_v20 }
 0x48d   :  { %3320 = vmatpush3.bf16.msra.mxu1 %v1181_v58  ;;  %1284 = vmatprep.subr.bf16.mxu0 %v1114_v55 }
 0x48e   :  { %1732 = vst.msk [vmem:[#allocation3 + $0x40] sm:$0xf] %vm46_vm0, %v3504_v54  ;;  %v1726_v52 = vsel %vm102_vm7, %v3503_v62, %v3504_v54  ;;  %1285 = vmatpush1.bf16.msra.mxu0 %v1113_v56  ;;  %v3534_v54 = vld [vmem:[%s5395_s1] sm:$0xff]  }
 0x48f   :  { %1731 = vst [vmem:[#allocation3 + $0x38] sm:$0xf] %v1726_v52  ;;  %v1130_v60 = vpop.permute.xlu0 %1129  ;;  %v1706_v34 = vpop.permute.xlu1 %1705  ;;  %v1208_v61 = vld [vmem:[#allocation4 + $0x160] sm:$0xff] }
 0x490   :  { %v1711_v30 = vsel %vm87_vm3, %v1706_v34, %v3498_v18  ;;  %3321 = vmatprep.subr.bf16.mxu1 %v1208_v61  ;;  %v1140_v1 = vsel %vm5416_vm10, %v4342_v46, %v1130_v60  ;;  %v1794_v46 = vld [vmem:[#allocation3 + $0x8] sm:$0xff] }
 0x491   :  { %1716 = vst [vmem:[#allocation3 + $0x18] sm:$0xf0] %v1711_v30  ;;  %3322 = vmatpush3.bf16.msra.mxu1 %v1184_v16  ;;  %1287 = vmatmul.mubr.bf16.vlgmr.msra.gmra.mrb[8].mxu0 %v3527_v8  ;;  %v1809_v11 = vpack.c.bf16 %v1797_v12, %v1794_v46 }
 0x492   :  { %3323 = vmatprep.subr.bf16.mxu1 %v1211_v21  ;;  %1296 = vmatprep.mubr.bf16.mxu0 %v3530_v26 }
 0x493   :  { %v1138_v57 = vpop.permute.xlu0 %1137  ;;  %v4419_v48 = vpop.permute.xlu1 %3506 }
 0x494   :  { %1155 = vst.msk [vmem:[#allocation4 + $0x1a8] sm:$0xff] %vm365_vm12, %v1138_v57  ;;  %v3509_v18 = vunpack.i.h.bf16 %v4419_v48  ;;  %v3508_v28 = vunpack.i.l.bf16 %v4419_v48 }
 0x495   :  { %3324 = vmatpush3.bf16.msra.mxu1 %v1187_v5 }
 0x496   :  { %1746 = vst.msk [vmem:[#allocation3 + $0x40] sm:$0xf0] %vm64_vm2, %v3509_v18  ;;  %v1740_v36 = vsel %vm117_vm6, %v3508_v28, %v3509_v18 }
 0x497   :  { %1745 = vst [vmem:[#allocation3 + $0x38] sm:$0xf0] %v1740_v36  ;;  %v3512_v7 = vpop.permute.xlu0 %3511  ;;  %v1132_v32 = vpop.permute.xlu1 %1131 }
 0x498   :  { %v3514_v51 = vunpack.i.h.bf16 %v3512_v7  ;;  %v3513_v35 = vunpack.i.l.bf16 %v3512_v7  ;;  %v1141_v63 = vsel %vm5416_vm10, %v1130_v60, %v1132_v32  ;;  %1152 = vst.msk [vmem:[#allocation4 + $0x190] sm:$0xff] %vm365_vm12, %v1132_v32  ;;  %1393 = vmatmul.mubr.bf16.vlgmr.msra.gmra.mrb[4].mxu1 %v3527_v8  ;;  %v1796_v14 = vld [vmem:[#allocation3 + $0x18] sm:$0xff] }
 0x499   :  { %1400 = vmatprep.mubr.bf16.mxu1 %v3530_v26  ;;  %1297 = vmatmul.mubr.bf16.gmra.mrb[12].mxu0 %v3267_v47  ;;  %v1808_v49 = vpack.c.bf16 %v1796_v14, %v1793_v43  ;;  %v3535_v7 = vld [vmem:[%s5395_s1 + $0x8] sm:$0xff]  }
 0x49a   :  { %1760 = vst.msk [vmem:[#allocation3 + $0x58] sm:$0xf] %vm46_vm0, %v3514_v51  ;;  %v1754_v33 = vsel %vm132_vm9, %v3513_v35, %v3514_v51  ;;  %1307 = vmatprep.subr.bf16.mxu0 %v1141_v63  ;;  %1339 = vmatprep.mubr.bf16.mxu0 %v5438_v50 }
 0x49b   :  { %1759 = vst [vmem:[#allocation3 + $0x50] sm:$0xf] %v1754_v33  ;;  %v1720_v6 = vpop.permute.xlu0 %1719  ;;  %v1136_v24 = vpop.permute.xlu1 %1135  ;;  %1308 = vmatpush1.bf16.msra.mxu0 %v1140_v1  ;;  %v1217_v9 = vld [vmem:[#allocation4 + $0x1a8] sm:$0xff] }
 0x49c   :  { %v1725_v23 = vsel %vm102_vm7, %v1720_v6, %v3503_v62  ;;  %v1142_v3 = vsel %vm5416_vm10, %v4348_v44, %v1136_v24  ;;  %v1143_v53 = vsel %vm5416_vm10, %v1136_v24, %v1138_v57 }
 0x49d   :  { %1730 = vst [vmem:[#allocation3 + $0x30] sm:$0xf] %v1725_v23  ;;  %1309 = vmatprep.subr.bf16.mxu0 %v1143_v53  ;;  %v1801_v58 = vld [vmem:[#allocation3 + $0x40] sm:$0xff] }
 0x49e   :  { %v1800_v26 = vld [vmem:[#allocation3 + $0x38] sm:$0xff] }
 0x49f   :  { %v3517_v39 = vpop.permute.xlu1 %3516  ;;  %v1214_v40 = vld [vmem:[#allocation4 + $0x190] sm:$0xff]  ;;  %v1748_v31 = vpop.permute.xlu0 %1747  ;;  %1310 = vmatpush1.bf16.msra.mxu0 %v1142_v3 }
 0x4a0   :  { %v3519_v45 = vunpack.i.h.bf16 %v3517_v39  ;;  %v3518_v20 = vunpack.i.l.bf16 %v3517_v39  ;;  %1401 = vmatmul.mubr.bf16.gmra.mrb[8].mxu1 %v3267_v47  ;;  %3388 = vmatprep.subr.bf16.mxu1 %v1214_v40  ;;  %v1753_v44 = vsel %vm132_vm9, %v1748_v31, %v3513_v35 }
 0x4a1   :  { %3389 = vmatpush3.bf16.msra.mxu1 %v1214_v40  ;;  %1758 = vst [vmem:[#allocation3 + $0x48] sm:$0xf] %v1753_v44  ;;  %3392 = vmatprep.mubr.msk.bf16.mxu1 %vm365_vm12, %v3532_v29 }
 0x4a2   :  { %1774 = vst.msk [vmem:[#allocation3 + $0x58] sm:$0xf0] %vm64_vm2, %v3519_v45  ;;  %v1768_v15 = vsel %vm147_vm8, %v3518_v20, %v3519_v45  ;;  %3390 = vmatprep.subr.bf16.mxu1 %v1217_v9  ;;  %1842 = vmatprep.subr.bf16.mxu0 %v1809_v11  ;;  %vm5447_vm2 = vcmask 1041408  }
 0x4a3   :  { %1773 = vst [vmem:[#allocation3 + $0x50] sm:$0xf0] %v1768_v15  ;;  %v1734_v4 = vpop.permute.xlu1 %1733  ;;  %v3522_v59 = vpop.permute.xlu0 %3521  ;;  %3270 = vmatmul.mubr.msk.bf16.vlgmr.msra.gmra.mrb[8].mxu0 %vm365_vm12, %v3532_v29  ;;  %vm5448_vm11 = vmmov %vm5447_vm2 }
 0x4a4   :  { %v1739_v13 = vsel %vm117_vm6, %v1734_v4, %v3508_v28  ;;  %v3524_v25 = vunpack.i.h.bf16 %v3522_v59  ;;  %v3523_v41 = vunpack.i.l.bf16 %v3522_v59  ;;  %1843 = vmatpush1.bf16.msra.mxu0 %v1808_v49  ;;  %1349 = vmatprep.mubr.bf16.mxu0 %v5438_v50 }
 0x4a5   :  { %1744 = vst [vmem:[#allocation3 + $0x30] sm:$0xf0] %v1739_v13  ;;  %3391 = vmatpush3.bf16.msra.mxu1 %v1217_v9 }
 0x4a6   :  { %3396 = vmatprep.subr.bf16.mxu1 %v1810_v27  ;;  %v1781_v62 = vsel %vm5416_vm10, %v3523_v41, %v3524_v25 }
 0x4a7   :  { %v1762_v56 = vpop.permute.xlu1 %1761  ;;  %1786 = vst [vmem:[#allocation3 + $0x60] sm:$0xf] %v1781_v62 }
 0x4a8   :  { %v1767_v55 = vsel %vm147_vm8, %v1762_v56, %v3518_v20  ;;  %3393 = vmatmul.mubr.msk.bf16.vlgmr.msra.gmra.mrb[12].mxu1 %vm365_vm12, %v3533_v42 }
 0x4a9   :  { %1772 = vst [vmem:[#allocation3 + $0x48] sm:$0xf0] %v1767_v55  ;;  %3397 = vmatpush3.bf16.msra.mxu1 %v1810_v27  ;;  %v1804_v8 = vld [vmem:[#allocation3 + $0x58] sm:$0xff]  ;;  %3402 = vmatprep.mubr.msk.bf16.mxu1 %vm209_vm1, %v3534_v54 }
 0x4aa   :  { %v1813_v52 = vpack.c.bf16 %v1804_v8, %v1801_v58  ;;  %v1803_v60 = vld [vmem:[#allocation3 + $0x50] sm:$0xff] }
 0x4ab   :  { %v1780_v34 = vpop.permute.xlu1 %1779  ;;  %v1812_v61 = vpack.c.bf16 %v1803_v60, %v1800_v26  ;;  %3271 = vmatmul.mubr.msk.bf16.gmra.mrb[12].mxu0 %vm365_vm12, %v3533_v42 }
 0x4ac   :  { %v1782_v30 = vsel %vm5416_vm10, %v3524_v25, %v1780_v34  ;;  %1788 = vst.msk [vmem:[#allocation3 + $0x70] sm:$0xf] %vm46_vm0, %v1780_v34  ;;  %3398 = vmatprep.subr.bf16.mxu1 %v1813_v52  ;;  %1874 = vmatprep.mubr.bf16.mxu0 %v5438_v50  ;;  %v1799_v21 = vld [vmem:[#allocation3 + $0x30] sm:$0xff]  ;;  %vm5449_vm0 = vmmov %vm5447_vm2 }
 0x4ad   :  { %1787 = vst [vmem:[#allocation3 + $0x68] sm:$0xf] %v1782_v30  ;;  %1844 = vmatprep.subr.bf16.mxu0 %v1812_v61  ;;  %3399 = vmatpush3.bf16.msra.mxu1 %v1813_v52  ;;  %vm5450_vm10 = vmmov %vm5449_vm0 }
 0x4ae   :  { %v1805_v16 = vld [vmem:[#allocation3 + $0x60] sm:$0xf] }
 0x4af   :  { %v1814_v57 = vpack.c.bf16 %v1805_v16, %v1805_v16 }
 0x4b0   :  { %v1802_v0 = vld [vmem:[#allocation3 + $0x48] sm:$0xff] }
 0x4b1   :  { %v1811_v22 = vpack.c.bf16 %v1802_v0, %v1799_v21  ;;  %v1834_v47 = vsel %vm5447_vm2, %v1814_v57, 0 }
 0x4b3   :  { %1845 = vmatpush1.bf16.msra.mxu0 %v1811_v22  ;;  %v1807_v48 = vld [vmem:[#allocation3 + $0x70] sm:$0xf] }
 0x4b4   :  { %v1806_v18 = vld [vmem:[#allocation3 + $0x68] sm:$0xf]  ;;  %v1816_v28 = vpack.c.bf16 %v1807_v48, %v1807_v48 }
 0x4b5   :  { %v1815_v5 = vpack.c.bf16 %v1806_v18, %v1806_v18 }
 0x4b6   :  { %3431 = vmatprep.subr.msk.bf16.mxu1 %vm5448_vm11, %v1816_v28  ;;  %v1840_v36 = vsel %vm5449_vm0, %v1816_v28, 0 }
 0x4b7   :  { %3277 = vmatprep.subr.msk.bf16.mxu0 %vm5450_vm10, %v1815_v5  ;;  %3401 = vmatpush3.bf16.msra.mxu1 %v1840_v36 }
 0x4b8   :  { %1847 = vmatpush1.bf16.msra.mxu0 %v1834_v47 }
 0x4ba   :  { %3403 = vmatmul.mubr.msk.bf16.vlgmr.msra.gmra.mrb[16].mxu1 %vm209_vm1, %v3535_v7 }
 0x4bb   :  { %3278 = vmatmul.mubr.msk.bf16.vlgmr.msra.gmra.mrb[16].mxu0 %vm209_vm1, %v3534_v54 }
 0x4bc   :  { %1884 = vmatprep.mubr.bf16.mxu0 %v5438_v50 }
 0x4c3   :  { %3279 = vmatmul.mubr.msk.bf16.gmra.mrb[20].mxu0 %vm209_vm1, %v3535_v7 }
 0x56b   :  { %v3325_v32 = vpop.f32.mrb[4].mxu1 }
 0x56c   :  { %v3326_v51 = vpop.f32.mrb[5].mxu1 }
 0x56d   :  { %v3327_v35 = vadd.f32 %v3326_v51, %v3325_v32  ;;  %v3328_v63 = vpop.f32.mrb[6].mxu1 }
 0x56e   :  { %v3329_v1 = vpop.f32.mrb[7].mxu1 }
 0x56f   :  { %v3330_v33 = vadd.f32 %v3329_v1, %v3328_v63 }
 0x573   :  { %v3331_v6 = vpop.f32.mrb[8].mxu1 }
 0x574   :  { %v3332_v24 = vpop.f32.mrb[9].mxu1 }
 0x575   :  { %v3333_v23 = vadd.f32 %v3332_v24, %v3331_v6  ;;  %v3334_v3 = vpop.f32.mrb[10].mxu1 }
 0x576   :  { %v3335_v53 = vpop.f32.mrb[11].mxu1  ;;  %v4472_v46 = vpop.f32.mrb[8].mxu0 }
 0x577   :  { %5451 = vst [vmem:[#allocation8_spill] sm:$0xff] %v4472_v46  ;;  %v3336_v12 = vadd.f32 %v3335_v53, %v3334_v3  ;;  %v1466_v39 = vmul.f32 %v4472_v46, %v3790_v38  ;;  %v4476_v40 = vpop.f32.mrb[9].mxu0 }
 0x578   :  { %5452 = vst [vmem:[#allocation11_spill] sm:$0xff] %v4476_v40  ;;  %v1467_v31 = vmul.f32 %v4476_v40, %v3794_v10  ;;  %v4480_v29 = vpop.f32.mrb[10].mxu0 }
 0x579   :  { %5453 = vst [vmem:[#allocation10_spill] sm:$0xff] %v4480_v29  ;;  %v1469_v14 = vmul.f32 %v4480_v29, %v3790_v38  ;;  %v4484_v45 = vpop.f32.mrb[11].mxu0 }
 0x57a   :  { %5454 = vst [vmem:[#allocation12_spill] sm:$0xff] %v4484_v45  ;;  %v4486_v20 = vadd.f32 %v1467_v31, %v1466_v39  ;;  %v1470_v44 = vmul.f32 %v4484_v45, %v3794_v10 }
 0x57b   :  { %v3394_v2 = vpop.f32.mrb[12].mxu1 }
 0x57c   :  { %5455 = vst [vmem:[#allocation5_spill] sm:$0xff] %v4486_v20  ;;  %v4490_v11 = vadd.f32 %v3394_v2, %v3333_v23  ;;  %v1443_v9 = vpop.f32.mrb[13].mxu1  ;;  %v4492_v17 = vadd.f32 %v1470_v44, %v1469_v14 }
 0x57d   :  { %v4494_v43 = vadd.f32 %v3327_v35, %v1443_v9  ;;  %v3395_v15 = vpop.f32.mrb[14].mxu1 }
 0x57e   :  { %5456 = vst [vmem:[#allocation7_spill] sm:$0xff] %v4490_v11  ;;  %5457 = vst [vmem:[#allocation9_spill] sm:$0xff] %v4492_v17  ;;  %v4496_v49 = vadd.f32 %v3395_v15, %v3336_v12  ;;  %v1446_v4 = vpop.f32.mrb[15].mxu1  ;;  %v4498_v59 = vpop.f32.mrb[12].mxu0 }
 0x57f   :  { %5459 = vst [vmem:[#allocation13_spill] sm:$0xff] %v4498_v59  ;;  %v4500_v13 = vadd.f32 %v3330_v33, %v1446_v4  ;;  %v1472_v27 = vmul.f32 %v4498_v59, %v3790_v38  ;;  %v4504_v42 = vpop.f32.mrb[13].mxu0 }
 0x580   :  { %5458 = vst [vmem:[#allocation6_spill] sm:$0xff] %v4496_v49  ;;  %5461 = vst [vmem:[#allocation15_spill] sm:$0xff] %v4504_v42  ;;  %v1473_v25 = vmul.f32 %v4504_v42, %v3794_v10  ;;  %v4508_v41 = vpop.f32.mrb[14].mxu0 }
 0x581   :  { %5460 = vst [vmem:[#allocation14_spill] sm:$0xff] %v4500_v13  ;;  %5462 = vst [vmem:[#allocation16_spill] sm:$0xff] %v4508_v41  ;;  %v1475_v54 = vmul.f32 %v4508_v41, %v3790_v38  ;;  %v4512_v62 = vpop.f32.mrb[15].mxu0 }
 0x582   :  { %5463 = vst [vmem:[#allocation17_spill] sm:$0xff] %v4512_v62  ;;  %v4514_v56 = vadd.f32 %v1473_v25, %v1472_v27  ;;  %v1476_v55 = vmul.f32 %v4512_v62, %v3794_v10 }
 0x584   :  { %5464 = vst [vmem:[#allocation18_spill] sm:$0xff] %v4514_v56  ;;  %v4518_v58 = vadd.f32 %v1476_v55, %v1475_v54 }
 0x586   :  { %5465 = vst [vmem:[#allocation19_spill] sm:$0xff] %v4518_v58 }
 0x58d   :  { %v4520_v8 = vpop.f32.mrb[16].mxu1 }
 0x58e   :  { %v1876_v52 = vpop.f32.mrb[16].mxu0  ;;  %v1929_v26 = vpop.f32.mrb[17].mxu1  ;;  %v1960_v35 = vmul.f32 %v4520_v8, %v3788_v37 }
 0x58f   :  { %v1952_v60 = vmul.f32 %v1876_v52, %v3790_v38  ;;  %v1878_v34 = vpop.f32.mrb[17].mxu0  ;;  %v1954_v61 = vmul.f32 %v1929_v26, %v3788_v37  ;;  %v3405_v30 = vpop.f32.mrb[18].mxu1 }
 0x590   :  { %v1953_v16 = vmul.f32 %v1878_v34, %v3794_v10  ;;  %v1880_v21 = vpop.f32.mrb[18].mxu0  ;;  %v1932_v0 = vpop.f32.mrb[19].mxu1  ;;  %v1963_v24 = vmul.f32 %v3405_v30, %v3788_v37  ;;  %v1975_v39 = vsel %vm365_vm12, %v1960_v35, 0.0 }
 0x591   :  { %v1955_v22 = vmul.f32 %v1880_v21, %v3790_v38  ;;  %v1882_v57 = vpop.f32.mrb[19].mxu0  ;;  %v1957_v48 = vmul.f32 %v1932_v0, %v3788_v37  ;;  %v1965_v18 = vsel %vm365_vm12, %v1954_v61, 0.0 }
 0x592   :  { %v1956_v28 = vmul.f32 %v1882_v57, %v3794_v10  ;;  %v1964_v5 = vadd.f32 %v1953_v16, %v1952_v60  ;;  %v1980_v44 = vsel %vm365_vm12, %v1963_v24, 0.0 }
 0x593   :  { %v1970_v47 = vsel %vm365_vm12, %v1957_v48, 0.0 }
 0x594   :  { %v1969_v36 = vadd.f32 %v1956_v28, %v1955_v22  ;;  %v1966_v7 = vadd.f32 %v1965_v18, %v1964_v5 }
 0x596   :  { %v1886_v32 = vpop.f32.mrb[20].mxu0  ;;  %1967 = vadd.xlane.f32.xlu0 %v1966_v7  ;;  %v1971_v51 = vadd.f32 %v1970_v47, %v1969_v36 }
 0x597   :  { %v1958_v63 = vmul.f32 %v1886_v32, %v3790_v38  ;;  %v4533_v1 = vpop.f32.mrb[21].mxu0 }
 0x598   :  { %v1959_v33 = vmul.f32 %v4533_v1, %v3794_v10  ;;  %v1890_v6 = vpop.f32.mrb[22].mxu0  ;;  %1972 = vadd.xlane.f32.xlu1 %v1971_v51 }
 0x599   :  { %v1961_v23 = vmul.f32 %v1890_v6, %v3790_v38  ;;  %v1892_v3 = vpop.f32.mrb[23].mxu0 }
 0x59a   :  { %v1974_v53 = vadd.f32 %v1959_v33, %v1958_v63  ;;  %v1962_v12 = vmul.f32 %v1892_v3, %v3794_v10 }
 0x59c   :  { %v1979_v31 = vadd.f32 %v1962_v12, %v1961_v23  ;;  %v1976_v14 = vadd.f32 %v1975_v39, %v1974_v53 }
 0x59e   :  { %1977 = vadd.xlane.f32.xlu0 %v1976_v14  ;;  %v1981_v2 = vadd.f32 %v1980_v44, %v1979_v31 }
 0x5a2   :  { %1982 = vadd.xlane.f32.xlu0 %v1981_v2 }
 0x623   :  { %v1968_v9 = vpop.xlane.xlu0 %1967 }
 0x625   :  { %v1973_v15 = vpop.xlane.xlu1 %1972 }
 0x626   :  { %v1984_v27 = vadd.f32 %v1973_v15, %v1968_v9 }
 0x62b   :  { %v1978_v4 = vpop.xlane.xlu0 %1977 }
 0x62c   :  { %v1985_v25 = vadd.f32 %v1984_v27, %v1978_v4 }
 0x62f   :  { %v1983_v54 = vpop.xlane.xlu0 %1982 }
 0x630   :  { %v1986_v55 = vadd.f32 %v1985_v25, %v1983_v54 }
 0x632   :  { %v1987_v60 = vrot.slane %v1986_v55, 4 }
 0x634   :  { %v1988_v61 = vadd.f32 %v1987_v60, %v1986_v55 }
 0x636   :  { %v1989_v16 = vrot.slane %v1988_v61, 2 }
 0x638   :  { %v1990_v22 = vadd.f32 %v1989_v16, %v1988_v61 }
 0x63a   :  { %v1991_v48 = vrot.slane %v1990_v22, 1 }
 0x63c   :  { %v1992_v18 = vadd.f32 %v1991_v48, %v1990_v22 }
 0x63e   :  { %v1993_v28 = vmul.f32 0.00012207031, %v1992_v18 }
 0x640   :  { %v4542_v5 = vsub.f32 %v1880_v21, %v1993_v28  ;;  %v4544_v47 = vsub.f32 %v1882_v57, %v1993_v28  ;;  %v4546_v36 = vsub.f32 %v1932_v0, %v1993_v28  ;;  %v4548_v7 = vsub.f32 %v1876_v52, %v1993_v28 }
 0x641   :  { %v4550_v51 = vsub.f32 %v1878_v34, %v1993_v28  ;;  %v4552_v35 = vsub.f32 %v1929_v26, %v1993_v28  ;;  %v4554_v63 = vsub.f32 %v1890_v6, %v1993_v28  ;;  %v4556_v33 = vsub.f32 %v1892_v3, %v1993_v28 }
 0x642   :  { %v2009_v24 = vmul.f32 %v4542_v5, %v3790_v38  ;;  %v2010_v21 = vmul.f32 %v4544_v47, %v3794_v10  ;;  %v2011_v0 = vmul.f32 %v4546_v36, %v3788_v37  ;;  %v2006_v52 = vmul.f32 %v4548_v7, %v3790_v38 }
 0x643   :  { %v2007_v26 = vmul.f32 %v4550_v51, %v3794_v10  ;;  %v2008_v34 = vmul.f32 %v4552_v35, %v3788_v37  ;;  %v4570_v57 = vsub.f32 %v3405_v30, %v1993_v28  ;;  %v2015_v6 = vmul.f32 %v4554_v63, %v3790_v38 }
 0x644   :  { %v2021_v23 = vmul.f32 %v2009_v24, %v2009_v24  ;;  %v2022_v3 = vmul.f32 %v2010_v21, %v2010_v21  ;;  %v2023_v53 = vmul.f32 %v2011_v0, %v2011_v0  ;;  %v2018_v12 = vmul.f32 %v2006_v52, %v2006_v52 }
 0x645   :  { %v2019_v39 = vmul.f32 %v2007_v26, %v2007_v26  ;;  %v2020_v31 = vmul.f32 %v2008_v34, %v2008_v34  ;;  %v2016_v14 = vmul.f32 %v4556_v33, %v3794_v10  ;;  %v2017_v44 = vmul.f32 %v4570_v57, %v3788_v37  ;;  %v1944_v34 = vld [vmem:[%s5397_s2] sm:$0xff] }
 0x646   :  { %v2035_v2 = vadd.f32 %v2022_v3, %v2021_v23  ;;  %v2036_v9 = vsel %vm365_vm12, %v2023_v53, 0.0  ;;  %v2027_v30 = vmul.f32 %v2015_v6, %v2015_v6  ;;  %v4579_v15 = vsub.f32 %v1886_v32, %v1993_v28  ;;  %v1945_v6 = vld [vmem:[%s5397_s2 + $0x8] sm:$0xff]  ;;  %v1948_v23 = vld [vmem:[%s5398_s3] sm:$0xff]  ;;  %v1946_v3 = vld [vmem:[%s5397_s2 + $0x10] sm:$0xff] }
 0x647   :  { %v2030_v4 = vadd.f32 %v2019_v39, %v2018_v12  ;;  %v2031_v27 = vsel %vm365_vm12, %v2020_v31, 0.0  ;;  %v2028_v25 = vmul.f32 %v2016_v14, %v2016_v14  ;;  %v2029_v54 = vmul.f32 %v2017_v44, %v2017_v44  ;;  %v1949_v53 = vld [vmem:[%s5398_s3 + $0x8] sm:$0xff]  ;;  %v1950_v12 = vld [vmem:[%s5398_s3 + $0x10] sm:$0xff]  ;;  %v1947_v39 = vld [vmem:[%s5397_s2 + $0x18] sm:$0xff] }
 0x648   :  { %v2037_v55 = vadd.f32 %v2036_v9, %v2035_v2  ;;  %v4583_v60 = vsub.f32 %v4533_v1, %v1993_v28  ;;  %v4586_v61 = vsub.f32 %v4520_v8, %v1993_v28  ;;  %v2012_v16 = vmul.f32 %v4579_v15, %v3790_v38  ;;  %v1951_v31 = vld [vmem:[%s5398_s3 + $0x18] sm:$0xff] }
 0x649   :  { %v2032_v22 = vadd.f32 %v2031_v27, %v2030_v4  ;;  %v2045_v48 = vadd.f32 %v2028_v25, %v2027_v30  ;;  %v2046_v32 = vsel %vm365_vm12, %v2029_v54, 0.0 }
 0x64a   :  { %2038 = vadd.xlane.f32.xlu0 %v2037_v55  ;;  %v2013_v18 = vmul.f32 %v4583_v60, %v3794_v10  ;;  %v2014_v24 = vmul.f32 %v4586_v61, %v3788_v37  ;;  %v2024_v21 = vmul.f32 %v2012_v16, %v2012_v16 }
 0x64b   :  { %2033 = vadd.xlane.f32.xlu1 %v2032_v22  ;;  %v2047_v1 = vadd.f32 %v2046_v32, %v2045_v48 }
 0x64c   :  { %v2025_v0 = vmul.f32 %v2013_v18, %v2013_v18  ;;  %v2026_v8 = vmul.f32 %v2014_v24, %v2014_v24 }
 0x64e   :  { %2048 = vadd.xlane.f32.xlu0 %v2047_v1  ;;  %v2040_v28 = vadd.f32 %v2025_v0, %v2024_v21  ;;  %v2041_v52 = vsel %vm365_vm12, %v2026_v8, 0.0 }
 0x650   :  { %v2042_v26 = vadd.f32 %v2041_v52, %v2040_v28 }
 0x652   :  { %2043 = vadd.xlane.f32.xlu1 %v2042_v26 }
 0x663   :  { %2076 = vperm.xlu1 %3483, %v1944_v34  }
 0x664   :  { %2081 = vperm.xlu0 %3484, %v1945_v6  }
 0x667   :  { %2108 = vperm.xlu1 %3483, %v1948_v23  }
 0x668   :  { %2086 = vperm.xlu0 %3484, %v1946_v3  }
 0x66b   :  { %2113 = vperm.xlu1 %3483, %v1949_v53  }
 0x66c   :  { %2118 = vperm.xlu0 %3484, %v1950_v12  }
 0x66f   :  { %2091 = vperm.xlu1 %3483, %v1947_v39  }
 0x673   :  { %2123 = vperm.xlu1 %3483, %v1951_v31  }
 0x6d7   :  { %v2039_v44 = vpop.xlane.xlu0 %2038 }
 0x6d8   :  { %v2034_v14 = vpop.xlane.xlu1 %2033 }
 0x6d9   :  { %v2050_v2 = vadd.f32 %v2039_v44, %v2034_v14 }
 0x6db   :  { %v2049_v4 = vpop.xlane.xlu0 %2048 }
 0x6df   :  { %v2044_v9 = vpop.xlane.xlu1 %2043 }
 0x6e0   :  { %v2051_v30 = vadd.f32 %v2050_v2, %v2044_v9 }
 0x6e2   :  { %v2052_v27 = vadd.f32 %v2051_v30, %v2049_v4 }
 0x6e3   :  { %v2077_v24 = vpop.permute.xlu1 %2076 }
 0x6e4   :  { %v2053_v25 = vrot.slane %v2052_v27, 4 }
 0x6e6   :  { %v2054_v54 = vadd.f32 %v2053_v25, %v2052_v27 }
 0x6e7   :  { %v2109_v3 = vpop.permute.xlu1 %2108 }
 0x6e8   :  { %v2055_v55 = vrot.slane %v2054_v54, 2 }
 0x6ea   :  { %v2056_v16 = vadd.f32 %v2055_v55, %v2054_v54 }
 0x6eb   :  { %v2114_v44 = vpop.permute.xlu1 %2113 }
 0x6ec   :  { %v2057_v22 = vrot.slane %v2056_v16, 1 }
 0x6ee   :  { %v2058_v48 = vadd.f32 %v2057_v22, %v2056_v16 }
 0x6f0   :  { %v2059_v32 = vmul.f32 0.00012207031, %v2058_v48 }
 0x6f2   :  { %v2060_v18 = vadd.f32 1e-05, %v2059_v32 }
 0x6f4   :  { %3594 = vrsqrt.f32 %v2060_v18 }
 0x6fe   :  { %v4620_v21 = vpop.eup %3594 }
 0x6ff   :  { %v2062_v1 = vmul.f32 %v4620_v21, %v4548_v7  ;;  %v2063_v0 = vmul.f32 %v4620_v21, %v4550_v51  ;;  %v2064_v8 = vmul.f32 %v4620_v21, %v4552_v35  ;;  %v2065_v28 = vmul.f32 %v4620_v21, %v4542_v5  ;;  %v2082_v7 = vpop.permute.xlu0 %2081 }
 0x700   :  { %v2066_v52 = vmul.f32 %v4620_v21, %v4544_v47  ;;  %v2067_v23 = vmul.f32 %v4620_v21, %v4546_v36  ;;  %v2068_v22 = vmul.f32 %v4620_v21, %v4579_v15  ;;  %v2069_v32 = vmul.f32 %v4620_v21, %v4583_v60 }
 0x701   :  { %v2094_v26 = vmul.f32 %v2077_v24, %v2062_v1  ;;  %v2095_v34 = vmul.f32 %v2077_v24, %v2063_v0  ;;  %v2096_v6 = vmul.f32 %v2077_v24, %v2064_v8  ;;  %v2097_v35 = vmul.f32 %v2082_v7, %v2065_v28 }
 0x702   :  { %v2098_v39 = vmul.f32 %v2082_v7, %v2066_v52  ;;  %v2099_v5 = vmul.f32 %v2082_v7, %v2067_v23  ;;  %v2070_v15 = vmul.f32 %v4620_v21, %v4586_v61 }
 0x703   :  { %v4634_v53 = vadd.f32 %v2109_v3, %v2094_v26  ;;  %v4636_v51 = vadd.f32 %v2109_v3, %v2095_v34  ;;  %v4638_v12 = vadd.f32 %v2109_v3, %v2096_v6  ;;  %v4651_v9 = vadd.f32 %v2114_v44, %v2097_v35  ;;  %v2087_v0 = vpop.permute.xlu0 %2086 }
 0x704   :  { %v4653_v30 = vadd.f32 %v2114_v44, %v2098_v39  ;;  %v4656_v25 = vadd.f32 %v2114_v44, %v2099_v5  ;;  %v2100_v28 = vmul.f32 %v2087_v0, %v2068_v22  ;;  %v2101_v52 = vmul.f32 %v2087_v0, %v2069_v32 }
 0x705   :  { %v4641_v31 = vmul.f32 0.70710677, %v4634_v53  ;;  %v4644_v47 = vmul.f32 0.70710677, %v4636_v51  ;;  %v4647_v14 = vmul.f32 0.70710677, %v4638_v12  ;;  %v2102_v7 = vmul.f32 %v2087_v0, %v2070_v15 }
 0x706   :  { %v4663_v18 = vmul.f32 0.70710677, %v4651_v9  ;;  %v4666_v24 = vmul.f32 0.70710677, %v4653_v30  ;;  %v4669_v8 = vmul.f32 0.70710677, %v4656_v25 }
 0x707   :  { %v2186_v36 = vand.u32 2147483647, %v4641_v31  ;;  %v2187_v2 = vand.u32 2147483647, %v4644_v47  ;;  %v2188_v4 = vand.u32 2147483647, %v4647_v14  ;;  %v2119_v39 = vpop.permute.xlu0 %2118 }
 0x708   :  { %v2189_v60 = vand.u32 2147483647, %v4663_v18  ;;  %v2190_v26 = vand.u32 2147483647, %v4666_v24  ;;  %v4676_v34 = vand.u32 2147483647, %v4669_v8  ;;  %v4681_v61 = vadd.f32 %v2119_v39, %v2101_v52 }
 0x709   :  { %v2198_v27 = vmul.f32 0.3275911, %v2186_v36  ;;  %v2199_v54 = vmul.f32 0.3275911, %v2187_v2  ;;  %v2200_v55 = vmul.f32 0.3275911, %v2188_v4  ;;  %v4685_v32 = vadd.f32 %v2119_v39, %v2102_v7 }
 0x70a   :  { %v2201_v6 = vmul.f32 0.3275911, %v2189_v60  ;;  %v2202_v23 = vmul.f32 0.3275911, %v2190_v26  ;;  %v2343_v3 = vsub.f32 0.0, %v2187_v2  ;;  %v2344_v22 = vsub.f32 0.0, %v2188_v4 }
 0x70b   :  { %v2210_v16 = vadd.f32 1.0, %v2198_v27  ;;  %v2211_v48 = vadd.f32 1.0, %v2199_v54  ;;  %v2212_v1 = vadd.f32 1.0, %v2200_v55  ;;  %v2203_v35 = vmul.f32 0.3275911, %v4676_v34 }
 0x70c   :  { %v2213_v5 = vadd.f32 1.0, %v2201_v6  ;;  %v2214_v44 = vadd.f32 1.0, %v2202_v23  ;;  %v4679_v27 = vadd.f32 %v2119_v39, %v2100_v28  ;;  %v2342_v55 = vsub.f32 0.0, %v2186_v36 }
 0x70d   :  { %3596 = vrcp.f32 %v2210_v16  ;;  %v2215_v54 = vadd.f32 1.0, %v2203_v35  ;;  %v4694_v28 = vmul.f32 0.70710677, %v4681_v61  ;;  %v2346_v7 = vsub.f32 0.0, %v2190_v26 }
 0x70e   :  { %3598 = vrcp.f32 %v2211_v48  ;;  %v2355_v48 = vmul.f32 %v2343_v3, %v2187_v2  ;;  %v4691_v15 = vmul.f32 0.70710677, %v4679_v27  ;;  %v2354_v3 = vmul.f32 %v2342_v55, %v2186_v36 }
 0x70f   :  { %3600 = vrcp.f32 %v2212_v1  ;;  %v2356_v39 = vmul.f32 %v2344_v22, %v2188_v4  ;;  %v4708_v45 = vand.u32 2147483647, %v4694_v28  ;;  %v2358_v4 = vmul.f32 %v2346_v7, %v2190_v26 }
 0x710   :  { %3602 = vrcp.f32 %v2213_v5  ;;  %v2368_v5 = vmul.f32 1.442695, %v2355_v48  ;;  %v4705_v41 = vand.u32 2147483647, %v4691_v15  ;;  %vm2163_vm1 = vcmp.ge.f32.partialorder %v4644_v47, 0.0 }
 0x711   :  { %3604 = vrcp.f32 %v2214_v44  ;;  %v4701_v44 = vmul.f32 0.70710677, %v4685_v32  ;;  %v2205_v40 = vmul.f32 0.3275911, %v4708_v45  ;;  %vm2162_vm10 = vcmp.ge.f32.partialorder %v4641_v31, 0.0 }
 0x712   :  { %3606 = vrcp.f32 %v2215_v54  ;;  %v2204_v22 = vmul.f32 0.3275911, %v4705_v41  ;;  %v2175_v47 = vsel %vm2163_vm1, 1.0, %v5436_v19  ;;  %vm2166_vm2 = vcmp.ge.f32.partialorder %v4666_v24, 0.0 }
 0x713   :  { %3608 = vpow2.f32 %v2368_v5  ;;  %v4716_v59 = vand.u32 2147483647, %v4701_v44  ;;  %v2374_v5 = vmul.f32 1.442695, %v2358_v4  ;;  %v2217_v49 = vadd.f32 1.0, %v2205_v40 }
 0x714   :  { %vm2164_vm11 = vcmp.ge.f32.partialorder %v4647_v14, 0.0  ;;  %vm2165_vm0 = vcmp.ge.f32.partialorder %v4663_v18, 0.0  ;;  %vm2167_vm1 = vcmp.ge.f32.partialorder %v4669_v8, 0.0  ;;  %v2143_v8 = vmul.f32 0.5, %v4656_v25 }
 0x715   :  { %3610 = vpow2.f32 %v2374_v5 }
 0x717   :  { %v4683_v16 = vpop.eup %3596 }
 0x718   :  { %v4687_v1 = vpop.eup %3598  ;;  %v2234_v0 = vmul.f32 1.0614054, %v4683_v16 }
 0x719   :  { %v4696_v52 = vpop.eup %3600  ;;  %v2235_v6 = vmul.f32 1.0614054, %v4687_v1 }
 0x71a   :  { %v2236_v2 = vmul.f32 1.0614054, %v4696_v52  ;;  %v2246_v23 = vadd.f32 -1.4531521, %v2234_v0  ;;  %v2345_v0 = vsub.f32 0.0, %v2189_v60  ;;  %v4713_v42 = vpop.eup %3602 }
 0x71b   :  { %v2247_v35 = vadd.f32 -1.4531521, %v2235_v6  ;;  %v2366_v6 = vmul.f32 1.442695, %v2354_v3  ;;  %v2237_v26 = vmul.f32 1.0614054, %v4713_v42 }
 0x71c   :  { %v2248_v54 = vadd.f32 -1.4531521, %v2236_v2  ;;  %v2258_v62 = vmul.f32 %v4683_v16, %v2246_v23  ;;  %v2370_v2 = vmul.f32 1.442695, %v2356_v39  ;;  %v2357_v39 = vmul.f32 %v2345_v0, %v2189_v60 }
 0x71d   :  { %v2259_v29 = vmul.f32 %v4687_v1, %v2247_v35  ;;  %v4719_v35 = vpop.eup %3604  ;;  %v2249_v58 = vadd.f32 -1.4531521, %v2237_v26 }
 0x71e   :  { %v2260_v36 = vmul.f32 %v4696_v52, %v2248_v54  ;;  %v2270_v55 = vadd.f32 1.4214138, %v2258_v62  ;;  %v4725_v3 = vpop.eup %3606  ;;  %v2238_v7 = vmul.f32 1.0614054, %v4719_v35  ;;  %v2372_v4 = vmul.f32 1.442695, %v2357_v39 }
 0x71f   :  { %v2271_v48 = vadd.f32 1.4214138, %v2259_v29  ;;  %v2347_v29 = vsub.f32 0.0, %v4676_v34  ;;  %v2239_v50 = vmul.f32 1.0614054, %v4725_v3  ;;  %v2261_v20 = vmul.f32 %v4713_v42, %v2249_v58 }
 0x720   :  { %v2272_v23 = vadd.f32 1.4214138, %v2260_v36  ;;  %v2282_v54 = vmul.f32 %v4683_v16, %v2270_v55  ;;  %v2216_v36 = vadd.f32 1.0, %v2204_v22  ;;  %v2250_v55 = vadd.f32 -1.4531521, %v2238_v7 }
 0x721   :  { %v2283_v62 = vmul.f32 %v4687_v1, %v2271_v48  ;;  %v2206_v48 = vmul.f32 0.3275911, %v4716_v59  ;;  %v2251_v13 = vadd.f32 -1.4531521, %v2239_v50  ;;  %v2359_v0 = vmul.f32 %v2347_v29, %v4676_v34 }
 0x722   :  { %v2284_v56 = vmul.f32 %v4696_v52, %v2272_v23  ;;  %v2294_v17 = vadd.f32 -0.28449672, %v2282_v54  ;;  %v2262_v60 = vmul.f32 %v4719_v35, %v2250_v55  ;;  %v2273_v23 = vadd.f32 1.4214138, %v2261_v20  ;;  %v3609_v55 = vpop.eup %3608 }
 0x723   :  { %v2295_v46 = vadd.f32 -0.28449672, %v2283_v62  ;;  %v2263_v62 = vmul.f32 %v4725_v3, %v2251_v13  ;;  %3612 = vrcp.f32 %v2216_v36  ;;  %v2218_v40 = vadd.f32 1.0, %v2206_v48  ;;  %v3611_v48 = vpop.eup %3610 }
 0x724   :  { %v2296_v26 = vadd.f32 -0.28449672, %v2284_v56  ;;  %v2274_v7 = vadd.f32 1.4214138, %v2262_v60  ;;  %3614 = vrcp.f32 %v2217_v49  ;;  %v2285_v54 = vmul.f32 %v4713_v42, %v2273_v23 }
 0x725   :  { %v2307_v11 = vmul.f32 %v4687_v1, %v2295_v46  ;;  %v2306_v46 = vmul.f32 %v4683_v16, %v2294_v17  ;;  %v2275_v58 = vadd.f32 1.4214138, %v2263_v62  ;;  %3616 = vpow2.f32 %v2366_v6 }
 0x726   :  { %v2286_v34 = vmul.f32 %v4719_v35, %v2274_v7  ;;  %v2297_v20 = vadd.f32 -0.28449672, %v2285_v54  ;;  %3618 = vpow2.f32 %v2372_v4  ;;  %v2308_v56 = vmul.f32 %v4696_v52, %v2296_v26 }
 0x727   :  { %v2319_v22 = vadd.f32 0.2548296, %v2307_v11  ;;  %v2376_v11 = vmul.f32 1.442695, %v2359_v0  ;;  %v2287_v13 = vmul.f32 %v4725_v3, %v2275_v58  ;;  %3620 = vrcp.f32 %v2218_v40 }
 0x728   :  { %v2298_v49 = vadd.f32 -0.28449672, %v2286_v34  ;;  %v2318_v17 = vadd.f32 0.2548296, %v2306_v46  ;;  %3622 = vpow2.f32 %v2370_v2  ;;  %v2309_v39 = vmul.f32 %v4713_v42, %v2297_v20 }
 0x729   :  { %v2331_v50 = vmul.f32 %v4687_v1, %v2319_v22  ;;  %v2299_v1 = vadd.f32 -0.28449672, %v2287_v13  ;;  %3624 = vpow2.f32 %v2376_v11  ;;  %v2320_v60 = vadd.f32 0.2548296, %v2308_v56 }
 0x72a   :  { %v2310_v5 = vmul.f32 %v4719_v35, %v2298_v49  ;;  %v2321_v36 = vadd.f32 0.2548296, %v2309_v39  ;;  %v2330_v62 = vmul.f32 %v4683_v16, %v2318_v17  ;;  %v4752_v26 = vmul.f32 0.5, %v4634_v53 }
 0x72b   :  { %v2391_v29 = vmul.f32 %v3609_v55, %v2331_v50  ;;  %v2311_v6 = vmul.f32 %v4725_v3, %v2299_v1  ;;  %v2139_v7 = vmul.f32 0.5, %v4636_v51  ;;  %v2071_v16 = vmul.f32 %v4620_v21, %v4554_v63  ;;  %v2092_v55 = vpop.permute.xlu1 %2091 }
 0x72c   :  { %v2322_v4 = vadd.f32 0.2548296, %v2310_v5  ;;  %v2333_v46 = vmul.f32 %v4713_v42, %v2321_v36  ;;  %v2332_v58 = vmul.f32 %v4696_v52, %v2320_v60  ;;  %v2072_v51 = vmul.f32 %v4620_v21, %v4556_v33 }
 0x72d   :  { %v2403_v0 = vsub.f32 1.0, %v2391_v29  ;;  %v4746_v22 = vpop.eup %3612  ;;  %v2323_v2 = vadd.f32 0.2548296, %v2311_v6  ;;  %v2142_v11 = vmul.f32 0.5, %v4653_v30  ;;  %v2073_v56 = vmul.f32 %v4620_v21, %v4570_v57 }
 0x72e   :  { %v4749_v23 = vpop.eup %3614  ;;  %v2334_v40 = vmul.f32 %v4719_v35, %v2322_v4  ;;  %v2240_v20 = vmul.f32 1.0614054, %v4746_v22  ;;  %v2174_v29 = vsel %vm2162_vm10, 1.0, %v5436_v19  ;;  %v2178_v30 = vsel %vm2166_vm2, 1.0, %v5436_v19 }
 0x72f   :  { %v3617_v50 = vpop.eup %3616  ;;  %v2415_v53 = vmul.f32 %v2403_v0, %v2175_v47  ;;  %v2335_v42 = vmul.f32 %v4725_v3, %v2323_v2  ;;  %v2241_v52 = vmul.f32 1.0614054, %v4749_v23  ;;  %v2103_v49 = vmul.f32 %v2092_v55, %v2071_v16  ;;  %v2124_v4 = vpop.permute.xlu1 %2123 }
 0x730   :  { %v2394_v54 = vmul.f32 %v3611_v48, %v2334_v40  ;;  %v3619_v34 = vpop.eup %3618  ;;  %v2390_v35 = vmul.f32 %v3617_v50, %v2330_v62  ;;  %v2104_v6 = vmul.f32 %v2092_v55, %v2072_v51  ;;  %v2105_v21 = vmul.f32 %v2092_v55, %v2073_v56 }
 0x731   :  { %v4768_v13 = vpop.eup %3620  ;;  %v2393_v3 = vmul.f32 %v3619_v34, %v2333_v46  ;;  %v2427_v39 = vadd.f32 1.0, %v2415_v53  ;;  %v2252_v60 = vadd.f32 -1.4531521, %v2240_v20  ;;  %v2253_v0 = vadd.f32 -1.4531521, %v2241_v52 }
 0x732   :  { %v2406_v63 = vsub.f32 1.0, %v2394_v54  ;;  %v3623_v33 = vpop.eup %3622  ;;  %v2402_v36 = vsub.f32 1.0, %v2390_v35  ;;  %v2242_v57 = vmul.f32 1.0614054, %v4768_v13  ;;  %v4783_v62 = vadd.f32 %v2124_v4, %v2103_v49 }
 0x733   :  { %v3625_v17 = vpop.eup %3624  ;;  %v2392_v1 = vmul.f32 %v3623_v33, %v2332_v58  ;;  %v2405_v24 = vsub.f32 1.0, %v2393_v3  ;;  %v4785_v2 = vadd.f32 %v2124_v4, %v2104_v6  ;;  %v2439_v47 = vmul.f32 %v2427_v39, %v2139_v7 }
 0x734   :  { %v2418_v5 = vmul.f32 %v2406_v63, %v2178_v30  ;;  %v2395_v48 = vmul.f32 %v3625_v17, %v2335_v42  ;;  %v4787_v16 = vadd.f32 %v2124_v4, %v2105_v21  ;;  %v2140_v50 = vmul.f32 0.5, %v4638_v12 }
 0x735   :  { %v2404_v40 = vsub.f32 1.0, %v2392_v1  ;;  %v2176_v58 = vsel %vm2164_vm11, 1.0, %v5436_v19  ;;  %v2414_v53 = vmul.f32 %v2402_v36, %v2174_v29  ;;  %v2177_v51 = vsel %vm2165_vm0, 1.0, %v5436_v19 }
 0x736   :  { %v2430_v31 = vadd.f32 1.0, %v2418_v5  ;;  %v2407_v54 = vsub.f32 1.0, %v2395_v48  ;;  %v2254_v55 = vadd.f32 -1.4531521, %v2242_v57  ;;  %v2264_v34 = vmul.f32 %v4746_v22, %v2252_v60 }
 0x737   :  { %v2265_v7 = vmul.f32 %v4749_v23, %v2253_v0  ;;  %v2179_v35 = vsel %vm2167_vm1, 1.0, %v5436_v19  ;;  %v2417_v12 = vmul.f32 %v2405_v24, %v2177_v51  ;;  %v4805_v14 = vmul.f32 0.70710677, %v4785_v2 }
 0x738   :  { %v2442_v46 = vmul.f32 %v2430_v31, %v2142_v11  ;;  %v4802_v11 = vmul.f32 0.70710677, %v4783_v62  ;;  %v2416_v42 = vmul.f32 %v2404_v40, %v2176_v58  ;;  %v4808_v18 = vmul.f32 0.70710677, %v4787_v16 }
 0x739   :  { %v2451_v63 = vmul.f32 %v2439_v47, %v3794_v10  ;;  %v2426_v52 = vadd.f32 1.0, %v2414_v53  ;;  %v2141_v56 = vmul.f32 0.5, %v4651_v9  ;;  %v2419_v33 = vmul.f32 %v2407_v54, %v2179_v35 }
 0x73a   :  { %v2454_v20 = vmul.f32 %v2442_v46, %v3794_v10  ;;  %v2266_v29 = vmul.f32 %v4768_v13, %v2254_v55  ;;  %v2276_v30 = vadd.f32 1.4214138, %v2264_v34  ;;  %v2277_v3 = vadd.f32 1.4214138, %v2265_v7 }
 0x73b   :  { %v2348_v49 = vsub.f32 0.0, %v4705_v41  ;;  %v2429_v17 = vadd.f32 1.0, %v2417_v12  ;;  %v2349_v1 = vsub.f32 0.0, %v4708_v45  ;;  %v2195_v39 = vand.u32 2147483647, %v4802_v11 }
 0x73c   :  { %v2196_v5 = vand.u32 2147483647, %v4805_v14  ;;  %v2428_v6 = vadd.f32 1.0, %v2416_v42  ;;  %v2350_v36 = vsub.f32 0.0, %v4716_v59  ;;  %v2197_v9 = vand.u32 2147483647, %v4808_v18 }
 0x73d   :  { %v2463_v25 = vpack.c.bf16 %v2454_v20, %v2451_v63  ;;  %v2438_v48 = vmul.f32 %v2426_v52, %v4752_v26  ;;  %v2431_v57 = vadd.f32 1.0, %v2419_v33  ;;  %v2207_v21 = vmul.f32 0.3275911, %v2195_v39 }
 0x73e   :  { %v2208_v31 = vmul.f32 0.3275911, %v2196_v5  ;;  %v2278_v60 = vadd.f32 1.4214138, %v2266_v29  ;;  %v2288_v0 = vmul.f32 %v4746_v22, %v2276_v30  ;;  %v2360_v4 = vmul.f32 %v2348_v49, %v4705_v41 }
 0x73f   :  { %v2209_v24 = vmul.f32 0.3275911, %v2197_v9  ;;  %2476 = vrot.lane.b32.xlu1 %v2463_v25, %s3658_s7  ;;  %v2441_v40 = vmul.f32 %v2429_v17, %v2141_v56  ;;  %v2289_v47 = vmul.f32 %v4749_v23, %v2277_v3  ;;  %v2219_v46 = vadd.f32 1.0, %v2207_v21 }
 0x740   :  { %v2220_v58 = vadd.f32 1.0, %v2208_v31  ;;  %v2361_v53 = vmul.f32 %v2349_v1, %v4708_v45  ;;  %v2440_v26 = vmul.f32 %v2428_v6, %v2140_v50  ;;  %v2443_v51 = vmul.f32 %v2431_v57, %v2143_v8 }
 0x741   :  { %v2221_v54 = vadd.f32 1.0, %v2209_v24  ;;  %3626 = vrcp.f32 %v2219_v46  ;;  %v2450_v55 = vmul.f32 %v2438_v48, %v3790_v38  ;;  %v2290_v34 = vmul.f32 %v4768_v13, %v2278_v60 }
 0x742   :  { %v2300_v7 = vadd.f32 -0.28449672, %v2288_v0  ;;  %v2362_v41 = vmul.f32 %v2350_v36, %v4716_v59  ;;  %3628 = vrcp.f32 %v2220_v58  ;;  %v2301_v35 = vadd.f32 -0.28449672, %v2289_v47 }
 0x743   :  { %v2378_v12 = vmul.f32 1.442695, %v2360_v4  ;;  %3630 = vrcp.f32 %v2221_v54  ;;  %v2453_v42 = vmul.f32 %v2441_v40, %v3790_v38  ;;  %v2380_v63 = vmul.f32 1.442695, %v2361_v53 }
 0x744   :  { %v2452_v45 = vmul.f32 %v2440_v26, %v3788_v37  ;;  %v2455_v50 = vmul.f32 %v2443_v51, %v3788_v37  ;;  %v2302_v52 = vadd.f32 -0.28449672, %v2290_v34  ;;  %v2312_v56 = vmul.f32 %v4746_v22, %v2300_v7 }
 0x745   :  { %v2462_v20 = vpack.c.bf16 %v2453_v42, %v2450_v55  ;;  %v2313_v8 = vmul.f32 %v4749_v23, %v2301_v35  ;;  %3632 = vpow2.f32 %v2378_v12  ;;  %v2382_v33 = vmul.f32 1.442695, %v2362_v41 }
 0x746   :  { %v2351_v59 = vsub.f32 0.0, %v2195_v39  ;;  %3634 = vpow2.f32 %v2380_v63  ;;  %v2352_v29 = vsub.f32 0.0, %v2196_v5  ;;  %v2353_v30 = vsub.f32 0.0, %v2197_v9 }
 0x747   :  { %2474 = vrot.lane.b32.xlu0 %v2462_v20, %s3658_s7  ;;  %v2464_v3 = vpack.c.bf16 %v2455_v50, %v2452_v45  ;;  %v2314_v49 = vmul.f32 %v4768_v13, %v2302_v52  ;;  %v2324_v17 = vadd.f32 0.2548296, %v2312_v56  ;;  %v2325_v6 = vadd.f32 0.2548296, %v2313_v8 }
 0x748   :  { %3636 = vpow2.f32 %v2382_v33  ;;  %v2363_v36 = vmul.f32 %v2351_v59, %v2195_v39  ;;  %v2364_v57 = vmul.f32 %v2352_v29, %v2196_v5  ;;  %v2365_v60 = vmul.f32 %v2353_v30, %v2197_v9 }
 0x749   :  { %v2326_v0 = vadd.f32 0.2548296, %v2314_v49  ;;  %v2336_v4 = vmul.f32 %v4746_v22, %v2324_v17  ;;  %v2337_v47 = vmul.f32 %v4749_v23, %v2325_v6  ;;  %vm2168_vm10 = vcmp.ge.f32.partialorder %v4691_v15, 0.0 }
 0x74a   :  { %v2384_v58 = vmul.f32 1.442695, %v2363_v36  ;;  %v2386_v39 = vmul.f32 1.442695, %v2364_v57  ;;  %v2388_v55 = vmul.f32 1.442695, %v2365_v60 }
 0x74b   :  { %v3627_v1 = vpop.eup %3626  ;;  %2478 = vrot.lane.b32.xlu0 %v2464_v3, %s3658_s7  ;;  %v2338_v5 = vmul.f32 %v4768_v13, %v2326_v0  ;;  %vm2169_vm2 = vcmp.ge.f32.partialorder %v4694_v28, 0.0  ;;  %vm2170_vm11 = vcmp.ge.f32.partialorder %v4701_v44, 0.0  ;;  %v2180_v59 = vsel %vm2168_vm10, 1.0, %v5436_v19 }
 0x74c   :  { %v3629_v25 = vpop.eup %3628  ;;  %v2243_v48 = vmul.f32 1.0614054, %v3627_v1  ;;  %3638 = vpow2.f32 %v2384_v58  ;;  %v2181_v29 = vsel %vm2169_vm2, 1.0, %v5436_v19  ;;  %vm2171_vm0 = vcmp.ge.f32.partialorder %v4802_v11, 0.0 }
 0x74d   :  { %v3631_v21 = vpop.eup %3630  ;;  %v2244_v31 = vmul.f32 1.0614054, %v3629_v25  ;;  %3640 = vpow2.f32 %v2386_v39  ;;  %vm2172_vm1 = vcmp.ge.f32.partialorder %v4805_v14, 0.0  ;;  %vm2173_vm10 = vcmp.ge.f32.partialorder %v4808_v18, 0.0 }
 0x74e   :  { %v2245_v24 = vmul.f32 1.0614054, %v3631_v21  ;;  %v2255_v40 = vadd.f32 -1.4531521, %v2243_v48  ;;  %3642 = vpow2.f32 %v2388_v55  ;;  %v2145_v39 = vmul.f32 0.5, %v4681_v61 }
 0x74f   :  { %v2256_v46 = vadd.f32 -1.4531521, %v2244_v31  ;;  %v3633_v26 = vpop.eup %3632  ;;  %v2182_v31 = vsel %vm2170_vm11, 1.0, %v5436_v19  ;;  %v2185_v18 = vsel %vm2173_vm10, 1.0, %v5436_v19  ;;  %v2147_v61 = vmul.f32 0.5, %v4783_v62 }
 0x750   :  { %v2257_v53 = vadd.f32 -1.4531521, %v2245_v24  ;;  %v2267_v54 = vmul.f32 %v3627_v1, %v2255_v40  ;;  %v3635_v34 = vpop.eup %3634  ;;  %v2396_v7 = vmul.f32 %v3633_v26, %v2336_v4  ;;  %v2149_v14 = vmul.f32 0.5, %v4787_v16 }
 0x751   :  { %v2268_v51 = vmul.f32 %v3629_v25, %v2256_v46  ;;  %v2397_v35 = vmul.f32 %v3635_v34, %v2337_v47 }
 0x752   :  { %v2269_v9 = vmul.f32 %v3631_v21, %v2257_v53  ;;  %v2279_v41 = vadd.f32 1.4214138, %v2267_v54  ;;  %v3637_v23 = vpop.eup %3636  ;;  %v2408_v45 = vsub.f32 1.0, %v2396_v7  ;;  %v2144_v53 = vmul.f32 0.5, %v4679_v27 }
 0x753   :  { %v2280_v22 = vadd.f32 1.4214138, %v2268_v51  ;;  %v2398_v20 = vmul.f32 %v3637_v23, %v2338_v5  ;;  %v2409_v52 = vsub.f32 1.0, %v2397_v35  ;;  %v2148_v35 = vmul.f32 0.5, %v4785_v2 }
 0x754   :  { %v2281_v12 = vadd.f32 1.4214138, %v2269_v9  ;;  %v2291_v42 = vmul.f32 %v3627_v1, %v2279_v41  ;;  %v2420_v3 = vmul.f32 %v2408_v45, %v2180_v59  ;;  %v2146_v9 = vmul.f32 0.5, %v4685_v32 }
 0x755   :  { %v2292_v63 = vmul.f32 %v3629_v25, %v2280_v22  ;;  %v2410_v15 = vsub.f32 1.0, %v2398_v20  ;;  %v2421_v17 = vmul.f32 %v2409_v52, %v2181_v29 }
 0x756   :  { %v2293_v50 = vmul.f32 %v3631_v21, %v2281_v12  ;;  %v2303_v13 = vadd.f32 -0.28449672, %v2291_v42  ;;  %v3639_v57 = vpop.eup %3638  ;;  %v2432_v4 = vadd.f32 1.0, %v2420_v3 }
 0x757   :  { %v2304_v56 = vadd.f32 -0.28449672, %v2292_v63  ;;  %v3641_v60 = vpop.eup %3640  ;;  %v2422_v0 = vmul.f32 %v2410_v15, %v2182_v31  ;;  %v2433_v46 = vadd.f32 1.0, %v2421_v17 }
 0x758   :  { %v2305_v8 = vadd.f32 -0.28449672, %v2293_v50  ;;  %v2315_v33 = vmul.f32 %v3627_v1, %v2303_v13  ;;  %v3643_v47 = vpop.eup %3642  ;;  %v2444_v55 = vmul.f32 %v2432_v4, %v2144_v53 }
 0x759   :  { %v2316_v30 = vmul.f32 %v3629_v25, %v2304_v56  ;;  %v2434_v51 = vadd.f32 1.0, %v2422_v0  ;;  %v2445_v27 = vmul.f32 %v2433_v46, %v2145_v39  ;;  %v1468_v0 = vmul.f32 %v4494_v43, %v3788_v37 }
 0x75a   :  { %v2317_v28 = vmul.f32 %v3631_v21, %v2305_v8  ;;  %v2327_v49 = vadd.f32 0.2548296, %v2315_v33  ;;  %v2456_v63 = vmul.f32 %v2444_v55, %v3790_v38 }
 0x75b   :  { %v2328_v6 = vadd.f32 0.2548296, %v2316_v30  ;;  %v2446_v12 = vmul.f32 %v2434_v51, %v2146_v9 }
 0x75c   :  { %v2329_v36 = vadd.f32 0.2548296, %v2317_v28  ;;  %v2339_v48 = vmul.f32 %v3627_v1, %v2327_v49 }
 0x75d   :  { %v2340_v44 = vmul.f32 %v3629_v25, %v2328_v6  ;;  %v2183_v25 = vsel %vm2171_vm0, 1.0, %v5436_v19  ;;  %v2458_v13 = vmul.f32 %v2446_v12, %v3788_v37 }
 0x75e   :  { %v2341_v24 = vmul.f32 %v3631_v21, %v2329_v36  ;;  %v2399_v40 = vmul.f32 %v3639_v57, %v2339_v48  ;;  %v2184_v21 = vsel %vm2172_vm1, 1.0, %v5436_v19  ;;  %v2457_v19 = vmul.f32 %v2445_v27, %v3794_v10  ;;  %v3538_v57 = vld [vmem:[%s5399_s4 + $0x4] ss:$12 sps:$4 sm:$0xff]  }
 0x75f   :  { %v2400_v58 = vmul.f32 %v3641_v60, %v2340_v44  ;;  %2980 = vmatprep.mubr.bf16.mxu0 %v3538_v57  ;;  %2874 = vmatprep.mubr.bf16.mxu1 %v3538_v57 }
 0x760   :  { %v2401_v1 = vmul.f32 %v3643_v47, %v2341_v24  ;;  %v2411_v54 = vsub.f32 1.0, %v2399_v40  ;;  %v1479_v24 = vsel %vm365_vm12, %v1468_v0, 0.0  ;;  %v5466_v47 = vld [vmem:[#allocation5_spill] sm:$0xff] }
 0x761   :  { %v2412_v26 = vsub.f32 1.0, %v2400_v58  ;;  %v1480_v46 = vadd.f32 %v1479_v24, %v5466_v47 }
 0x762   :  { %v2413_v34 = vsub.f32 1.0, %v2401_v1  ;;  %v2423_v5 = vmul.f32 %v2411_v54, %v2183_v25 }
 0x763   :  { %v2424_v7 = vmul.f32 %v2412_v26, %v2184_v21  ;;  %v5467_v21 = vld [vmem:[#allocation14_spill] sm:$0xff] }
 0x764   :  { %v2425_v41 = vmul.f32 %v2413_v34, %v2185_v18  ;;  %v2435_v11 = vadd.f32 1.0, %v2423_v5  ;;  %v1471_v26 = vmul.f32 %v5467_v21, %v3788_v37  ;;  %v5468_v34 = vld [vmem:[#allocation7_spill] sm:$0xff] }
 0x765   :  { %v2436_v22 = vadd.f32 1.0, %v2424_v7  ;;  %v1474_v5 = vmul.f32 %v5468_v34, %v3788_v37 }
 0x766   :  { %v2437_v42 = vadd.f32 1.0, %v2425_v41  ;;  %v2447_v23 = vmul.f32 %v2435_v11, %v2147_v61  ;;  %v1484_v27 = vsel %vm365_vm12, %v1471_v26, 0.0  ;;  %v5469_v61 = vld [vmem:[#allocation9_spill] sm:$0xff] }
 0x767   :  { %v2448_v20 = vmul.f32 %v2436_v22, %v2148_v35  ;;  %v1485_v41 = vadd.f32 %v1484_v27, %v5469_v61  ;;  %v1489_v11 = vsel %vm365_vm12, %v1474_v5, 0.0  ;;  %v5470_v35 = vld [vmem:[#allocation6_spill] sm:$0xff] }
 0x768   :  { %v2449_v45 = vmul.f32 %v2437_v42, %v2149_v14  ;;  %v2459_v32 = vmul.f32 %v2447_v23, %v3790_v38  ;;  %v1477_v14 = vmul.f32 %v5470_v35, %v3788_v37  ;;  %v5471_v42 = vld [vmem:[#allocation18_spill] sm:$0xff] }
 0x769   :  { %v2460_v62 = vmul.f32 %v2448_v20, %v3794_v10  ;;  %v1490_v23 = vadd.f32 %v1489_v11, %v5471_v42 }
 0x76a   :  { %v2465_v50 = vpack.c.bf16 %v2459_v32, %v2456_v63  ;;  %v2461_v2 = vmul.f32 %v2449_v45, %v3788_v37  ;;  %v1494_v63 = vsel %vm365_vm12, %v1477_v14, 0.0  ;;  %v5472_v32 = vld [vmem:[#allocation19_spill] sm:$0xff] }
 0x76b   :  { %v2466_v16 = vpack.c.bf16 %v2460_v62, %v2457_v19  ;;  %v1495_v62 = vadd.f32 %v1494_v63, %v5472_v32 }
 0x76c   :  { %2480 = vrot.lane.b32.xlu1 %v2465_v50, %s3658_s7  ;;  %v2467_v52 = vpack.c.bf16 %v2461_v2, %v2458_v13 }
 0x76d   :  { %2482 = vrot.lane.b32.xlu0 %v2466_v16, %s3658_s7 }
 0x770   :  { %2484 = vrot.lane.b32.xlu1 %v2467_v52, %s3658_s7 }
 0x7b1   :  { %v2477_v56 = vpop.permute.xlu1 %2476 }
 0x7b9   :  { %v2475_v8 = vpop.permute.xlu0 %2474 }
 0x7ba   :  { %2496 = vst.msk [vmem:[#allocation2] sm:$0xff] %vm898_vm15, %v2475_v8  ;;  %v2486_v33 = vsel %vm31_vm14, %v2475_v8, %v2477_v56 }
 0x7bb   :  { %2842 = vmatprep.subr.bf16.mxu1 %v2486_v33 }
 0x7bd   :  { %v2479_v59 = vpop.permute.xlu0 %2478 }
 0x7be   :  { %v2487_v29 = vsel %vm31_vm14, %v2477_v56, %v2479_v59 }
 0x7bf   :  { %2498 = vst.msk [vmem:[#allocation2 + $0x10] sm:$0xff] %vm901_vm13, %v2487_v29 }
 0x7c1   :  { %v2502_v30 = vld [vmem:[#allocation2] sm:$0xff] }
 0x7c2   :  { %2520 = vrot.lane.b32.xlu0 %v2502_v30, %s3649_s30  ;;  %2843 = vmatpush1.bf16.msra.mxu1 %v2502_v30 }
 0x7c6   :  { %2548 = vrot.lane.b32.xlu0 %v2502_v30, %s3650_s9  ;;  %v2504_v15 = vld [vmem:[#allocation2 + $0x10] sm:$0xff] }
 0x7c7   :  { %2510 = vst.msk [vmem:[#allocation4 + $0x10] sm:$0xff] %vm365_vm12, %v2504_v15 }
 0x7ca   :  { %2576 = vrot.lane.b32.xlu0 %v2502_v30, %s3648_s29 }
 0x7ce   :  { %2604 = vrot.lane.b32.xlu0 %v2502_v30, %s3652_s11 }
 0x7d2   :  { %2632 = vrot.lane.b32.xlu0 %v2502_v30, %s3651_s10 }
 0x7d6   :  { %2660 = vrot.lane.b32.xlu0 %v2502_v30, %s3654_s13 }
 0x7da   :  { %2688 = vrot.lane.b32.xlu0 %v2502_v30, %s3653_s12 }
 0x7de   :  { %v2481_v3 = vpop.permute.xlu1 %2480  ;;  %2522 = vrot.lane.b32.xlu0 %v2486_v33, %s3649_s30 }
 0x7df   :  { %2499 = vst.msk [vmem:[#allocation2 + $0x18] sm:$0xff] %vm898_vm15, %v2481_v3  ;;  %v2483_v28 = vpop.permute.xlu0 %2482 }
 0x7e0   :  { %v2488_v49 = vsel %vm31_vm14, %v2481_v3, %v2483_v28 }
 0x7e1   :  { %2844 = vmatprep.subr.bf16.mxu1 %v2488_v49 }
 0x7e2   :  { %v2485_v17 = vpop.permute.xlu1 %2484 }
 0x7e3   :  { %v2489_v6 = vsel %vm31_vm14, %v2483_v28, %v2485_v17 }
 0x7e4   :  { %2501 = vst.msk [vmem:[#allocation2 + $0x28] sm:$0xff] %vm901_vm13, %v2489_v6 }
 0x7e6   :  { %v2505_v36 = vld [vmem:[#allocation2 + $0x18] sm:$0xff] }
 0x7e7   :  { %2526 = vrot.lane.b32.xlu1 %v2505_v36, %s3649_s30  ;;  %2845 = vmatpush1.bf16.msra.mxu1 %v2505_v36 }
 0x7eb   :  { %2554 = vrot.lane.b32.xlu1 %v2505_v36, %s3650_s9  ;;  %v2507_v48 = vld [vmem:[#allocation2 + $0x28] sm:$0xff] }
 0x7ec   :  { %2530 = vrot.lane.b32.xlu0 %v2507_v48, %s3649_s30  ;;  %2513 = vst.msk [vmem:[#allocation4 + $0x28] sm:$0xff] %vm365_vm12, %v2507_v48 }
 0x7ef   :  { %2582 = vrot.lane.b32.xlu1 %v2505_v36, %s3648_s29 }
 0x7f0   :  { %2550 = vrot.lane.b32.xlu0 %v2486_v33, %s3650_s9 }
 0x7f3   :  { %2610 = vrot.lane.b32.xlu1 %v2505_v36, %s3652_s11 }
 0x7f4   :  { %2558 = vrot.lane.b32.xlu0 %v2507_v48, %s3650_s9 }
 0x7f7   :  { %2638 = vrot.lane.b32.xlu1 %v2505_v36, %s3651_s10 }
 0x7f8   :  { %2578 = vrot.lane.b32.xlu0 %v2486_v33, %s3648_s29 }
 0x7fb   :  { %2666 = vrot.lane.b32.xlu1 %v2505_v36, %s3654_s13 }
 0x7fc   :  { %2586 = vrot.lane.b32.xlu0 %v2507_v48, %s3648_s29 }
 0x7ff   :  { %2524 = vrot.lane.b32.xlu1 %v2504_v15, %s3649_s30 }
 0x800   :  { %2606 = vrot.lane.b32.xlu0 %v2486_v33, %s3652_s11 }
 0x803   :  { %2528 = vrot.lane.b32.xlu1 %v2488_v49, %s3649_s30 }
 0x804   :  { %2614 = vrot.lane.b32.xlu0 %v2507_v48, %s3652_s11 }
 0x807   :  { %2552 = vrot.lane.b32.xlu1 %v2504_v15, %s3650_s9 }
 0x808   :  { %2634 = vrot.lane.b32.xlu0 %v2486_v33, %s3651_s10 }
 0x80b   :  { %2556 = vrot.lane.b32.xlu1 %v2488_v49, %s3650_s9 }
 0x80c   :  { %2642 = vrot.lane.b32.xlu0 %v2507_v48, %s3651_s10 }
 0x80f   :  { %2580 = vrot.lane.b32.xlu1 %v2504_v15, %s3648_s29 }
 0x810   :  { %2662 = vrot.lane.b32.xlu0 %v2486_v33, %s3654_s13 }
 0x813   :  { %2584 = vrot.lane.b32.xlu1 %v2488_v49, %s3648_s29 }
 0x814   :  { %2670 = vrot.lane.b32.xlu0 %v2507_v48, %s3654_s13 }
 0x817   :  { %2608 = vrot.lane.b32.xlu1 %v2504_v15, %s3652_s11 }
 0x818   :  { %2690 = vrot.lane.b32.xlu0 %v2486_v33, %s3653_s12 }
 0x81b   :  { %2612 = vrot.lane.b32.xlu1 %v2488_v49, %s3652_s11 }
 0x81c   :  { %2698 = vrot.lane.b32.xlu0 %v2507_v48, %s3653_s12 }
 0x81f   :  { %2636 = vrot.lane.b32.xlu1 %v2504_v15, %s3651_s10 }
 0x820   :  { %2716 = vrot.lane.b32.xlu0 %v2502_v30, %s3655_s14 }
 0x823   :  { %2640 = vrot.lane.b32.xlu1 %v2488_v49, %s3651_s10 }
 0x824   :  { %2718 = vrot.lane.b32.xlu0 %v2486_v33, %s3655_s14 }
 0x827   :  { %2664 = vrot.lane.b32.xlu1 %v2504_v15, %s3654_s13 }
 0x828   :  { %2726 = vrot.lane.b32.xlu0 %v2507_v48, %s3655_s14 }
 0x82b   :  { %2668 = vrot.lane.b32.xlu1 %v2488_v49, %s3654_s13 }
 0x82f   :  { %2692 = vrot.lane.b32.xlu1 %v2504_v15, %s3653_s12 }
 0x833   :  { %2696 = vrot.lane.b32.xlu1 %v2488_v49, %s3653_s12 }
 0x834   :  { %v2521_v31 = vpop.permute.xlu0 %2520 }
 0x837   :  { %2694 = vrot.lane.b32.xlu1 %v2505_v36, %s3653_s12 }
 0x838   :  { %v2549_v44 = vpop.permute.xlu0 %2548 }
 0x83b   :  { %2720 = vrot.lane.b32.xlu1 %v2504_v15, %s3655_s14 }
 0x83c   :  { %v2577_v60 = vpop.permute.xlu0 %2576 }
 0x83f   :  { %2724 = vrot.lane.b32.xlu1 %v2488_v49, %s3655_s14 }
 0x840   :  { %v2605_v4 = vpop.permute.xlu0 %2604 }
 0x843   :  { %2722 = vrot.lane.b32.xlu1 %v2505_v36, %s3655_s14 }
 0x844   :  { %v2633_v40 = vpop.permute.xlu0 %2632 }
 0x847   :  { %1481 = vadd.xlane.f32.xlu0 %v1480_v46 }
 0x848   :  { %v4937_v58 = vpop.permute.xlu0 %2660 }
 0x84c   :  { %v4939_v53 = vpop.permute.xlu0 %2688 }
 0x850   :  { %v2523_v1 = vpop.permute.xlu0 %2522 }
 0x851   :  { %v2532_v54 = vsel %vm56_vm4, %v2521_v31, %v2523_v1 }
 0x859   :  { %v2527_v39 = vpop.permute.xlu1 %2526 }
 0x85d   :  { %v2555_v25 = vpop.permute.xlu1 %2554 }
 0x85e   :  { %v2531_v51 = vpop.permute.xlu0 %2530 }
 0x85f   :  { %2547 = vst.msk [vmem:[#allocation4 + $0x58] sm:$0xff] %vm365_vm12, %v2531_v51 }
 0x861   :  { %v2583_v55 = vpop.permute.xlu1 %2582 }
 0x862   :  { %v2551_v18 = vpop.permute.xlu0 %2550 }
 0x863   :  { %v2560_v7 = vsel %vm72_vm5, %v2549_v44, %v2551_v18 }
 0x865   :  { %v4949_v9 = vpop.permute.xlu1 %2610 }
 0x866   :  { %v2559_v22 = vpop.permute.xlu0 %2558  ;;  %v2763_v32 = vld [vmem:[#allocation4 + $0x58] sm:$0xff] }
 0x867   :  { %1486 = vadd.xlane.f32.xlu1 %v1485_v41  ;;  %2575 = vst.msk [vmem:[#allocation4 + $0x88] sm:$0xff] %vm365_vm12, %v2559_v22 }
 0x869   :  { %v4956_v12 = vpop.permute.xlu1 %2638 }
 0x86a   :  { %v2579_v20 = vpop.permute.xlu0 %2578 }
 0x86b   :  { %1491 = vadd.xlane.f32.xlu1 %v1490_v23  ;;  %v2588_v19 = vsel %vm87_vm3, %v2577_v60, %v2579_v20 }
 0x86d   :  { %v4961_v45 = vpop.permute.xlu1 %2666 }
 0x86e   :  { %v2587_v50 = vpop.permute.xlu0 %2586 }
 0x86f   :  { %1496 = vadd.xlane.f32.xlu1 %v1495_v62  ;;  %2603 = vst.msk [vmem:[#allocation4 + $0xb8] sm:$0xff] %vm365_vm12, %v2587_v50 }
 0x871   :  { %v2525_v13 = vpop.permute.xlu1 %2524 }
 0x872   :  { %v2533_v2 = vsel %vm56_vm4, %v2523_v1, %v2525_v13  ;;  %2544 = vst.msk [vmem:[#allocation4 + $0x40] sm:$0xff] %vm365_vm12, %v2525_v13  ;;  %v2607_v16 = vpop.permute.xlu0 %2606 }
 0x873   :  { %2846 = vmatprep.subr.bf16.mxu1 %v2533_v2  ;;  %v2616_v52 = vsel %vm102_vm7, %v2605_v4, %v2607_v16 }
 0x874   :  { %2847 = vmatpush1.bf16.msra.mxu1 %v2532_v54 }
 0x875   :  { %v2529_v56 = vpop.permute.xlu1 %2528 }
 0x876   :  { %v2534_v8 = vsel %vm56_vm4, %v2527_v39, %v2529_v56  ;;  %v2535_v33 = vsel %vm56_vm4, %v2529_v56, %v2531_v51  ;;  %v2615_v59 = vpop.permute.xlu0 %2614  ;;  %v2769_v56 = vld [vmem:[#allocation4 + $0x88] sm:$0xff] }
 0x877   :  { %2848 = vmatprep.subr.bf16.mxu1 %v2535_v33  ;;  %2631 = vst.msk [vmem:[#allocation4 + $0xe8] sm:$0xff] %vm365_vm12, %v2615_v59 }
 0x878   :  { %2849 = vmatpush1.bf16.msra.mxu1 %v2534_v8 }
 0x879   :  { %v2553_v29 = vpop.permute.xlu1 %2552  ;;  %v2760_v23 = vld [vmem:[#allocation4 + $0x40] sm:$0xff] }
 0x87a   :  { %v2561_v30 = vsel %vm72_vm5, %v2551_v18, %v2553_v29  ;;  %2572 = vst.msk [vmem:[#allocation4 + $0x70] sm:$0xff] %vm365_vm12, %v2553_v29  ;;  %v2635_v15 = vpop.permute.xlu0 %2634 }
 0x87b   :  { %2850 = vmatprep.subr.bf16.mxu1 %v2561_v30  ;;  %v2644_v3 = vsel %vm117_vm6, %v2633_v40, %v2635_v15 }
 0x87c   :  { %2851 = vmatpush1.bf16.msra.mxu1 %v2560_v7 }
 0x87d   :  { %v2557_v28 = vpop.permute.xlu1 %2556 }
 0x87e   :  { %v2562_v49 = vsel %vm72_vm5, %v2555_v25, %v2557_v28  ;;  %v2563_v17 = vsel %vm72_vm5, %v2557_v28, %v2559_v22  ;;  %v2643_v6 = vpop.permute.xlu0 %2642  ;;  %v2781_v51 = vld [vmem:[#allocation4 + $0xe8] sm:$0xff] }
 0x87f   :  { %2852 = vmatprep.subr.bf16.mxu1 %v2563_v17  ;;  %2659 = vst.msk [vmem:[#allocation4 + $0x118] sm:$0xff] %vm365_vm12, %v2643_v6  ;;  %v2775_v17 = vld [vmem:[#allocation4 + $0xb8] sm:$0xff] }
 0x880   :  { %2853 = vmatpush1.bf16.msra.mxu1 %v2562_v49 }
 0x881   :  { %v2581_v36 = vpop.permute.xlu1 %2580 }
 0x882   :  { %v2589_v48 = vsel %vm87_vm3, %v2579_v20, %v2581_v36  ;;  %2600 = vst.msk [vmem:[#allocation4 + $0xa0] sm:$0xff] %vm365_vm12, %v2581_v36  ;;  %v2663_v57 = vpop.permute.xlu0 %2662 }
 0x883   :  { %2854 = vmatprep.subr.bf16.mxu1 %v2589_v48  ;;  %v2672_v31 = vsel %vm132_vm9, %v4937_v58, %v2663_v57  ;;  %v3541_v48 = vld [vmem:[%s5399_s4 + $0x18] ss:$12 sps:$4 sm:$0xff]  }
 0x884   :  { %2855 = vmatpush1.bf16.msra.mxu1 %v2588_v19 }
 0x885   :  { %v2585_v44 = vpop.permute.xlu1 %2584 }
 0x886   :  { %v2590_v60 = vsel %vm87_vm3, %v2583_v55, %v2585_v44  ;;  %v2591_v0 = vsel %vm87_vm3, %v2585_v44, %v2587_v50  ;;  %v2671_v4 = vpop.permute.xlu0 %2670  ;;  %vm5473_vm3 = vcmask 736256   ;;  %v2787_v22 = vld [vmem:[#allocation4 + $0x118] sm:$0xff] }
 0x887   :  { %2856 = vmatprep.subr.bf16.mxu1 %v2591_v0  ;;  %2687 = vst.msk [vmem:[#allocation4 + $0x148] sm:$0xff] %vm365_vm12, %v2671_v4  ;;  %vm5474_vm4 = vmmov %vm5473_vm3  ;;  %v5477_v0 = vmov 0  }
 0x888   :  { %2857 = vmatpush1.bf16.msra.mxu1 %v2590_v60  ;;  %vm5475_vm5 = vmmov %vm5473_vm3 }
 0x889   :  { %v2609_v24 = vpop.permute.xlu1 %2608  ;;  %v2772_v30 = vld [vmem:[#allocation4 + $0xa0] sm:$0xff] }
 0x88a   :  { %v2617_v40 = vsel %vm102_vm7, %v2607_v16, %v2609_v24  ;;  %2628 = vst.msk [vmem:[#allocation4 + $0xd0] sm:$0xff] %vm365_vm12, %v2609_v24  ;;  %v2691_v47 = vpop.permute.xlu0 %2690  ;;  %v2766_v16 = vld [vmem:[#allocation4 + $0x70] sm:$0xff]  ;;  %v3543_v24 = vld [vmem:[%s5399_s4 + $0x20] ss:$12 sps:$4 sm:$0xff]  }
 0x88b   :  { %2858 = vmatprep.subr.bf16.mxu1 %v2617_v40  ;;  %v2700_v46 = vsel %vm147_vm8, %v4939_v53, %v2691_v47  ;;  %v2754_v53 = vld [vmem:[#allocation4 + $0x10] sm:$0xff] }
 0x88c   :  { %2859 = vmatpush1.bf16.msra.mxu1 %v2616_v52 }
 0x88d   :  { %v2613_v58 = vpop.permute.xlu1 %2612 }
 0x88e   :  { %v2618_v1 = vsel %vm102_vm7, %v4949_v9, %v2613_v58  ;;  %v2619_v54 = vsel %vm102_vm7, %v2613_v58, %v2615_v59  ;;  %v2699_v39 = vpop.permute.xlu0 %2698  ;;  %v2757_v9 = vld [vmem:[#allocation4 + $0x28] sm:$0xff] }
 0x88f   :  { %2860 = vmatprep.subr.bf16.mxu1 %v2619_v54  ;;  %2715 = vst.msk [vmem:[#allocation4 + $0x178] sm:$0xff] %vm365_vm12, %v2699_v39  ;;  %v2793_v13 = vld [vmem:[#allocation4 + $0x148] sm:$0xff] }
 0x890   :  { %2861 = vmatpush1.bf16.msra.mxu1 %v2618_v1 }
 0x891   :  { %v2637_v25 = vpop.permute.xlu1 %2636  ;;  %v2778_v26 = vld [vmem:[#allocation4 + $0xd0] sm:$0xff] }
 0x892   :  { %v2645_v55 = vsel %vm117_vm6, %v2635_v15, %v2637_v25  ;;  %2656 = vst.msk [vmem:[#allocation4 + $0x100] sm:$0xff] %vm365_vm12, %v2637_v25  ;;  %3346 = vmatprep.subr.bf16.mxu0 %v2778_v26  ;;  %v2717_v5 = vpop.permute.xlu0 %2716  ;;  %v3536_v15 = vld [vmem:[%s5399_s4] ss:$12 sps:$4 sm:$0xff]  }
 0x893   :  { %3347 = vmatpush3.bf16.msra.mxu0 %v2754_v53  ;;  %2862 = vmatprep.subr.bf16.mxu1 %v2645_v55 }
 0x894   :  { %3348 = vmatprep.subr.bf16.mxu0 %v2781_v51  ;;  %2863 = vmatpush1.bf16.msra.mxu1 %v2644_v3  ;;  %v3539_v3 = vld [vmem:[%s5399_s4 + $0x1c] ss:$12 sps:$4 sm:$0xff]  }
 0x895   :  { %v2641_v27 = vpop.permute.xlu1 %2640 }
 0x896   :  { %v2646_v18 = vsel %vm117_vm6, %v4956_v12, %v2641_v27  ;;  %v2647_v7 = vsel %vm117_vm6, %v2641_v27, %v2643_v6  ;;  %v2719_v61 = vpop.permute.xlu0 %2718  ;;  %v2799_v59 = vld [vmem:[#allocation4 + $0x178] sm:$0xff]  ;;  %vm5476_vm6 = vmmov %vm5473_vm3 }
 0x897   :  { %3349 = vmatpush3.bf16.msra.mxu0 %v2757_v9  ;;  %2864 = vmatprep.subr.bf16.mxu1 %v2647_v7  ;;  %v2728_v41 = vsel %vm5473_vm3, %v2717_v5, %v2719_v61  ;;  %v5479_v9 = vld [vmem:[#allocation11_spill] sm:$0xff] }
 0x898   :  { %2865 = vmatpush1.bf16.msra.mxu1 %v2646_v18  ;;  %v5478_v18 = vld [vmem:[#allocation8_spill] sm:$0xff] }
 0x899   :  { %v2665_v11 = vpop.permute.xlu1 %2664  ;;  %v2784_v14 = vld [vmem:[#allocation4 + $0x100] sm:$0xff] }
 0x89a   :  { %v2673_v42 = vsel %vm132_vm9, %v2663_v57, %v2665_v11  ;;  %2684 = vst.msk [vmem:[#allocation4 + $0x130] sm:$0xff] %vm365_vm12, %v2665_v11  ;;  %3350 = vmatprep.subr.bf16.mxu0 %v2784_v14  ;;  %v2727_v63 = vpop.permute.xlu0 %2726  ;;  %v5480_v11 = vld [vmem:[#allocation13_spill] sm:$0xff] }
 0x89b   :  { %3351 = vmatpush3.bf16.msra.mxu0 %v2760_v23  ;;  %2866 = vmatprep.subr.bf16.mxu1 %v2673_v42  ;;  %2743 = vst.msk [vmem:[#allocation4 + $0x1a8] sm:$0xff] %vm365_vm12, %v2727_v63 }
 0x89c   :  { %3352 = vmatprep.subr.bf16.mxu0 %v2787_v22  ;;  %2867 = vmatpush1.bf16.msra.mxu1 %v2672_v31  ;;  %v5481_v22 = vld [vmem:[#allocation15_spill] sm:$0xff] }
 0x89d   :  { %v2669_v12 = vpop.permute.xlu1 %2668 }
 0x89e   :  { %v2674_v20 = vsel %vm132_vm9, %v4961_v45, %v2669_v12  ;;  %v2675_v19 = vsel %vm132_vm9, %v2669_v12, %v2671_v4  ;;  %v3542_v4 = vld [vmem:[%s5399_s4 + $0x8] ss:$12 sps:$4 sm:$0xff]  }
 0x89f   :  { %3353 = vmatpush3.bf16.msra.mxu0 %v2763_v32  ;;  %2868 = vmatprep.subr.bf16.mxu1 %v2675_v19 }
 0x8a0   :  { %2869 = vmatpush1.bf16.msra.mxu1 %v2674_v20  ;;  %v5483_v20 = vld [vmem:[#allocation12_spill] sm:$0xff] }
 0x8a1   :  { %v2693_v62 = vpop.permute.xlu1 %2692  ;;  %v2790_v50 = vld [vmem:[#allocation4 + $0x130] sm:$0xff] }
 0x8a2   :  { %v2701_v2 = vsel %vm147_vm8, %v2691_v47, %v2693_v62  ;;  %2712 = vst.msk [vmem:[#allocation4 + $0x160] sm:$0xff] %vm365_vm12, %v2693_v62  ;;  %3354 = vmatprep.subr.bf16.mxu0 %v2790_v50  ;;  %v2805_v44 = vld [vmem:[#allocation4 + $0x1a8] sm:$0xff] }
 0x8a3   :  { %3355 = vmatpush3.bf16.msra.mxu0 %v2766_v16  ;;  %2870 = vmatprep.subr.bf16.mxu1 %v2701_v2 }
 0x8a4   :  { %3356 = vmatprep.subr.bf16.mxu0 %v2793_v13  ;;  %2871 = vmatpush1.bf16.msra.mxu1 %v2700_v46 }
 0x8a5   :  { %v2697_v45 = vpop.permute.xlu1 %2696 }
 0x8a6   :  { %v2703_v52 = vsel %vm147_vm8, %v2697_v45, %v2699_v39 }
 0x8a7   :  { %3357 = vmatpush3.bf16.msra.mxu0 %v2769_v56  ;;  %2872 = vmatprep.subr.bf16.mxu1 %v2703_v52 }
 0x8a9   :  { %v2695_v8 = vpop.permute.xlu1 %2694  ;;  %v2796_v33 = vld [vmem:[#allocation4 + $0x160] sm:$0xff] }
 0x8aa   :  { %v2702_v29 = vsel %vm147_vm8, %v2695_v8, %v2697_v45  ;;  %3358 = vmatprep.subr.bf16.mxu0 %v2796_v33 }
 0x8ab   :  { %3359 = vmatpush3.bf16.msra.mxu0 %v2772_v30  ;;  %2873 = vmatpush1.bf16.msra.mxu1 %v2702_v29  ;;  %v5484_v29 = vld [vmem:[#allocation16_spill] sm:$0xff] }
 0x8ac   :  { %3360 = vmatprep.subr.bf16.mxu0 %v2799_v59 }
 0x8ad   :  { %v2721_v28 = vpop.permute.xlu1 %2720 }
 0x8ae   :  { %v2729_v49 = vsel %vm5474_vm4, %v2719_v61, %v2721_v28  ;;  %2740 = vst.msk [vmem:[#allocation4 + $0x190] sm:$0xff] %vm365_vm12, %v2721_v28  ;;  %2875 = vmatmul.mubr.bf16.vlgmr.msra.gmra.mrb[20].mxu1 %v3536_v15  ;;  %v5485_v28 = vld [vmem:[#allocation17_spill] sm:$0xff] }
 0x8af   :  { %3361 = vmatpush3.bf16.msra.mxu0 %v2775_v17  ;;  %2895 = vmatprep.subr.bf16.mxu1 %v2729_v49 }
 0x8b0   :  { %2896 = vmatpush1.bf16.msra.mxu1 %v2728_v41  ;;  %2884 = vmatprep.mubr.bf16.mxu1 %v3539_v3 }
 0x8b1   :  { %v2725_v6 = vpop.permute.xlu1 %2724 }
 0x8b2   :  { %v2731_v36 = vsel %vm5475_vm5, %v2725_v6, %v2727_v63  ;;  %2981 = vmatmul.mubr.bf16.vlgmr.msra.gmra.mrb[24].mxu0 %v3536_v15  ;;  %v5482_v63 = vld [vmem:[#allocation10_spill] sm:$0xff] }
 0x8b3   :  { %2988 = vmatprep.mubr.bf16.mxu0 %v3539_v3  ;;  %2897 = vmatprep.subr.bf16.mxu1 %v2731_v36  ;;  %v1458_v36 = vld [vmem:[%s5400_s5] sm:$0xff] }
 0x8b5   :  { %v2723_v57 = vpop.permute.xlu1 %2722  ;;  %v2802_v31 = vld [vmem:[#allocation4 + $0x190] sm:$0xff] }
 0x8b6   :  { %v2730_v60 = vsel %vm5476_vm6, %v2723_v57, %v2725_v6  ;;  %3406 = vmatprep.subr.bf16.mxu0 %v2802_v31  ;;  %2885 = vmatmul.mubr.bf16.gmra.mrb[24].mxu1 %v3541_v48  ;;  %v1461_v57 = vld [vmem:[%s5400_s5 + $0x18] sm:$0xff] }
 0x8b7   :  { %3407 = vmatpush3.bf16.msra.mxu0 %v2802_v31  ;;  %2898 = vmatpush1.bf16.msra.mxu1 %v2730_v60  ;;  %v5101_v31 = vld [vmem:[%s5400_s5 + $0x8] sm:$0xff]  ;;  %v1465_v60 = vld [vmem:[%s5401_s6 + $0x18] sm:$0xff] }
 0x8b8   :  { %3408 = vmatprep.subr.bf16.mxu0 %v2805_v44  ;;  %2927 = vmatprep.mubr.bf16.mxu1 %v5477_v0 }
 0x8ba   :  { %2989 = vmatmul.mubr.bf16.gmra.mrb[28].mxu0 %v3541_v48  ;;  %v1460_v48 = vld [vmem:[%s5400_s5 + $0x10] sm:$0xff] }
 0x8bb   :  { %3409 = vmatpush3.bf16.msra.mxu0 %v2805_v44  ;;  %3410 = vmatprep.mubr.msk.bf16.mxu0 %vm365_vm12, %v3542_v4  ;;  %v1463_v44 = vld [vmem:[%s5401_s6 + $0x8] sm:$0xff] }
 0x8be   :  { %3288 = vmatmul.mubr.msk.bf16.vlgmr.msra.gmra.mrb[20].mxu1 %vm365_vm12, %v3542_v4 }
 0x8bf   :  { %2937 = vmatprep.mubr.bf16.mxu1 %v5477_v0 }
 0x8c2   :  { %3411 = vmatmul.mubr.msk.bf16.vlgmr.msra.gmra.mrb[32].mxu0 %vm365_vm12, %v3543_v24 }
 0x8c6   :  { %3289 = vmatmul.mubr.msk.bf16.gmra.mrb[24].mxu1 %vm365_vm12, %v3543_v24 }
 0x8d4   :  { %v1482_v47 = vpop.xlane.xlu0 %1481 }
 0x8f4   :  { %v1487_v40 = vpop.xlane.xlu1 %1486 }
 0x8f5   :  { %v1498_v58 = vadd.f32 %v1487_v40, %v1482_v47 }
 0x8f8   :  { %v1492_v46 = vpop.xlane.xlu1 %1491 }
 0x8f9   :  { %v1499_v1 = vadd.f32 %v1498_v58, %v1492_v46 }
 0x8fc   :  { %v1497_v54 = vpop.xlane.xlu1 %1496 }
 0x8fd   :  { %v1500_v39 = vadd.f32 %v1499_v1, %v1497_v54 }
 0x8ff   :  { %v1501_v25 = vrot.slane %v1500_v39, 4 }
 0x901   :  { %v1502_v26 = vadd.f32 %v1501_v25, %v1500_v39 }
 0x903   :  { %v1503_v51 = vrot.slane %v1502_v26, 2 }
 0x905   :  { %v1504_v55 = vadd.f32 %v1503_v51, %v1502_v26 }
 0x907   :  { %v1505_v53 = vrot.slane %v1504_v55, 1 }
 0x909   :  { %v1506_v5 = vadd.f32 %v1505_v53, %v1504_v55 }
 0x90b   :  { %v5033_v27 = vmul.f32 0.00012207031, %v1506_v5 }
 0x90d   :  { %v5037_v7 = vsub.f32 %v5478_v18, %v5033_v27  ;;  %v5041_v61 = vsub.f32 %v5479_v9, %v5033_v27  ;;  %v5045_v41 = vsub.f32 %v4494_v43, %v5033_v27  ;;  %v5049_v14 = vsub.f32 %v5480_v11, %v5033_v27 }
 0x90e   :  { %v5053_v42 = vsub.f32 %v5481_v22, %v5033_v27  ;;  %v5057_v23 = vsub.f32 %v5468_v34, %v5033_v27  ;;  %v5061_v12 = vsub.f32 %v5482_v63, %v5033_v27  ;;  %v5065_v43 = vsub.f32 %v5483_v20, %v5033_v27 }
 0x90f   :  { %v1520_v19 = vmul.f32 %v5037_v7, %v3790_v38  ;;  %v1521_v32 = vmul.f32 %v5041_v61, %v3794_v10  ;;  %v1522_v62 = vmul.f32 %v5045_v41, %v3788_v37  ;;  %v1526_v34 = vmul.f32 %v5049_v14, %v3790_v38 }
 0x910   :  { %v1527_v50 = vmul.f32 %v5053_v42, %v3794_v10  ;;  %v1528_v13 = vmul.f32 %v5057_v23, %v3788_v37  ;;  %v5082_v30 = vsub.f32 %v5484_v29, %v5033_v27  ;;  %v5086_v49 = vsub.f32 %v5485_v28, %v5033_v27 }
 0x911   :  { %v1532_v2 = vmul.f32 %v1520_v19, %v1520_v19  ;;  %v1533_v16 = vmul.f32 %v1521_v32, %v1521_v32  ;;  %v1534_v45 = vmul.f32 %v1522_v62, %v1522_v62  ;;  %v1538_v52 = vmul.f32 %v1526_v34, %v1526_v34 }
 0x912   :  { %v1539_v56 = vmul.f32 %v1527_v50, %v1527_v50  ;;  %v1540_v8 = vmul.f32 %v1528_v13, %v1528_v13 }
 0x913   :  { %v1544_v33 = vadd.f32 %v1533_v16, %v1532_v2  ;;  %v1545_v59 = vsel %vm365_vm12, %v1534_v45, 0.0 }
 0x914   :  { %v1554_v3 = vadd.f32 %v1539_v56, %v1538_v52  ;;  %v1555_v17 = vsel %vm365_vm12, %v1540_v8, 0.0 }
 0x915   :  { %v1546_v15 = vadd.f32 %v1545_v59, %v1544_v33 }
 0x916   :  { %v1556_v6 = vadd.f32 %v1555_v17, %v1554_v3 }
 0x917   :  { %1547 = vadd.xlane.f32.xlu1 %v1546_v15 }
 0x91b   :  { %1557 = vadd.xlane.f32.xlu1 %v1556_v6 }
 0x92c   :  { %1590 = vperm.xlu1 %3483, %v1458_v36  }
 0x930   :  { %1600 = vperm.xlu1 %3483, %v1460_v48  }
 0x934   :  { %1605 = vperm.xlu1 %3483, %v1461_v57  }
 0x938   :  { %3178 = vperm.xlu1 %3483, %v1458_v36  }
 0x93c   :  { %3183 = vperm.xlu1 %3483, %v5101_v31  }
 0x940   :  { %3188 = vperm.xlu1 %3483, %v1460_v48  }
 0x944   :  { %3193 = vperm.xlu1 %3483, %v1461_v57   ;;  %v5158_v57 = vsub.f32 %v5467_v21, %v5033_v27 }
 0x948   :  { %1627 = vperm.xlu1 %3483, %v1463_v44  }
 0x94c   :  { %1637 = vperm.xlu1 %3483, %v1465_v60  }
 0x950   :  { %3215 = vperm.xlu1 %3483, %v1463_v44  }
 0x954   :  { %3225 = vperm.xlu1 %3483, %v1465_v60  }
 0x985   :  { %v3362_v0 = vpop.f32.mrb[24].mxu0 }
 0x986   :  { %v3363_v4 = vpop.f32.mrb[25].mxu0 }
 0x987   :  { %v3364_v24 = vadd.f32 %v3363_v4, %v3362_v0  ;;  %v3365_v40 = vpop.f32.mrb[26].mxu0  ;;  %v1523_v0 = vmul.f32 %v5061_v12, %v3790_v38 }
 0x988   :  { %v3366_v47 = vpop.f32.mrb[27].mxu0 }
 0x989   :  { %v3367_v46 = vadd.f32 %v3366_v47, %v3365_v40  ;;  %v1525_v40 = vmul.f32 %v5158_v57, %v3788_v37  ;;  %v5170_v47 = vsub.f32 %v5470_v35, %v5033_v27 }
 0x98b   :  { %v1531_v35 = vmul.f32 %v5170_v47, %v3788_v37 }
 0x98d   :  { %v3368_v58 = vpop.f32.mrb[28].mxu0 }
 0x98e   :  { %v3369_v1 = vpop.f32.mrb[29].mxu0 }
 0x98f   :  { %v3370_v54 = vadd.f32 %v3369_v1, %v3368_v58  ;;  %v3371_v39 = vpop.f32.mrb[30].mxu0  ;;  %v1535_v58 = vmul.f32 %v1523_v0, %v1523_v0 }
 0x990   :  { %v3372_v25 = vpop.f32.mrb[31].mxu0 }
 0x991   :  { %v3373_v26 = vadd.f32 %v3372_v25, %v3371_v39  ;;  %v5110_v51 = vpop.f32.mrb[20].mxu1  ;;  %v1529_v39 = vmul.f32 %v5082_v30, %v3790_v38  ;;  %v1530_v25 = vmul.f32 %v5086_v49, %v3794_v10 }
 0x992   :  { %v3054_v55 = vmul.f32 %v5110_v51, %v3790_v38  ;;  %v5114_v53 = vpop.f32.mrb[21].mxu1 }
 0x993   :  { %v3055_v5 = vmul.f32 %v5114_v53, %v3794_v10  ;;  %v5118_v18 = vpop.f32.mrb[22].mxu1 }
 0x994   :  { %v3057_v9 = vmul.f32 %v5118_v18, %v3790_v38  ;;  %v5122_v11 = vpop.f32.mrb[23].mxu1 }
 0x995   :  { %v3412_v22 = vpop.f32.mrb[32].mxu0  ;;  %v3066_v63 = vadd.f32 %v3055_v5, %v3054_v55  ;;  %v3058_v20 = vmul.f32 %v5122_v11, %v3794_v10 }
 0x996   :  { %v5126_v19 = vadd.f32 %v3412_v22, %v3370_v54  ;;  %v3031_v32 = vpop.f32.mrb[33].mxu0  ;;  %v1542_v22 = vmul.f32 %v1530_v25, %v1530_v25 }
 0x997   :  { %v5128_v62 = vadd.f32 %v3364_v24, %v3031_v32  ;;  %v3413_v34 = vpop.f32.mrb[34].mxu0  ;;  %v3071_v50 = vadd.f32 %v3058_v20, %v3057_v9  ;;  %v1524_v24 = vmul.f32 %v5065_v43, %v3794_v10  ;;  %v1541_v9 = vmul.f32 %v1529_v39, %v1529_v39 }
 0x998   :  { %v5130_v13 = vadd.f32 %v3413_v34, %v3373_v26  ;;  %v3034_v2 = vpop.f32.mrb[35].mxu0  ;;  %v3062_v44 = vmul.f32 %v5126_v19, %v3788_v37  ;;  %v1537_v26 = vmul.f32 %v1525_v40, %v1525_v40  ;;  %v1543_v20 = vmul.f32 %v1531_v35, %v1531_v35 }
 0x999   :  { %v3056_v16 = vmul.f32 %v5128_v62, %v3788_v37  ;;  %v5134_v45 = vadd.f32 %v3367_v46, %v3034_v2  ;;  %v5136_v52 = vpop.f32.mrb[24].mxu1  ;;  %v1536_v54 = vmul.f32 %v1524_v24, %v1524_v24  ;;  %v1559_v34 = vadd.f32 %v1542_v22, %v1541_v9 }
 0x99a   :  { %v3060_v56 = vmul.f32 %v5136_v52, %v3790_v38  ;;  %v5140_v8 = vpop.f32.mrb[25].mxu1  ;;  %v3077_v21 = vsel %vm365_vm12, %v3062_v44, 0.0  ;;  %v3065_v46 = vmul.f32 %v5130_v13, %v3788_v37 }
 0x99b   :  { %v3067_v33 = vsel %vm365_vm12, %v3056_v16, 0.0  ;;  %v3059_v59 = vmul.f32 %v5134_v45, %v3788_v37  ;;  %v3061_v29 = vmul.f32 %v5140_v8, %v3794_v10  ;;  %v5147_v15 = vpop.f32.mrb[26].mxu1  ;;  %v1549_v5 = vadd.f32 %v1536_v54, %v1535_v58 }
 0x99c   :  { %v3068_v3 = vadd.f32 %v3067_v33, %v3066_v63  ;;  %v3063_v28 = vmul.f32 %v5147_v15, %v3790_v38  ;;  %v5151_v17 = vpop.f32.mrb[27].mxu1  ;;  %v3082_v27 = vsel %vm365_vm12, %v3065_v46, 0.0  ;;  %v1550_v63 = vsel %vm365_vm12, %v1537_v26, 0.0 }
 0x99d   :  { %v3072_v6 = vsel %vm365_vm12, %v3059_v59, 0.0  ;;  %v3076_v36 = vadd.f32 %v3061_v29, %v3060_v56  ;;  %v3064_v48 = vmul.f32 %v5151_v17, %v3794_v10  ;;  %v1551_v32 = vadd.f32 %v1550_v63, %v1549_v5 }
 0x99e   :  { %3069 = vadd.xlane.f32.xlu0 %v3068_v3  ;;  %v3073_v4 = vadd.f32 %v3072_v6, %v3071_v50  ;;  %v1560_v50 = vsel %vm365_vm12, %v1543_v20, 0.0 }
 0x99f   :  { %v3081_v60 = vadd.f32 %v3064_v48, %v3063_v28  ;;  %v3078_v1 = vadd.f32 %v3077_v21, %v3076_v36  ;;  %v1561_v2 = vadd.f32 %v1560_v50, %v1559_v34 }
 0x9a1   :  { %v3083_v55 = vadd.f32 %v3082_v27, %v3081_v60 }
 0x9a2   :  { %3074 = vadd.xlane.f32.xlu0 %v3073_v4 }
 0x9a4   :  { %v1548_v16 = vpop.xlane.xlu1 %1547 }
 0x9a6   :  { %3079 = vadd.xlane.f32.xlu0 %v3078_v1 }
 0x9a8   :  { %v1558_v56 = vpop.xlane.xlu1 %1557 }
 0x9aa   :  { %3084 = vadd.xlane.f32.xlu0 %v3083_v55 }
 0x9ac   :  { %v5185_v29 = vpop.permute.xlu1 %1590 }
 0x9ae   :  { %1552 = vadd.xlane.f32.xlu0 %v1551_v32 }
 0x9b0   :  { %v5187_v6 = vpop.permute.xlu1 %1600 }
 0x9b2   :  { %1562 = vadd.xlane.f32.xlu0 %v1561_v2 }
 0x9b4   :  { %v5189_v4 = vpop.permute.xlu1 %1605 }
 0x9b8   :  { %v5191_v54 = vpop.permute.xlu1 %3178 }
 0x9bc   :  { %v5193_v5 = vpop.permute.xlu1 %3183 }
 0x9c8   :  { %1595 = vperm.xlu0 %3484, %v5101_v31  }
 0xa2b   :  { %v3070_v33 = vpop.xlane.xlu0 %3069 }
 0xa2f   :  { %v3075_v59 = vpop.xlane.xlu0 %3074 }
 0xa30   :  { %v3086_v28 = vadd.f32 %v3075_v59, %v3070_v33 }
 0xa33   :  { %v3080_v3 = vpop.xlane.xlu0 %3079 }
 0xa34   :  { %v3087_v36 = vadd.f32 %v3086_v28, %v3080_v3 }
 0xa37   :  { %v3085_v48 = vpop.xlane.xlu0 %3084 }
 0xa38   :  { %v3088_v44 = vadd.f32 %v3087_v36, %v3085_v48 }
 0xa3a   :  { %v3089_v60 = vrot.slane %v3088_v44, 4 }
 0xa3b   :  { %v1553_v0 = vpop.xlane.xlu0 %1552 }
 0xa3c   :  { %v3090_v24 = vadd.f32 %v3089_v60, %v3088_v44  ;;  %v1564_v40 = vadd.f32 %v1553_v0, %v1548_v16  ;;  %v5234_v60 = vpop.permute.xlu1 %3188 }
 0xa3e   :  { %v3091_v31 = vrot.slane %v3090_v24, 2  ;;  %v1565_v21 = vadd.f32 %v1564_v40, %v1558_v56 }
 0xa3f   :  { %v1563_v46 = vpop.xlane.xlu0 %1562 }
 0xa40   :  { %v3092_v58 = vadd.f32 %v3091_v31, %v3090_v24  ;;  %v1566_v1 = vadd.f32 %v1565_v21, %v1563_v46 }
 0xa42   :  { %v3093_v39 = vrot.slane %v3092_v58, 1  ;;  %v1567_v25 = vrot.slane %v1566_v1, 4 }
 0xa44   :  { %v3094_v26 = vadd.f32 %v3093_v39, %v3092_v58  ;;  %v1568_v35 = vadd.f32 %v1567_v25, %v1566_v1 }
 0xa46   :  { %v3095_v27 = vmul.f32 0.00012207031, %v3094_v26  ;;  %v1569_v55 = vrot.slane %v1568_v35, 2 }
 0xa48   :  { %v1570_v9 = vadd.f32 %v1569_v55, %v1568_v35  ;;  %v5196_v22 = vsub.f32 %v5110_v51, %v3095_v27  ;;  %v5199_v63 = vsub.f32 %v5114_v53, %v3095_v27  ;;  %v5202_v20 = vsub.f32 %v5128_v62, %v3095_v27 }
 0xa49   :  { %v5205_v32 = vsub.f32 %v5118_v18, %v3095_v27  ;;  %v5208_v34 = vsub.f32 %v5122_v11, %v3095_v27  ;;  %v5211_v50 = vsub.f32 %v5134_v45, %v3095_v27  ;;  %v5214_v2 = vsub.f32 %v5136_v52, %v3095_v27 }
 0xa4a   :  { %v1571_v51 = vrot.slane %v1570_v9, 1  ;;  %v3108_v53 = vmul.f32 %v5196_v22, %v3790_v38  ;;  %v3109_v62 = vmul.f32 %v5199_v63, %v3794_v10  ;;  %v3110_v18 = vmul.f32 %v5202_v20, %v3788_v37 }
 0xa4b   :  { %v3111_v11 = vmul.f32 %v5205_v32, %v3790_v38  ;;  %v3112_v45 = vmul.f32 %v5208_v34, %v3794_v10  ;;  %v3113_v52 = vmul.f32 %v5211_v50, %v3788_v37  ;;  %v5229_v16 = vsub.f32 %v5140_v8, %v3095_v27 }
 0xa4c   :  { %v1572_v56 = vadd.f32 %v1571_v51, %v1570_v9  ;;  %v3120_v33 = vmul.f32 %v3108_v53, %v3108_v53  ;;  %v3121_v59 = vmul.f32 %v3109_v62, %v3109_v62  ;;  %v3122_v3 = vmul.f32 %v3110_v18, %v3110_v18 }
 0xa4d   :  { %v3123_v28 = vmul.f32 %v3111_v11, %v3111_v11  ;;  %v3124_v36 = vmul.f32 %v3112_v45, %v3112_v45  ;;  %v3125_v48 = vmul.f32 %v3113_v52, %v3113_v52  ;;  %v5232_v44 = vsub.f32 %v5126_v19, %v3095_v27 }
 0xa4e   :  { %v1573_v0 = vmul.f32 0.00012207031, %v1572_v56  ;;  %v3132_v24 = vadd.f32 %v3121_v59, %v3120_v33  ;;  %v3133_v40 = vsel %vm365_vm12, %v3122_v3, 0.0  ;;  %v3114_v8 = vmul.f32 %v5214_v2, %v3790_v38 }
 0xa4f   :  { %v3137_v31 = vadd.f32 %v3124_v36, %v3123_v28  ;;  %v3115_v21 = vmul.f32 %v5229_v16, %v3794_v10  ;;  %v3116_v46 = vmul.f32 %v5232_v44, %v3788_v37  ;;  %v5244_v39 = vsub.f32 %v5147_v15, %v3095_v27  ;;  %v5257_v15 = vpop.permute.xlu1 %3193 }
 0xa50   :  { %v1574_v58 = vadd.f32 1e-05, %v1573_v0  ;;  %v3134_v1 = vadd.f32 %v3133_v40, %v3132_v24  ;;  %v3126_v19 = vmul.f32 %v3114_v8, %v3114_v8  ;;  %v3138_v25 = vsel %vm365_vm12, %v3125_v48, 0.0  ;;  %v1596_v48 = vpop.permute.xlu0 %1595 }
 0xa51   :  { %v3127_v26 = vmul.f32 %v3115_v21, %v3115_v21  ;;  %v3128_v35 = vmul.f32 %v3116_v46, %v3116_v46  ;;  %v5248_v55 = vsub.f32 %v5151_v17, %v3095_v27  ;;  %v5251_v9 = vsub.f32 %v5130_v13, %v3095_v27 }
 0xa52   :  { %3644 = vrsqrt.f32 %v1574_v58  ;;  %3135 = vadd.xlane.f32.xlu0 %v3134_v1  ;;  %v3117_v51 = vmul.f32 %v5244_v39, %v3790_v38  ;;  %v3139_v62 = vadd.f32 %v3138_v25, %v3137_v31 }
 0xa53   :  { %v3118_v53 = vmul.f32 %v5248_v55, %v3794_v10  ;;  %v3142_v18 = vadd.f32 %v3127_v26, %v3126_v19  ;;  %v3119_v11 = vmul.f32 %v5251_v9, %v3788_v37  ;;  %v3143_v45 = vsel %vm365_vm12, %v3128_v35, 0.0  ;;  %v1628_v33 = vpop.permute.xlu1 %1627 }
 0xa54   :  { %v3129_v17 = vmul.f32 %v3117_v51, %v3117_v51 }
 0xa55   :  { %v3130_v52 = vmul.f32 %v3118_v53, %v3118_v53  ;;  %v3131_v13 = vmul.f32 %v3119_v11, %v3119_v11  ;;  %v3144_v27 = vadd.f32 %v3143_v45, %v3142_v18 }
 0xa56   :  { %3140 = vadd.xlane.f32.xlu0 %v3139_v62 }
 0xa57   :  { %v3147_v56 = vadd.f32 %v3130_v52, %v3129_v17  ;;  %v3148_v38 = vsel %vm365_vm12, %v3131_v13, 0.0  ;;  %v1638_v46 = vpop.permute.xlu1 %1637 }
 0xa59   :  { %v3149_v59 = vadd.f32 %v3148_v38, %v3147_v56 }
 0xa5a   :  { %3145 = vadd.xlane.f32.xlu0 %v3144_v27 }
 0xa5c   :  { %v3645_v10 = vpop.eup %3644 }
 0xa5d   :  { %v1579_v3 = vmul.f32 %v3645_v10, %v5061_v12  ;;  %v1580_v28 = vmul.f32 %v3645_v10, %v5065_v43  ;;  %v1581_v37 = vmul.f32 %v3645_v10, %v5158_v57  ;;  %v1585_v36 = vmul.f32 %v3645_v10, %v5082_v30 }
 0xa5e   :  { %v1586_v0 = vmul.f32 %v3645_v10, %v5086_v49  ;;  %v1587_v24 = vmul.f32 %v3645_v10, %v5170_v47  ;;  %3150 = vadd.xlane.f32.xlu0 %v3149_v59  ;;  %v1462_v49 = vld [vmem:[%s5401_s6] sm:$0xff]  ;;  %v1464_v47 = vld [vmem:[%s5401_s6 + $0x10] sm:$0xff]  ;;  %v1576_v11 = vmul.f32 %v3645_v10, %v5037_v7  ;;  %v1577_v17 = vmul.f32 %v3645_v10, %v5041_v61 }
 0xa5f   :  { %v1611_v40 = vmul.f32 %v1596_v48, %v1579_v3  ;;  %v1612_v8 = vmul.f32 %v1596_v48, %v1580_v28  ;;  %v1613_v31 = vmul.f32 %v1596_v48, %v1581_v37  ;;  %v1617_v21 = vmul.f32 %v5189_v4, %v1585_v36 }
 0xa60   :  { %v1618_v12 = vmul.f32 %v5189_v4, %v1586_v0  ;;  %v1619_v43 = vmul.f32 %v5189_v4, %v1587_v24  ;;  %v1578_v45 = vmul.f32 %v3645_v10, %v5045_v41  ;;  %v1608_v27 = vmul.f32 %v5185_v29, %v1576_v11 }
 0xa61   :  { %v1643_v58 = vadd.f32 %v1628_v33, %v1611_v40  ;;  %v1644_v57 = vadd.f32 %v1628_v33, %v1612_v8  ;;  %v1645_v1 = vadd.f32 %v1628_v33, %v1613_v31  ;;  %v1649_v30 = vadd.f32 %v1638_v46, %v1617_v21  ;;  %v3216_v31 = vpop.permute.xlu1 %3215 }
 0xa62   :  { %v1650_v19 = vadd.f32 %v1638_v46, %v1618_v12  ;;  %v1651_v25 = vadd.f32 %v1638_v46, %v1619_v43  ;;  %v1609_v56 = vmul.f32 %v5185_v29, %v1577_v17  ;;  %v1610_v38 = vmul.f32 %v5185_v29, %v1578_v45 }
 0xa63   :  { %1655 = vst [vmem:[%s5402_s8 + $0x18] sm:$0xff] %v1643_v58  ;;  %1656 = vst [vmem:[%s5402_s8 + $0x20] sm:$0xff] %v1644_v57  ;;  %v1582_v59 = vmul.f32 %v3645_v10, %v5049_v14  ;;  %v1583_v3 = vmul.f32 %v3645_v10, %v5053_v42  ;;  %v1584_v28 = vmul.f32 %v3645_v10, %v5057_v23 }
 0xa64   :  { %1657 = vst.msk [vmem:[%s5402_s8 + $0x28] sm:$0xff] %vm365_vm12, %v1645_v1  ;;  %1661 = vst [vmem:[%s5402_s8 + $0x48] sm:$0xff] %v1649_v30 }
 0xa65   :  { %1662 = vst [vmem:[%s5402_s8 + $0x50] sm:$0xff] %v1650_v19  ;;  %1663 = vst.msk [vmem:[%s5402_s8 + $0x58] sm:$0xff] %vm365_vm12, %v1651_v25  ;;  %v1614_v14 = vmul.f32 %v5187_v6, %v1582_v59  ;;  %v1615_v42 = vmul.f32 %v5187_v6, %v1583_v3  ;;  %v1616_v23 = vmul.f32 %v5187_v6, %v1584_v28 }
 0xa74   :  { %1622 = vperm.xlu0 %3484, %v1462_v49  }
 0xa78   :  { %1632 = vperm.xlu0 %3484, %v1464_v47  }
 0xa7c   :  { %3210 = vperm.xlu0 %3484, %v1462_v49  }
 0xa80   :  { %3220 = vperm.xlu0 %3484, %v1464_v47   ;;  %v3226_v47 = vpop.permute.xlu1 %3225 }
 0xadf   :  { %v3136_v4 = vpop.xlane.xlu0 %3135 }
 0xae3   :  { %v3141_v26 = vpop.xlane.xlu0 %3140 }
 0xae4   :  { %v3152_v51 = vadd.f32 %v3141_v26, %v3136_v4 }
 0xae7   :  { %v3146_v35 = vpop.xlane.xlu0 %3145 }
 0xae8   :  { %v3153_v53 = vadd.f32 %v3152_v51, %v3146_v35 }
 0xaeb   :  { %v3151_v62 = vpop.xlane.xlu0 %3150 }
 0xaec   :  { %v3154_v18 = vadd.f32 %v3153_v53, %v3151_v62 }
 0xaee   :  { %v3155_v52 = vrot.slane %v3154_v18, 4 }
 0xaf0   :  { %v3156_v13 = vadd.f32 %v3155_v52, %v3154_v18 }
 0xaf2   :  { %v3157_v33 = vrot.slane %v3156_v13, 2 }
 0xaf3   :  { %v1623_v7 = vpop.permute.xlu0 %1622 }
 0xaf4   :  { %v3158_v37 = vadd.f32 %v3157_v33, %v3156_v13  ;;  %v1640_v61 = vadd.f32 %v1623_v7, %v1608_v27  ;;  %v1641_v36 = vadd.f32 %v1623_v7, %v1609_v56  ;;  %v1642_v41 = vadd.f32 %v1623_v7, %v1610_v38 }
 0xaf6   :  { %v3159_v48 = vrot.slane %v3158_v37, 1  ;;  %1652 = vst [vmem:[%s5402_s8] sm:$0xff] %v1640_v61  ;;  %1653 = vst [vmem:[%s5402_s8 + $0x8] sm:$0xff] %v1641_v36 }
 0xaf7   :  { %1654 = vst.msk [vmem:[%s5402_s8 + $0x10] sm:$0xff] %vm365_vm12, %v1642_v41  ;;  %v1633_v29 = vpop.permute.xlu0 %1632 }
 0xaf8   :  { %v3160_v10 = vadd.f32 %v3159_v48, %v3158_v37  ;;  %v1646_v0 = vadd.f32 %v1633_v29, %v1614_v14  ;;  %v1647_v24 = vadd.f32 %v1633_v29, %v1615_v42  ;;  %v1648_v40 = vadd.f32 %v1633_v29, %v1616_v23 }
 0xafa   :  { %v3161_v8 = vmul.f32 0.00012207031, %v3160_v10  ;;  %1658 = vst [vmem:[%s5402_s8 + $0x30] sm:$0xff] %v1646_v0  ;;  %1659 = vst [vmem:[%s5402_s8 + $0x38] sm:$0xff] %v1647_v24 }
 0xafb   :  { %1660 = vst.msk [vmem:[%s5402_s8 + $0x40] sm:$0xff] %vm365_vm12, %v1648_v40 }
 0xafc   :  { %v3162_v6 = vadd.f32 1e-05, %v3161_v8 }
 0xafe   :  { %3646 = vrsqrt.f32 %v3162_v6 }
 0xb08   :  { %v3647_v21 = vpop.eup %3646 }
 0xb09   :  { %v3167_v46 = vmul.f32 %v3647_v21, %v5205_v32  ;;  %v3168_v12 = vmul.f32 %v3647_v21, %v5208_v34  ;;  %v3169_v43 = vmul.f32 %v3647_v21, %v5211_v50  ;;  %v3173_v58 = vmul.f32 %v3647_v21, %v5244_v39 }
 0xb0a   :  { %v3174_v57 = vmul.f32 %v3647_v21, %v5248_v55  ;;  %v3175_v1 = vmul.f32 %v3647_v21, %v5251_v9  ;;  %v3164_v30 = vmul.f32 %v3647_v21, %v5196_v22  ;;  %v3165_v19 = vmul.f32 %v3647_v21, %v5199_v63  ;;  %v3211_v9 = vpop.permute.xlu0 %3210 }
 0xb0b   :  { %v3199_v25 = vmul.f32 %v5193_v5, %v3167_v46  ;;  %v3200_v49 = vmul.f32 %v5193_v5, %v3168_v12  ;;  %v3201_v32 = vmul.f32 %v5193_v5, %v3169_v43  ;;  %v3205_v34 = vmul.f32 %v5257_v15, %v3173_v58 }
 0xb0c   :  { %v3206_v50 = vmul.f32 %v5257_v15, %v3174_v57  ;;  %v3207_v39 = vmul.f32 %v5257_v15, %v3175_v1  ;;  %v3166_v55 = vmul.f32 %v3647_v21, %v5202_v20  ;;  %v3196_v22 = vmul.f32 %v5191_v54, %v3164_v30 }
 0xb0d   :  { %v3231_v4 = vadd.f32 %v3216_v31, %v3199_v25  ;;  %v3232_v63 = vadd.f32 %v3216_v31, %v3200_v49  ;;  %v3233_v26 = vadd.f32 %v3216_v31, %v3201_v32  ;;  %v3237_v35 = vadd.f32 %v3226_v47, %v3205_v34 }
 0xb0e   :  { %v3238_v51 = vadd.f32 %v3226_v47, %v3206_v50  ;;  %v3239_v53 = vadd.f32 %v3226_v47, %v3207_v39  ;;  %v3197_v5 = vmul.f32 %v5191_v54, %v3165_v19  ;;  %v3198_v62 = vmul.f32 %v5191_v54, %v3166_v55  ;;  %v3221_v45 = vpop.permute.xlu0 %3220 }
 0xb0f   :  { %3295 = vst [vmem:[%s5402_s8 + $0x78] sm:$0xff] %v3231_v4  ;;  %3296 = vst [vmem:[%s5402_s8 + $0x80] sm:$0xff] %v3232_v63  ;;  %v3228_v20 = vadd.f32 %v3211_v9, %v3196_v22  ;;  %v3170_v54 = vmul.f32 %v3647_v21, %v5214_v2  ;;  %v3171_v15 = vmul.f32 %v3647_v21, %v5229_v16 }
 0xb10   :  { %3297 = vst.msk [vmem:[%s5402_s8 + $0x88] sm:$0xff] %vm365_vm12, %v3233_v26  ;;  %3301 = vst [vmem:[%s5402_s8 + $0xa8] sm:$0xff] %v3237_v35  ;;  %v3172_v18 = vmul.f32 %v3647_v21, %v5232_v44  ;;  %v3229_v11 = vadd.f32 %v3211_v9, %v3197_v5  ;;  %v3230_v17 = vadd.f32 %v3211_v9, %v3198_v62 }
 0xb11   :  { %3302 = vst [vmem:[%s5402_s8 + $0xb0] sm:$0xff] %v3238_v51  ;;  %3303 = vst.msk [vmem:[%s5402_s8 + $0xb8] sm:$0xff] %vm365_vm12, %v3239_v53  ;;  %v3202_v2 = vmul.f32 %v5234_v60, %v3170_v54  ;;  %v3203_v16 = vmul.f32 %v5234_v60, %v3171_v15 }
 0xb12   :  { %3292 = vst [vmem:[%s5402_s8 + $0x60] sm:$0xff] %v3228_v20  ;;  %v3204_v44 = vmul.f32 %v5234_v60, %v3172_v18  ;;  %3293 = vst [vmem:[%s5402_s8 + $0x68] sm:$0xff] %v3229_v11 }
 0xb13   :  { %3294 = vst.msk [vmem:[%s5402_s8 + $0x70] sm:$0xff] %vm365_vm12, %v3230_v17  ;;  %v3234_v52 = vadd.f32 %v3221_v45, %v3202_v2  ;;  %v3235_v13 = vadd.f32 %v3221_v45, %v3203_v16 }
 0xb14   :  { %v3236_v27 = vadd.f32 %v3221_v45, %v3204_v44 }
 0xb15   :  { %3298 = vst [vmem:[%s5402_s8 + $0x90] sm:$0xff] %v3234_v52  ;;  %3299 = vst [vmem:[%s5402_s8 + $0x98] sm:$0xff] %v3235_v13 }
 0xb16   :  { %3300 = vst.msk [vmem:[%s5402_s8 + $0xa0] sm:$0xff] %vm365_vm12, %v3236_v27 }

</bundles_post_ra>
